<compile_context>
chip_gen: v6e
topology: v6e:2x2x1
jax: 0.10.0
libtpu: 0.0.40
codegen_flags: <defaults>
</compile_context>

<pallas_src>
import jax
import jax.numpy as jnp
from jax.experimental import pallas as pl
from jax.experimental.pallas import tpu as pltpu
import numpy as np

# ----- model configuration (consistent with the module defaults) -----
D_MODEL = 64
PE_DIM = 8
PE_DIM_IN = 20
FEATURE_DIM = 8
EDGE_DIM = 4
IN_DIM = FEATURE_DIM + PE_DIM_IN + EDGE_DIM     # 32 (fused embedding operand)
CLASSES = 3
CLS_PAD = 128            # lane-dense padded class dim (sliced back to 3)
NUM_LAYERS = 3           # num_layers (kept small for the synthetic run)
BN_EPS = 1e-5
LN_EPS = 1e-5
GINE_EPS = 0.0           # GINEConv default eps (== 0 -> multiply elided)

# ----- batching geometry (one grid step == one graph block) -----
NODES_PER_GRAPH = 8
EDGES_PER_GRAPH = 16
GRAPHS_PER_BLOCK = 16
NODES_PER_BLOCK = GRAPHS_PER_BLOCK * NODES_PER_GRAPH      # 128
EDGES_PER_BLOCK = GRAPHS_PER_BLOCK * EDGES_PER_GRAPH      # 256
N_BLOCKS = 2                                              # grid size


def graph_model_kernel(
    # per-block (streaming) graph data
    comb_ref,        # [1, N+E, 32] f32   ([x|pe|0] rows then [0|eattr] rows)
    src_oh_ref,      # [1, E, N]    bf16  one-hot gather
    dst_ohT_ref,     # [1, N, E]    bf16  pre-transposed one-hot scatter
    pool_ohT_ref,    # [1, G, N]    bf16  pre-transposed pooling one-hot
    # resident parameters (constant index_map -> fetched once)
    emb_w_ref,       # [32, D]      f32   fused node/pe/edge embedding block
    misc_b_ref,      # [4, D]       f32   node/pe bias, edge bias, fin_b lo/hi
    w_gine_ref,      # [L, 2, D, D] bf16
    w_mlp1_ref,      # [L, D, 2D]   bf16
    w_mlp2_ref,      # [L, 2D, D]   bf16
    layer_b_ref,     # [L, 7, D]    f32   ln_g, ln_b, gb1, gb2, mlp_b2, mb1_lo, mb1_hi
    fin_w_ref,       # [D, 128]     bf16
    # output
    out_ref,         # [1, G, 128]  f32
):
    f32 = jnp.float32
    bf16 = jnp.bfloat16
    N = NODES_PER_BLOCK

    misc = misc_b_ref[...]                                   # [4, D] f32

    # ---- fused node/pe + edge embedding: ONE f32 matmul (tiny K) ----
    comb = comb_ref[0]                                       # [N+E, 32] f32
    emb = jnp.dot(comb, emb_w_ref[...], preferred_element_type=f32)
    h = emb[:N, :] + misc[0:1, :]                            # [N, D]
    eattr = emb[N:, :] + misc[1:2, :]                        # [E, D]

    src_oh = src_oh_ref[0]                                   # [E, N] bf16
    dst_ohT = dst_ohT_ref[0]                                 # [N, E] bf16

    for l in range(NUM_LAYERS):
        bb = layer_b_ref[l]                                  # [7, D] f32
        ln_g, ln_b = bb[0:1, :], bb[1:2, :]
        gine_b1, gine_b2, mlp_b2 = bb[2:3, :], bb[3:4, :], bb[4:5, :]
        mlp_b1 = jnp.concatenate([bb[5:6, :], bb[6:7, :]], axis=-1)   # [1, 2D]

        # ---- LayerNorm with independent cross-lane reductions ----
        mu = jnp.mean(h, axis=-1, keepdims=True)
        ms = jnp.mean(h * h, axis=-1, keepdims=True)
        var = ms - mu * mu
        z = (h - mu) * jax.lax.rsqrt(var + LN_EPS) * ln_g + ln_b
        z16 = z.astype(bf16)

        # ---- GINE conv: gather / scatter-add as bf16 MXU matmuls ----
        z_src = jnp.dot(src_oh, z16, preferred_element_type=f32)        # [E, D]
        msg = jnp.maximum(z_src + eattr, 0.0)
        aggr = jnp.dot(dst_ohT, msg.astype(bf16),
                       preferred_element_type=f32)                      # [N, D]
        g = z + aggr                              # eps == 0 -> (1+eps)*z == z
        g = jnp.maximum(
            jnp.dot(g.astype(bf16), w_gine_ref[l, 0],
                    preferred_element_type=f32) + gine_b1, 0.0)
        zz = (jnp.dot(g.astype(bf16), w_gine_ref[l, 1],
                      preferred_element_type=f32) + gine_b2)

        # post_seq_model is None -> z = h_local ; dropout(p=0) is identity

        # ---- per-layer MLP with residual ----
        m = jnp.maximum(
            jnp.dot(zz.astype(bf16), w_mlp1_ref[l],
                    preferred_element_type=f32) + mlp_b1, 0.0)
        m = (jnp.dot(m.astype(bf16), w_mlp2_ref[l],
                     preferred_element_type=f32) + mlp_b2)
        h = m + zz

    # ---- global_add_pool (pre-transposed one-hot) + final linear ----
    pooled = jnp.dot(pool_ohT_ref[0], h.astype(bf16),
                     preferred_element_type=f32)                         # [G, D]
    fin_b = jnp.concatenate([misc[2:3, :], misc[3:4, :]], axis=-1)       # [1, 128]
    out_ref[0] = (jnp.dot(pooled.astype(bf16), fin_w_ref[...],
                          preferred_element_type=f32) + fin_b)


def run_graph_model(args):
    N, E, G, D = NODES_PER_BLOCK, EDGES_PER_BLOCK, GRAPHS_PER_BLOCK, D_MODEL
    block = lambda b: (b, 0, 0)       # graph data / output advance with grid
    const2 = lambda b: (0, 0)         # resident weights: fetched once
    const3 = lambda b: (0, 0, 0)
    const4 = lambda b: (0, 0, 0, 0)

    grid_spec = pltpu.PrefetchScalarGridSpec(
        num_scalar_prefetch=0,
        grid=(N_BLOCKS,),
        in_specs=[
            pl.BlockSpec((1, N + E, IN_DIM), block),
            pl.BlockSpec((1, E, N), block),
            pl.BlockSpec((1, N, E), block),
            pl.BlockSpec((1, G, N), block),
            pl.BlockSpec((IN_DIM, D), const2),
            pl.BlockSpec((4, D), const2),
            pl.BlockSpec((NUM_LAYERS, 2, D, D), const4),
            pl.BlockSpec((NUM_LAYERS, D, 2 * D), const3),
            pl.BlockSpec((NUM_LAYERS, 2 * D, D), const3),
            pl.BlockSpec((NUM_LAYERS, 7, D), const3),
            pl.BlockSpec((D, CLS_PAD), const2),
        ],
        out_specs=pl.BlockSpec((1, G, CLS_PAD), block),
    )
    out = pl.pallas_call(
        graph_model_kernel,
        out_shape=jax.ShapeDtypeStruct((N_BLOCKS, G, CLS_PAD), jnp.float32),
        grid_spec=grid_spec,
        compiler_params=pltpu.CompilerParams(dimension_semantics=("parallel",)),
    )(*args)
    return out[:, :, :CLASSES].reshape(N_BLOCKS * G, CLASSES)


# ---------------------------------------------------------------------------
# pure-JAX f32 reference (gather / segment_sum path) for validation
# ---------------------------------------------------------------------------
def _layernorm_ref(x, gamma, beta):
    mu = jnp.mean(x, axis=-1, keepdims=True)
    var = jnp.mean((x - mu) ** 2, axis=-1, keepdims=True)
    return (x - mu) * jax.lax.rsqrt(var + LN_EPS) * gamma + beta


def reference_block(x, pe, edge_attr, src, dst, batch, p):
    x_pe = (pe - p["bn_m"]) / jnp.sqrt(p["bn_v"] + BN_EPS) * p["bn_g"] + p["bn_b"]
    h = jnp.concatenate([x @ p["node_w"] + p["node_b"],
                         x_pe @ p["pe_w"] + p["pe_b"]], axis=1)
    eattr = edge_attr @ p["edge_w"] + p["edge_b"]
    for l in range(NUM_LAYERS):
        z = _layernorm_ref(h, p["ln_g"][l], p["ln_b"][l])
        msg = jnp.maximum(z[src] + eattr, 0.0)
        aggr = jax.ops.segment_sum(msg, dst, num_segments=NODES_PER_BLOCK)
        g = (1.0 + GINE_EPS) * z + aggr
        g = jnp.maximum(g @ p["gine_w1"][l] + p["gine_b1"][l], 0.0)
        zz = g @ p["gine_w2"][l] + p["gine_b2"][l]
        m = jnp.maximum(zz @ p["mlp_w1"][l] + p["mlp_b1"][l], 0.0)
        m = m @ p["mlp_w2"][l] + p["mlp_b2"][l]
        h = m + zz
    pooled = jax.ops.segment_sum(h, batch, num_segments=GRAPHS_PER_BLOCK)
    return pooled @ p["fin_w"] + p["fin_b"]


def make_params(key):
    ks = iter(jax.random.split(key, 32))
    nrm = lambda shape, s=0.1: s * jax.random.normal(next(ks), shape, jnp.float32)
    D, D2, L = D_MODEL, 2 * D_MODEL, NUM_LAYERS
    p = dict(
        bn_g=1.0 + nrm((PE_DIM_IN,)),
        bn_b=nrm((PE_DIM_IN,)),
        bn_m=nrm((PE_DIM_IN,)),
        bn_v=1.0 + jnp.abs(nrm((PE_DIM_IN,))),
        node_w=nrm((FEATURE_DIM, D - PE_DIM)), node_b=nrm((D - PE_DIM,)),
        pe_w=nrm((PE_DIM_IN, PE_DIM)), pe_b=nrm((PE_DIM,)),
        edge_w=nrm((EDGE_DIM, D)), edge_b=nrm((D,)),
        ln_g=1.0 + nrm((L, D)), ln_b=nrm((L, D)),
        gine_w1=nrm((L, D, D)), gine_b1=nrm((L, D)),
        gine_w2=nrm((L, D, D)), gine_b2=nrm((L, D)),
        mlp_w1=nrm((L, D, D2)), mlp_b1=nrm((L, D2)),
        mlp_w2=nrm((L, D2, D)), mlp_b2=nrm((L, D)),
        fin_w=nrm((D, CLASSES)), fin_b=nrm((CLASSES,)),
    )
    return {k: v.astype(jnp.float32) for k, v in p.items()}


def pack_kernel_inputs(p, x, pe, edge_attr, src, dst, batch):
    """Fold BN, fuse embedding weights, stack per-layer slabs, pre-transpose
    the scatter one-hots, cast MXU layer-weights to bf16."""
    bf16 = jnp.bfloat16
    D = D_MODEL
    B, N, E, G = N_BLOCKS, NODES_PER_BLOCK, EDGES_PER_BLOCK, GRAPHS_PER_BLOCK

    # fold eval-mode BatchNorm1d(20) into pe_lin
    s = p["bn_g"] * jax.lax.rsqrt(p["bn_v"] + BN_EPS)                  # [20]
    pe_w_f = p["pe_w"] * s[:, None]                                    # [20, 8]
    pe_b_f = p["pe_b"] + (p["bn_b"] - p["bn_m"] * s) @ p["pe_w"]       # [8]

    # fused [node_emb | pe_lin | edge_emb] block weight (f32, tiny K)
    emb_w = jnp.zeros((IN_DIM, D), jnp.float32)
    emb_w = emb_w.at[:FEATURE_DIM, : D - PE_DIM].set(p["node_w"])
    emb_w = emb_w.at[FEATURE_DIM:FEATURE_DIM + PE_DIM_IN, D - PE_DIM:].set(pe_w_f)
    emb_w = emb_w.at[FEATURE_DIM + PE_DIM_IN:, :].set(p["edge_w"])

    # misc bias slab: node/pe bias, edge bias, padded final bias (lo/hi halves)
    misc_b = jnp.zeros((4, D), jnp.float32)
    misc_b = misc_b.at[0].set(jnp.concatenate([p["node_b"], pe_b_f]))
    misc_b = misc_b.at[1].set(p["edge_b"])
    misc_b = misc_b.at[2, :CLASSES].set(p["fin_b"])

    # fused embedding operand: [x|pe|0] node rows, [0|eattr] edge rows
    node_rows = jnp.concatenate(
        [x, pe, jnp.zeros((B, N, EDGE_DIM), jnp.float32)], axis=2)      # [B,N,32]
    edge_rows = jnp.concatenate(
        [jnp.zeros((B, E, FEATURE_DIM + PE_DIM_IN), jnp.float32), edge_attr],
        axis=2)                                                         # [B,E,32]
    comb = jnp.concatenate([node_rows, edge_rows], axis=1)              # [B,N+E,32]

    # graph structure one-hots (exact in bf16); scatter sides pre-transposed
    src_oh = jax.nn.one_hot(src, N, dtype=bf16)                         # [B, E, N]
    dst_ohT = jnp.swapaxes(jax.nn.one_hot(dst, N, dtype=bf16), 1, 2)    # [B, N, E]
    pool_ohT = jnp.broadcast_to(
        jax.nn.one_hot(batch, G, dtype=bf16).T, (B, G, N))              # [B, G, N]

    # per-layer stacked slabs
    w_gine = jnp.stack([p["gine_w1"], p["gine_w2"]], axis=1).astype(bf16)  # [L,2,D,D]
    w_mlp1 = p["mlp_w1"].astype(bf16)                                   # [L, D, 2D]
    w_mlp2 = p["mlp_w2"].astype(bf16)                                   # [L, 2D, D]
    layer_b = jnp.stack(
        [p["ln_g"], p["ln_b"], p["gine_b1"], p["gine_b2"], p["mlp_b2"],
         p["mlp_b1"][:, :D], p["mlp_b1"][:, D:]], axis=1)               # [L, 7, D]

    # lane-dense padded head
    fin_w = jnp.zeros((D, CLS_PAD), jnp.float32).at[:, :CLASSES].set(p["fin_w"])

    return (
        comb, src_oh, dst_ohT, pool_ohT,
        emb_w, misc_b,
        w_gine, w_mlp1, w_mlp2, layer_b,
        fin_w.astype(bf16),
    )


if __name__ == "__main__":
    key = jax.random.PRNGKey(0)
    k_x, k_pe, k_ea, k_s, k_d, k_p = jax.random.split(key, 6)

    B, N, E, G = N_BLOCKS, NODES_PER_BLOCK, EDGES_PER_BLOCK, GRAPHS_PER_BLOCK

    x = jax.random.normal(k_x, (B, N, FEATURE_DIM), jnp.float32)
    pe = jax.random.normal(k_pe, (B, N, PE_DIM_IN), jnp.float32)
    edge_attr = jax.random.normal(k_ea, (B, E, EDGE_DIM), jnp.float32)

    # edges confined to their own graph inside each block
    graph_of_edge = jnp.repeat(jnp.arange(G, dtype=jnp.int32), EDGES_PER_GRAPH)
    src = (graph_of_edge[None, :] * NODES_PER_GRAPH
           + jax.random.randint(k_s, (B, E), 0, NODES_PER_GRAPH)).astype(jnp.int32)
    dst = (graph_of_edge[None, :] * NODES_PER_GRAPH
           + jax.random.randint(k_d, (B, E), 0, NODES_PER_GRAPH)).astype(jnp.int32)
    batch = jnp.repeat(jnp.arange(G, dtype=jnp.int32), NODES_PER_GRAPH)   # [N]

    params = make_params(k_p)
    args = pack_kernel_inputs(params, x, pe, edge_attr, src, dst, batch)

    out = jax.block_until_ready(run_graph_model(args))

    ref = jnp.concatenate(
        [reference_block(x[b], pe[b], edge_attr[b], src[b], dst[b], batch, params)
         for b in range(B)], axis=0)
    ref = jax.block_until_ready(ref)

    # bf16 MXU layer operands (f32 accumulation) vs f32 reference -> loose tol
    np.testing.assert_allclose(np.asarray(out), np.asarray(ref), rtol=2e-2, atol=1e-1)
    print("KERNEL_OK")
</pallas_src>

<mosaic_0001>
module attributes {stable_mosaic.version = 11 : i64} {
  func.func @graph_model_kernel(%arg0: i32, %arg1: memref<1x384x32xf32, #tpu.memory_space<vmem>>, %arg2: memref<1x256x128xbf16, #tpu.memory_space<vmem>>, %arg3: memref<1x128x256xbf16, #tpu.memory_space<vmem>>, %arg4: memref<1x16x128xbf16, #tpu.memory_space<vmem>>, %arg5: memref<32x64xf32, #tpu.memory_space<vmem>>, %arg6: memref<4x64xf32, #tpu.memory_space<vmem>>, %arg7: memref<3x2x64x64xbf16, #tpu.memory_space<vmem>>, %arg8: memref<3x64x128xbf16, #tpu.memory_space<vmem>>, %arg9: memref<3x128x64xbf16, #tpu.memory_space<vmem>>, %arg10: memref<3x7x64xf32, #tpu.memory_space<vmem>>, %arg11: memref<64x128xbf16, #tpu.memory_space<vmem>>, %arg12: memref<1x16x128xf32, #tpu.memory_space<vmem>>) attributes {dimension_semantics = [#tpu.dimension_semantics<parallel>], iteration_bounds = array<i64: 2>, scalar_prefetch = 0 : i64, scratch_operands = 0 : i64, tpu.core_type = #tpu.core_type<tc>, window_params = [{transform_indices = @transform_0, window_bounds = array<i64: 1, 384, 32>}, {transform_indices = @transform_1, window_bounds = array<i64: 1, 256, 128>}, {transform_indices = @transform_2, window_bounds = array<i64: 1, 128, 256>}, {transform_indices = @transform_3, window_bounds = array<i64: 1, 16, 128>}, {pipeline_mode = #tpu.pipeline_mode<synchronous>, transform_indices = @transform_4, window_bounds = array<i64: 32, 64>}, {pipeline_mode = #tpu.pipeline_mode<synchronous>, transform_indices = @transform_5, window_bounds = array<i64: 4, 64>}, {pipeline_mode = #tpu.pipeline_mode<synchronous>, transform_indices = @transform_6, window_bounds = array<i64: 3, 2, 64, 64>}, {pipeline_mode = #tpu.pipeline_mode<synchronous>, transform_indices = @transform_7, window_bounds = array<i64: 3, 64, 128>}, {pipeline_mode = #tpu.pipeline_mode<synchronous>, transform_indices = @transform_8, window_bounds = array<i64: 3, 128, 64>}, {pipeline_mode = #tpu.pipeline_mode<synchronous>, transform_indices = @transform_9, window_bounds = array<i64: 3, 7, 64>}, {pipeline_mode = #tpu.pipeline_mode<synchronous>, transform_indices = @transform_10, window_bounds = array<i64: 64, 128>}, {transform_indices = @transform_11, window_bounds = array<i64: 1, 16, 128>}]} {
    %c0 = arith.constant 0 : index
    %c0_0 = arith.constant 0 : index
    %0 = vector.load %arg6[%c0, %c0_0] : memref<4x64xf32, #tpu.memory_space<vmem>>, vector<4x64xf32>
    %c0_1 = arith.constant 0 : index
    %c0_2 = arith.constant 0 : index
    %c0_3 = arith.constant 0 : index
    %1 = vector.load %arg1[%c0_1, %c0_2, %c0_3] : memref<1x384x32xf32, #tpu.memory_space<vmem>>, vector<1x384x32xf32>
    %2 = vector.shape_cast %1 : vector<1x384x32xf32> to vector<384x32xf32>
    %c0_4 = arith.constant 0 : index
    %c0_5 = arith.constant 0 : index
    %3 = vector.load %arg5[%c0_4, %c0_5] : memref<32x64xf32, #tpu.memory_space<vmem>>, vector<32x64xf32>
    %cst = arith.constant dense<0.000000e+00> : vector<384x64xf32>
    %4 = tpu.matmul %2, %3, %cst {dimension_numbers = #tpu.dot_dimension_numbers<[1], [0], [0], [1], [0, 0, 1, 1], [], []>} : vector<384x32xf32>, vector<32x64xf32>, vector<384x64xf32> -> vector<384x64xf32>
    %5 = vector.extract_strided_slice %4 {offsets = [0, 0], sizes = [128, 64], strides = [1, 1]} : vector<384x64xf32> to vector<128x64xf32>
    %6 = vector.extract_strided_slice %0 {offsets = [0, 0], sizes = [1, 64], strides = [1, 1]} : vector<4x64xf32> to vector<1x64xf32>
    %7 = vector.broadcast %6 : vector<1x64xf32> to vector<128x64xf32>
    %8 = arith.addf %5, %7 : vector<128x64xf32>
    %9 = vector.extract_strided_slice %4 {offsets = [128, 0], sizes = [256, 64], strides = [1, 1]} : vector<384x64xf32> to vector<256x64xf32>
    %10 = vector.extract_strided_slice %0 {offsets = [1, 0], sizes = [1, 64], strides = [1, 1]} : vector<4x64xf32> to vector<1x64xf32>
    %11 = vector.broadcast %10 : vector<1x64xf32> to vector<256x64xf32>
    %12 = arith.addf %9, %11 : vector<256x64xf32>
    %c0_6 = arith.constant 0 : index
    %c0_7 = arith.constant 0 : index
    %c0_8 = arith.constant 0 : index
    %13 = vector.load %arg2[%c0_6, %c0_7, %c0_8] : memref<1x256x128xbf16, #tpu.memory_space<vmem>>, vector<1x256x128xbf16>
    %14 = vector.shape_cast %13 : vector<1x256x128xbf16> to vector<256x128xbf16>
    %c0_9 = arith.constant 0 : index
    %c0_10 = arith.constant 0 : index
    %c0_11 = arith.constant 0 : index
    %15 = vector.load %arg3[%c0_9, %c0_10, %c0_11] : memref<1x128x256xbf16, #tpu.memory_space<vmem>>, vector<1x128x256xbf16>
    %16 = vector.shape_cast %15 : vector<1x128x256xbf16> to vector<128x256xbf16>
    %c0_12 = arith.constant 0 : index
    %c0_13 = arith.constant 0 : index
    %c0_14 = arith.constant 0 : index
    %17 = vector.load %arg10[%c0_12, %c0_13, %c0_14] : memref<3x7x64xf32, #tpu.memory_space<vmem>>, vector<1x7x64xf32>
    %18 = vector.shape_cast %17 : vector<1x7x64xf32> to vector<7x64xf32>
    %19 = vector.extract_strided_slice %18 {offsets = [0, 0], sizes = [1, 64], strides = [1, 1]} : vector<7x64xf32> to vector<1x64xf32>
    %20 = vector.extract_strided_slice %18 {offsets = [1, 0], sizes = [1, 64], strides = [1, 1]} : vector<7x64xf32> to vector<1x64xf32>
    %21 = vector.extract_strided_slice %18 {offsets = [2, 0], sizes = [1, 64], strides = [1, 1]} : vector<7x64xf32> to vector<1x64xf32>
    %22 = vector.extract_strided_slice %18 {offsets = [3, 0], sizes = [1, 64], strides = [1, 1]} : vector<7x64xf32> to vector<1x64xf32>
    %23 = vector.extract_strided_slice %18 {offsets = [4, 0], sizes = [1, 64], strides = [1, 1]} : vector<7x64xf32> to vector<1x64xf32>
    %24 = vector.extract_strided_slice %18 {offsets = [5, 0], sizes = [1, 64], strides = [1, 1]} : vector<7x64xf32> to vector<1x64xf32>
    %25 = vector.extract_strided_slice %18 {offsets = [6, 0], sizes = [1, 64], strides = [1, 1]} : vector<7x64xf32> to vector<1x64xf32>
    %26 = tpu.concatenate %24, %25 in 1 : vector<1x64xf32>, vector<1x64xf32> -> vector<1x128xf32>
    %cst_15 = arith.constant dense<0.000000e+00> : vector<128xf32>
    %27 = vector.multi_reduction <add>, %8, %cst_15 [1] : vector<128x64xf32> to vector<128xf32>
    %28 = vector.shape_cast %27 : vector<128xf32> to vector<128x1xf32>
    %cst_16 = arith.constant 6.400000e+01 : f32
    %29 = vector.broadcast %cst_16 : f32 to vector<128x1xf32>
    %30 = arith.divf %28, %29 : vector<128x1xf32>
    %31 = arith.mulf %8, %8 : vector<128x64xf32>
    %cst_17 = arith.constant dense<0.000000e+00> : vector<128xf32>
    %32 = vector.multi_reduction <add>, %31, %cst_17 [1] : vector<128x64xf32> to vector<128xf32>
    %33 = vector.shape_cast %32 : vector<128xf32> to vector<128x1xf32>
    %cst_18 = arith.constant 6.400000e+01 : f32
    %34 = vector.broadcast %cst_18 : f32 to vector<128x1xf32>
    %35 = arith.divf %33, %34 : vector<128x1xf32>
    %36 = arith.mulf %30, %30 : vector<128x1xf32>
    %37 = arith.subf %35, %36 : vector<128x1xf32>
    %38 = vector.broadcast %30 : vector<128x1xf32> to vector<128x64xf32>
    %39 = arith.subf %8, %38 : vector<128x64xf32>
    %cst_19 = arith.constant 9.99999974E-6 : f32
    %40 = vector.broadcast %cst_19 : f32 to vector<128x1xf32>
    %41 = arith.addf %37, %40 : vector<128x1xf32>
    %42 = math.rsqrt %41 : vector<128x1xf32>
    %43 = vector.broadcast %42 : vector<128x1xf32> to vector<128x64xf32>
    %44 = arith.mulf %39, %43 : vector<128x64xf32>
    %45 = vector.broadcast %19 : vector<1x64xf32> to vector<128x64xf32>
    %46 = arith.mulf %44, %45 : vector<128x64xf32>
    %47 = vector.broadcast %20 : vector<1x64xf32> to vector<128x64xf32>
    %48 = arith.addf %46, %47 : vector<128x64xf32>
    %49 = arith.truncf %48 : vector<128x64xf32> to vector<128x64xbf16>
    %cst_20 = arith.constant dense<0.000000e+00> : vector<256x64xf32>
    %50 = tpu.matmul %14, %49, %cst_20 {dimension_numbers = #tpu.dot_dimension_numbers<[1], [0], [0], [1], [0, 0, 1, 1], [], []>} : vector<256x128xbf16>, vector<128x64xbf16>, vector<256x64xf32> -> vector<256x64xf32>
    %51 = arith.addf %50, %12 : vector<256x64xf32>
    %cst_21 = arith.constant 0.000000e+00 : f32
    %52 = vector.broadcast %cst_21 : f32 to vector<256x64xf32>
    %53 = arith.maximumf %51, %52 : vector<256x64xf32>
    %54 = arith.truncf %53 : vector<256x64xf32> to vector<256x64xbf16>
    %cst_22 = arith.constant dense<0.000000e+00> : vector<128x64xf32>
    %55 = tpu.matmul %16, %54, %cst_22 {dimension_numbers = #tpu.dot_dimension_numbers<[1], [0], [0], [1], [0, 0, 1, 1], [], []>} : vector<128x256xbf16>, vector<256x64xbf16>, vector<128x64xf32> -> vector<128x64xf32>
    %56 = arith.addf %48, %55 : vector<128x64xf32>
    %57 = arith.truncf %56 : vector<128x64xf32> to vector<128x64xbf16>
    %c0_23 = arith.constant 0 : index
    %c0_24 = arith.constant 0 : index
    %c0_25 = arith.constant 0 : index
    %c0_26 = arith.constant 0 : index
    %58 = vector.load %arg7[%c0_23, %c0_24, %c0_25, %c0_26] : memref<3x2x64x64xbf16, #tpu.memory_space<vmem>>, vector<1x1x64x64xbf16>
    %59 = vector.shape_cast %58 : vector<1x1x64x64xbf16> to vector<64x64xbf16>
    %cst_27 = arith.constant dense<0.000000e+00> : vector<128x64xf32>
    %60 = tpu.matmul %57, %59, %cst_27 {dimension_numbers = #tpu.dot_dimension_numbers<[1], [0], [0], [1], [0, 0, 1, 1], [], []>} : vector<128x64xbf16>, vector<64x64xbf16>, vector<128x64xf32> -> vector<128x64xf32>
    %61 = vector.broadcast %21 : vector<1x64xf32> to vector<128x64xf32>
    %62 = arith.addf %60, %61 : vector<128x64xf32>
    %cst_28 = arith.constant 0.000000e+00 : f32
    %63 = vector.broadcast %cst_28 : f32 to vector<128x64xf32>
    %64 = arith.maximumf %62, %63 : vector<128x64xf32>
    %65 = arith.truncf %64 : vector<128x64xf32> to vector<128x64xbf16>
    %c0_29 = arith.constant 0 : index
    %c1 = arith.constant 1 : index
    %c0_30 = arith.constant 0 : index
    %c0_31 = arith.constant 0 : index
    %66 = vector.load %arg7[%c0_29, %c1, %c0_30, %c0_31] : memref<3x2x64x64xbf16, #tpu.memory_space<vmem>>, vector<1x1x64x64xbf16>
    %67 = vector.shape_cast %66 : vector<1x1x64x64xbf16> to vector<64x64xbf16>
    %cst_32 = arith.constant dense<0.000000e+00> : vector<128x64xf32>
    %68 = tpu.matmul %65, %67, %cst_32 {dimension_numbers = #tpu.dot_dimension_numbers<[1], [0], [0], [1], [0, 0, 1, 1], [], []>} : vector<128x64xbf16>, vector<64x64xbf16>, vector<128x64xf32> -> vector<128x64xf32>
    %69 = vector.broadcast %22 : vector<1x64xf32> to vector<128x64xf32>
    %70 = arith.addf %68, %69 : vector<128x64xf32>
    %71 = arith.truncf %70 : vector<128x64xf32> to vector<128x64xbf16>
    %c0_33 = arith.constant 0 : index
    %c0_34 = arith.constant 0 : index
    %c0_35 = arith.constant 0 : index
    %72 = vector.load %arg8[%c0_33, %c0_34, %c0_35] : memref<3x64x128xbf16, #tpu.memory_space<vmem>>, vector<1x64x128xbf16>
    %73 = vector.shape_cast %72 : vector<1x64x128xbf16> to vector<64x128xbf16>
    %cst_36 = arith.constant dense<0.000000e+00> : vector<128x128xf32>
    %74 = tpu.matmul %71, %73, %cst_36 {dimension_numbers = #tpu.dot_dimension_numbers<[1], [0], [0], [1], [0, 0, 1, 1], [], []>} : vector<128x64xbf16>, vector<64x128xbf16>, vector<128x128xf32> -> vector<128x128xf32>
    %75 = vector.broadcast %26 : vector<1x128xf32> to vector<128x128xf32>
    %76 = arith.addf %74, %75 : vector<128x128xf32>
    %cst_37 = arith.constant 0.000000e+00 : f32
    %77 = vector.broadcast %cst_37 : f32 to vector<128x128xf32>
    %78 = arith.maximumf %76, %77 : vector<128x128xf32>
    %79 = arith.truncf %78 : vector<128x128xf32> to vector<128x128xbf16>
    %c0_38 = arith.constant 0 : index
    %c0_39 = arith.constant 0 : index
    %c0_40 = arith.constant 0 : index
    %80 = vector.load %arg9[%c0_38, %c0_39, %c0_40] : memref<3x128x64xbf16, #tpu.memory_space<vmem>>, vector<1x128x64xbf16>
    %81 = vector.shape_cast %80 : vector<1x128x64xbf16> to vector<128x64xbf16>
    %cst_41 = arith.constant dense<0.000000e+00> : vector<128x64xf32>
    %82 = tpu.matmul %79, %81, %cst_41 {dimension_numbers = #tpu.dot_dimension_numbers<[1], [0], [0], [1], [0, 0, 1, 1], [], []>} : vector<128x128xbf16>, vector<128x64xbf16>, vector<128x64xf32> -> vector<128x64xf32>
    %83 = vector.broadcast %23 : vector<1x64xf32> to vector<128x64xf32>
    %84 = arith.addf %82, %83 : vector<128x64xf32>
    %85 = arith.addf %84, %70 : vector<128x64xf32>
    %c1_42 = arith.constant 1 : index
    %c0_43 = arith.constant 0 : index
    %c0_44 = arith.constant 0 : index
    %86 = vector.load %arg10[%c1_42, %c0_43, %c0_44] : memref<3x7x64xf32, #tpu.memory_space<vmem>>, vector<1x7x64xf32>
    %87 = vector.shape_cast %86 : vector<1x7x64xf32> to vector<7x64xf32>
    %88 = vector.extract_strided_slice %87 {offsets = [0, 0], sizes = [1, 64], strides = [1, 1]} : vector<7x64xf32> to vector<1x64xf32>
    %89 = vector.extract_strided_slice %87 {offsets = [1, 0], sizes = [1, 64], strides = [1, 1]} : vector<7x64xf32> to vector<1x64xf32>
    %90 = vector.extract_strided_slice %87 {offsets = [2, 0], sizes = [1, 64], strides = [1, 1]} : vector<7x64xf32> to vector<1x64xf32>
    %91 = vector.extract_strided_slice %87 {offsets = [3, 0], sizes = [1, 64], strides = [1, 1]} : vector<7x64xf32> to vector<1x64xf32>
    %92 = vector.extract_strided_slice %87 {offsets = [4, 0], sizes = [1, 64], strides = [1, 1]} : vector<7x64xf32> to vector<1x64xf32>
    %93 = vector.extract_strided_slice %87 {offsets = [5, 0], sizes = [1, 64], strides = [1, 1]} : vector<7x64xf32> to vector<1x64xf32>
    %94 = vector.extract_strided_slice %87 {offsets = [6, 0], sizes = [1, 64], strides = [1, 1]} : vector<7x64xf32> to vector<1x64xf32>
    %95 = tpu.concatenate %93, %94 in 1 : vector<1x64xf32>, vector<1x64xf32> -> vector<1x128xf32>
    %cst_45 = arith.constant dense<0.000000e+00> : vector<128xf32>
    %96 = vector.multi_reduction <add>, %85, %cst_45 [1] : vector<128x64xf32> to vector<128xf32>
    %97 = vector.shape_cast %96 : vector<128xf32> to vector<128x1xf32>
    %cst_46 = arith.constant 6.400000e+01 : f32
    %98 = vector.broadcast %cst_46 : f32 to vector<128x1xf32>
    %99 = arith.divf %97, %98 : vector<128x1xf32>
    %100 = arith.mulf %85, %85 : vector<128x64xf32>
    %cst_47 = arith.constant dense<0.000000e+00> : vector<128xf32>
    %101 = vector.multi_reduction <add>, %100, %cst_47 [1] : vector<128x64xf32> to vector<128xf32>
    %102 = vector.shape_cast %101 : vector<128xf32> to vector<128x1xf32>
    %cst_48 = arith.constant 6.400000e+01 : f32
    %103 = vector.broadcast %cst_48 : f32 to vector<128x1xf32>
    %104 = arith.divf %102, %103 : vector<128x1xf32>
    %105 = arith.mulf %99, %99 : vector<128x1xf32>
    %106 = arith.subf %104, %105 : vector<128x1xf32>
    %107 = vector.broadcast %99 : vector<128x1xf32> to vector<128x64xf32>
    %108 = arith.subf %85, %107 : vector<128x64xf32>
    %cst_49 = arith.constant 9.99999974E-6 : f32
    %109 = vector.broadcast %cst_49 : f32 to vector<128x1xf32>
    %110 = arith.addf %106, %109 : vector<128x1xf32>
    %111 = math.rsqrt %110 : vector<128x1xf32>
    %112 = vector.broadcast %111 : vector<128x1xf32> to vector<128x64xf32>
    %113 = arith.mulf %108, %112 : vector<128x64xf32>
    %114 = vector.broadcast %88 : vector<1x64xf32> to vector<128x64xf32>
    %115 = arith.mulf %113, %114 : vector<128x64xf32>
    %116 = vector.broadcast %89 : vector<1x64xf32> to vector<128x64xf32>
    %117 = arith.addf %115, %116 : vector<128x64xf32>
    %118 = arith.truncf %117 : vector<128x64xf32> to vector<128x64xbf16>
    %cst_50 = arith.constant dense<0.000000e+00> : vector<256x64xf32>
    %119 = tpu.matmul %14, %118, %cst_50 {dimension_numbers = #tpu.dot_dimension_numbers<[1], [0], [0], [1], [0, 0, 1, 1], [], []>} : vector<256x128xbf16>, vector<128x64xbf16>, vector<256x64xf32> -> vector<256x64xf32>
    %120 = arith.addf %119, %12 : vector<256x64xf32>
    %cst_51 = arith.constant 0.000000e+00 : f32
    %121 = vector.broadcast %cst_51 : f32 to vector<256x64xf32>
    %122 = arith.maximumf %120, %121 : vector<256x64xf32>
    %123 = arith.truncf %122 : vector<256x64xf32> to vector<256x64xbf16>
    %cst_52 = arith.constant dense<0.000000e+00> : vector<128x64xf32>
    %124 = tpu.matmul %16, %123, %cst_52 {dimension_numbers = #tpu.dot_dimension_numbers<[1], [0], [0], [1], [0, 0, 1, 1], [], []>} : vector<128x256xbf16>, vector<256x64xbf16>, vector<128x64xf32> -> vector<128x64xf32>
    %125 = arith.addf %117, %124 : vector<128x64xf32>
    %126 = arith.truncf %125 : vector<128x64xf32> to vector<128x64xbf16>
    %c1_53 = arith.constant 1 : index
    %c0_54 = arith.constant 0 : index
    %c0_55 = arith.constant 0 : index
    %c0_56 = arith.constant 0 : index
    %127 = vector.load %arg7[%c1_53, %c0_54, %c0_55, %c0_56] : memref<3x2x64x64xbf16, #tpu.memory_space<vmem>>, vector<1x1x64x64xbf16>
    %128 = vector.shape_cast %127 : vector<1x1x64x64xbf16> to vector<64x64xbf16>
    %cst_57 = arith.constant dense<0.000000e+00> : vector<128x64xf32>
    %129 = tpu.matmul %126, %128, %cst_57 {dimension_numbers = #tpu.dot_dimension_numbers<[1], [0], [0], [1], [0, 0, 1, 1], [], []>} : vector<128x64xbf16>, vector<64x64xbf16>, vector<128x64xf32> -> vector<128x64xf32>
    %130 = vector.broadcast %90 : vector<1x64xf32> to vector<128x64xf32>
    %131 = arith.addf %129, %130 : vector<128x64xf32>
    %cst_58 = arith.constant 0.000000e+00 : f32
    %132 = vector.broadcast %cst_58 : f32 to vector<128x64xf32>
    %133 = arith.maximumf %131, %132 : vector<128x64xf32>
    %134 = arith.truncf %133 : vector<128x64xf32> to vector<128x64xbf16>
    %c1_59 = arith.constant 1 : index
    %c1_60 = arith.constant 1 : index
    %c0_61 = arith.constant 0 : index
    %c0_62 = arith.constant 0 : index
    %135 = vector.load %arg7[%c1_59, %c1_60, %c0_61, %c0_62] : memref<3x2x64x64xbf16, #tpu.memory_space<vmem>>, vector<1x1x64x64xbf16>
    %136 = vector.shape_cast %135 : vector<1x1x64x64xbf16> to vector<64x64xbf16>
    %cst_63 = arith.constant dense<0.000000e+00> : vector<128x64xf32>
    %137 = tpu.matmul %134, %136, %cst_63 {dimension_numbers = #tpu.dot_dimension_numbers<[1], [0], [0], [1], [0, 0, 1, 1], [], []>} : vector<128x64xbf16>, vector<64x64xbf16>, vector<128x64xf32> -> vector<128x64xf32>
    %138 = vector.broadcast %91 : vector<1x64xf32> to vector<128x64xf32>
    %139 = arith.addf %137, %138 : vector<128x64xf32>
    %140 = arith.truncf %139 : vector<128x64xf32> to vector<128x64xbf16>
    %c1_64 = arith.constant 1 : index
    %c0_65 = arith.constant 0 : index
    %c0_66 = arith.constant 0 : index
    %141 = vector.load %arg8[%c1_64, %c0_65, %c0_66] : memref<3x64x128xbf16, #tpu.memory_space<vmem>>, vector<1x64x128xbf16>
    %142 = vector.shape_cast %141 : vector<1x64x128xbf16> to vector<64x128xbf16>
    %cst_67 = arith.constant dense<0.000000e+00> : vector<128x128xf32>
    %143 = tpu.matmul %140, %142, %cst_67 {dimension_numbers = #tpu.dot_dimension_numbers<[1], [0], [0], [1], [0, 0, 1, 1], [], []>} : vector<128x64xbf16>, vector<64x128xbf16>, vector<128x128xf32> -> vector<128x128xf32>
    %144 = vector.broadcast %95 : vector<1x128xf32> to vector<128x128xf32>
    %145 = arith.addf %143, %144 : vector<128x128xf32>
    %cst_68 = arith.constant 0.000000e+00 : f32
    %146 = vector.broadcast %cst_68 : f32 to vector<128x128xf32>
    %147 = arith.maximumf %145, %146 : vector<128x128xf32>
    %148 = arith.truncf %147 : vector<128x128xf32> to vector<128x128xbf16>
    %c1_69 = arith.constant 1 : index
    %c0_70 = arith.constant 0 : index
    %c0_71 = arith.constant 0 : index
    %149 = vector.load %arg9[%c1_69, %c0_70, %c0_71] : memref<3x128x64xbf16, #tpu.memory_space<vmem>>, vector<1x128x64xbf16>
    %150 = vector.shape_cast %149 : vector<1x128x64xbf16> to vector<128x64xbf16>
    %cst_72 = arith.constant dense<0.000000e+00> : vector<128x64xf32>
    %151 = tpu.matmul %148, %150, %cst_72 {dimension_numbers = #tpu.dot_dimension_numbers<[1], [0], [0], [1], [0, 0, 1, 1], [], []>} : vector<128x128xbf16>, vector<128x64xbf16>, vector<128x64xf32> -> vector<128x64xf32>
    %152 = vector.broadcast %92 : vector<1x64xf32> to vector<128x64xf32>
    %153 = arith.addf %151, %152 : vector<128x64xf32>
    %154 = arith.addf %153, %139 : vector<128x64xf32>
    %c2 = arith.constant 2 : index
    %c0_73 = arith.constant 0 : index
    %c0_74 = arith.constant 0 : index
    %155 = vector.load %arg10[%c2, %c0_73, %c0_74] : memref<3x7x64xf32, #tpu.memory_space<vmem>>, vector<1x7x64xf32>
    %156 = vector.shape_cast %155 : vector<1x7x64xf32> to vector<7x64xf32>
    %157 = vector.extract_strided_slice %156 {offsets = [0, 0], sizes = [1, 64], strides = [1, 1]} : vector<7x64xf32> to vector<1x64xf32>
    %158 = vector.extract_strided_slice %156 {offsets = [1, 0], sizes = [1, 64], strides = [1, 1]} : vector<7x64xf32> to vector<1x64xf32>
    %159 = vector.extract_strided_slice %156 {offsets = [2, 0], sizes = [1, 64], strides = [1, 1]} : vector<7x64xf32> to vector<1x64xf32>
    %160 = vector.extract_strided_slice %156 {offsets = [3, 0], sizes = [1, 64], strides = [1, 1]} : vector<7x64xf32> to vector<1x64xf32>
    %161 = vector.extract_strided_slice %156 {offsets = [4, 0], sizes = [1, 64], strides = [1, 1]} : vector<7x64xf32> to vector<1x64xf32>
    %162 = vector.extract_strided_slice %156 {offsets = [5, 0], sizes = [1, 64], strides = [1, 1]} : vector<7x64xf32> to vector<1x64xf32>
    %163 = vector.extract_strided_slice %156 {offsets = [6, 0], sizes = [1, 64], strides = [1, 1]} : vector<7x64xf32> to vector<1x64xf32>
    %164 = tpu.concatenate %162, %163 in 1 : vector<1x64xf32>, vector<1x64xf32> -> vector<1x128xf32>
    %cst_75 = arith.constant dense<0.000000e+00> : vector<128xf32>
    %165 = vector.multi_reduction <add>, %154, %cst_75 [1] : vector<128x64xf32> to vector<128xf32>
    %166 = vector.shape_cast %165 : vector<128xf32> to vector<128x1xf32>
    %cst_76 = arith.constant 6.400000e+01 : f32
    %167 = vector.broadcast %cst_76 : f32 to vector<128x1xf32>
    %168 = arith.divf %166, %167 : vector<128x1xf32>
    %169 = arith.mulf %154, %154 : vector<128x64xf32>
    %cst_77 = arith.constant dense<0.000000e+00> : vector<128xf32>
    %170 = vector.multi_reduction <add>, %169, %cst_77 [1] : vector<128x64xf32> to vector<128xf32>
    %171 = vector.shape_cast %170 : vector<128xf32> to vector<128x1xf32>
    %cst_78 = arith.constant 6.400000e+01 : f32
    %172 = vector.broadcast %cst_78 : f32 to vector<128x1xf32>
    %173 = arith.divf %171, %172 : vector<128x1xf32>
    %174 = arith.mulf %168, %168 : vector<128x1xf32>
    %175 = arith.subf %173, %174 : vector<128x1xf32>
    %176 = vector.broadcast %168 : vector<128x1xf32> to vector<128x64xf32>
    %177 = arith.subf %154, %176 : vector<128x64xf32>
    %cst_79 = arith.constant 9.99999974E-6 : f32
    %178 = vector.broadcast %cst_79 : f32 to vector<128x1xf32>
    %179 = arith.addf %175, %178 : vector<128x1xf32>
    %180 = math.rsqrt %179 : vector<128x1xf32>
    %181 = vector.broadcast %180 : vector<128x1xf32> to vector<128x64xf32>
    %182 = arith.mulf %177, %181 : vector<128x64xf32>
    %183 = vector.broadcast %157 : vector<1x64xf32> to vector<128x64xf32>
    %184 = arith.mulf %182, %183 : vector<128x64xf32>
    %185 = vector.broadcast %158 : vector<1x64xf32> to vector<128x64xf32>
    %186 = arith.addf %184, %185 : vector<128x64xf32>
    %187 = arith.truncf %186 : vector<128x64xf32> to vector<128x64xbf16>
    %cst_80 = arith.constant dense<0.000000e+00> : vector<256x64xf32>
    %188 = tpu.matmul %14, %187, %cst_80 {dimension_numbers = #tpu.dot_dimension_numbers<[1], [0], [0], [1], [0, 0, 1, 1], [], []>} : vector<256x128xbf16>, vector<128x64xbf16>, vector<256x64xf32> -> vector<256x64xf32>
    %189 = arith.addf %188, %12 : vector<256x64xf32>
    %cst_81 = arith.constant 0.000000e+00 : f32
    %190 = vector.broadcast %cst_81 : f32 to vector<256x64xf32>
    %191 = arith.maximumf %189, %190 : vector<256x64xf32>
    %192 = arith.truncf %191 : vector<256x64xf32> to vector<256x64xbf16>
    %cst_82 = arith.constant dense<0.000000e+00> : vector<128x64xf32>
    %193 = tpu.matmul %16, %192, %cst_82 {dimension_numbers = #tpu.dot_dimension_numbers<[1], [0], [0], [1], [0, 0, 1, 1], [], []>} : vector<128x256xbf16>, vector<256x64xbf16>, vector<128x64xf32> -> vector<128x64xf32>
    %194 = arith.addf %186, %193 : vector<128x64xf32>
    %195 = arith.truncf %194 : vector<128x64xf32> to vector<128x64xbf16>
    %c2_83 = arith.constant 2 : index
    %c0_84 = arith.constant 0 : index
    %c0_85 = arith.constant 0 : index
    %c0_86 = arith.constant 0 : index
    %196 = vector.load %arg7[%c2_83, %c0_84, %c0_85, %c0_86] : memref<3x2x64x64xbf16, #tpu.memory_space<vmem>>, vector<1x1x64x64xbf16>
    %197 = vector.shape_cast %196 : vector<1x1x64x64xbf16> to vector<64x64xbf16>
    %cst_87 = arith.constant dense<0.000000e+00> : vector<128x64xf32>
    %198 = tpu.matmul %195, %197, %cst_87 {dimension_numbers = #tpu.dot_dimension_numbers<[1], [0], [0], [1], [0, 0, 1, 1], [], []>} : vector<128x64xbf16>, vector<64x64xbf16>, vector<128x64xf32> -> vector<128x64xf32>
    %199 = vector.broadcast %159 : vector<1x64xf32> to vector<128x64xf32>
    %200 = arith.addf %198, %199 : vector<128x64xf32>
    %cst_88 = arith.constant 0.000000e+00 : f32
    %201 = vector.broadcast %cst_88 : f32 to vector<128x64xf32>
    %202 = arith.maximumf %200, %201 : vector<128x64xf32>
    %203 = arith.truncf %202 : vector<128x64xf32> to vector<128x64xbf16>
    %c2_89 = arith.constant 2 : index
    %c1_90 = arith.constant 1 : index
    %c0_91 = arith.constant 0 : index
    %c0_92 = arith.constant 0 : index
    %204 = vector.load %arg7[%c2_89, %c1_90, %c0_91, %c0_92] : memref<3x2x64x64xbf16, #tpu.memory_space<vmem>>, vector<1x1x64x64xbf16>
    %205 = vector.shape_cast %204 : vector<1x1x64x64xbf16> to vector<64x64xbf16>
    %cst_93 = arith.constant dense<0.000000e+00> : vector<128x64xf32>
    %206 = tpu.matmul %203, %205, %cst_93 {dimension_numbers = #tpu.dot_dimension_numbers<[1], [0], [0], [1], [0, 0, 1, 1], [], []>} : vector<128x64xbf16>, vector<64x64xbf16>, vector<128x64xf32> -> vector<128x64xf32>
    %207 = vector.broadcast %160 : vector<1x64xf32> to vector<128x64xf32>
    %208 = arith.addf %206, %207 : vector<128x64xf32>
    %209 = arith.truncf %208 : vector<128x64xf32> to vector<128x64xbf16>
    %c2_94 = arith.constant 2 : index
    %c0_95 = arith.constant 0 : index
    %c0_96 = arith.constant 0 : index
    %210 = vector.load %arg8[%c2_94, %c0_95, %c0_96] : memref<3x64x128xbf16, #tpu.memory_space<vmem>>, vector<1x64x128xbf16>
    %211 = vector.shape_cast %210 : vector<1x64x128xbf16> to vector<64x128xbf16>
    %cst_97 = arith.constant dense<0.000000e+00> : vector<128x128xf32>
    %212 = tpu.matmul %209, %211, %cst_97 {dimension_numbers = #tpu.dot_dimension_numbers<[1], [0], [0], [1], [0, 0, 1, 1], [], []>} : vector<128x64xbf16>, vector<64x128xbf16>, vector<128x128xf32> -> vector<128x128xf32>
    %213 = vector.broadcast %164 : vector<1x128xf32> to vector<128x128xf32>
    %214 = arith.addf %212, %213 : vector<128x128xf32>
    %cst_98 = arith.constant 0.000000e+00 : f32
    %215 = vector.broadcast %cst_98 : f32 to vector<128x128xf32>
    %216 = arith.maximumf %214, %215 : vector<128x128xf32>
    %217 = arith.truncf %216 : vector<128x128xf32> to vector<128x128xbf16>
    %c2_99 = arith.constant 2 : index
    %c0_100 = arith.constant 0 : index
    %c0_101 = arith.constant 0 : index
    %218 = vector.load %arg9[%c2_99, %c0_100, %c0_101] : memref<3x128x64xbf16, #tpu.memory_space<vmem>>, vector<1x128x64xbf16>
    %219 = vector.shape_cast %218 : vector<1x128x64xbf16> to vector<128x64xbf16>
    %cst_102 = arith.constant dense<0.000000e+00> : vector<128x64xf32>
    %220 = tpu.matmul %217, %219, %cst_102 {dimension_numbers = #tpu.dot_dimension_numbers<[1], [0], [0], [1], [0, 0, 1, 1], [], []>} : vector<128x128xbf16>, vector<128x64xbf16>, vector<128x64xf32> -> vector<128x64xf32>
    %221 = vector.broadcast %161 : vector<1x64xf32> to vector<128x64xf32>
    %222 = arith.addf %220, %221 : vector<128x64xf32>
    %223 = arith.addf %222, %208 : vector<128x64xf32>
    %c0_103 = arith.constant 0 : index
    %c0_104 = arith.constant 0 : index
    %c0_105 = arith.constant 0 : index
    %224 = vector.load %arg4[%c0_103, %c0_104, %c0_105] : memref<1x16x128xbf16, #tpu.memory_space<vmem>>, vector<1x16x128xbf16>
    %225 = vector.shape_cast %224 : vector<1x16x128xbf16> to vector<16x128xbf16>
    %226 = arith.truncf %223 : vector<128x64xf32> to vector<128x64xbf16>
    %cst_106 = arith.constant dense<0.000000e+00> : vector<16x64xf32>
    %227 = tpu.matmul %225, %226, %cst_106 {dimension_numbers = #tpu.dot_dimension_numbers<[1], [0], [0], [1], [0, 0, 1, 1], [], []>} : vector<16x128xbf16>, vector<128x64xbf16>, vector<16x64xf32> -> vector<16x64xf32>
    %228 = vector.extract_strided_slice %0 {offsets = [2, 0], sizes = [1, 64], strides = [1, 1]} : vector<4x64xf32> to vector<1x64xf32>
    %229 = vector.extract_strided_slice %0 {offsets = [3, 0], sizes = [1, 64], strides = [1, 1]} : vector<4x64xf32> to vector<1x64xf32>
    %230 = tpu.concatenate %228, %229 in 1 : vector<1x64xf32>, vector<1x64xf32> -> vector<1x128xf32>
    %231 = arith.truncf %227 : vector<16x64xf32> to vector<16x64xbf16>
    %c0_107 = arith.constant 0 : index
    %c0_108 = arith.constant 0 : index
    %232 = vector.load %arg11[%c0_107, %c0_108] : memref<64x128xbf16, #tpu.memory_space<vmem>>, vector<64x128xbf16>
    %cst_109 = arith.constant dense<0.000000e+00> : vector<16x128xf32>
    %233 = tpu.matmul %231, %232, %cst_109 {dimension_numbers = #tpu.dot_dimension_numbers<[1], [0], [0], [1], [0, 0, 1, 1], [], []>} : vector<16x64xbf16>, vector<64x128xbf16>, vector<16x128xf32> -> vector<16x128xf32>
    %234 = vector.broadcast %230 : vector<1x128xf32> to vector<16x128xf32>
    %235 = arith.addf %233, %234 : vector<16x128xf32>
    %c0_110 = arith.constant 0 : index
    %c0_111 = arith.constant 0 : index
    %c0_112 = arith.constant 0 : index
    %236 = vector.load %arg12[%c0_110, %c0_111, %c0_112] : memref<1x16x128xf32, #tpu.memory_space<vmem>>, vector<1x16x128xf32>
    %237 = vector.shape_cast %236 : vector<1x16x128xf32> to vector<16x128xf32>
    %238 = vector.shape_cast %235 : vector<16x128xf32> to vector<1x16x128xf32>
    tpu.vector_store %arg12[%c0_110, %c0_111, %c0_112], %238 {strides = array<i32>} : memref<1x16x128xf32, #tpu.memory_space<vmem>>, vector<1x16x128xf32>,
    return
  }
  func.func @transform_0(%arg0: i32) -> (i32, i32, i32) {
    %c0_i32 = arith.constant 0 : i32
    %c0_i32_0 = arith.constant 0 : i32
    %c0_i32_1 = arith.constant 0 : i32
    return %arg0, %c0_i32, %c0_i32_0 : i32, i32, i32
  }
  func.func @transform_1(%arg0: i32) -> (i32, i32, i32) {
    %c0_i32 = arith.constant 0 : i32
    %c0_i32_0 = arith.constant 0 : i32
    %c0_i32_1 = arith.constant 0 : i32
    return %arg0, %c0_i32, %c0_i32_0 : i32, i32, i32
  }
  func.func @transform_2(%arg0: i32) -> (i32, i32, i32) {
    %c0_i32 = arith.constant 0 : i32
    %c0_i32_0 = arith.constant 0 : i32
    %c0_i32_1 = arith.constant 0 : i32
    return %arg0, %c0_i32, %c0_i32_0 : i32, i32, i32
  }
  func.func @transform_3(%arg0: i32) -> (i32, i32, i32) {
    %c0_i32 = arith.constant 0 : i32
    %c0_i32_0 = arith.constant 0 : i32
    %c0_i32_1 = arith.constant 0 : i32
    return %arg0, %c0_i32, %c0_i32_0 : i32, i32, i32
  }
  func.func @transform_4(%arg0: i32) -> (i32, i32) {
    %c0_i32 = arith.constant 0 : i32
    %c0_i32_0 = arith.constant 0 : i32
    %c0_i32_1 = arith.constant 0 : i32
    return %c0_i32, %c0_i32_0 : i32, i32
  }
  func.func @transform_5(%arg0: i32) -> (i32, i32) {
    %c0_i32 = arith.constant 0 : i32
    %c0_i32_0 = arith.constant 0 : i32
    %c0_i32_1 = arith.constant 0 : i32
    return %c0_i32, %c0_i32_0 : i32, i32
  }
  func.func @transform_6(%arg0: i32) -> (i32, i32, i32, i32) {
    %c0_i32 = arith.constant 0 : i32
    %c0_i32_0 = arith.constant 0 : i32
    %c0_i32_1 = arith.constant 0 : i32
    %c0_i32_2 = arith.constant 0 : i32
    %c0_i32_3 = arith.constant 0 : i32
    return %c0_i32, %c0_i32_0, %c0_i32_1, %c0_i32_2 : i32, i32, i32, i32
  }
  func.func @transform_7(%arg0: i32) -> (i32, i32, i32) {
    %c0_i32 = arith.constant 0 : i32
    %c0_i32_0 = arith.constant 0 : i32
    %c0_i32_1 = arith.constant 0 : i32
    %c0_i32_2 = arith.constant 0 : i32
    return %c0_i32, %c0_i32_0, %c0_i32_1 : i32, i32, i32
  }
  func.func @transform_8(%arg0: i32) -> (i32, i32, i32) {
    %c0_i32 = arith.constant 0 : i32
    %c0_i32_0 = arith.constant 0 : i32
    %c0_i32_1 = arith.constant 0 : i32
    %c0_i32_2 = arith.constant 0 : i32
    return %c0_i32, %c0_i32_0, %c0_i32_1 : i32, i32, i32
  }
  func.func @transform_9(%arg0: i32) -> (i32, i32, i32) {
    %c0_i32 = arith.constant 0 : i32
    %c0_i32_0 = arith.constant 0 : i32
    %c0_i32_1 = arith.constant 0 : i32
    %c0_i32_2 = arith.constant 0 : i32
    return %c0_i32, %c0_i32_0, %c0_i32_1 : i32, i32, i32
  }
  func.func @transform_10(%arg0: i32) -> (i32, i32) {
    %c0_i32 = arith.constant 0 : i32
    %c0_i32_0 = arith.constant 0 : i32
    %c0_i32_1 = arith.constant 0 : i32
    return %c0_i32, %c0_i32_0 : i32, i32
  }
  func.func @transform_11(%arg0: i32) -> (i32, i32, i32) {
    %c0_i32 = arith.constant 0 : i32
    %c0_i32_0 = arith.constant 0 : i32
    %c0_i32_1 = arith.constant 0 : i32
    return %arg0, %c0_i32, %c0_i32_0 : i32, i32, i32
  }
}

</mosaic_0001>

<bundles_post_ra>
// kernel: tpu_custom_call.1
= control target key start
LH: loop header
LB: loop body
LE: loop exit
PB: predicated region body
PF: predicated region fallthrough
CT: control target
= control target key end

     0   :  { %s9615_s0 = inlined_call_operand.vmem [shape: f32[2,384,32], index: 0, kind: input, shape index: {}]   ;;  %s9616_s1 = inlined_call_operand.vmem [shape: bf16[2,256,128], index: 1, kind: input, shape index: {}]   ;;  %s9617_s2 = inlined_call_operand.vmem [shape: bf16[2,128,256], index: 2, kind: input, shape index: {}]   ;;  %s9618_s3 = inlined_call_operand.vmem [shape: bf16[2,16,128], index: 3, kind: input, shape index: {}]   ;;  %s9619_s4 = inlined_call_operand.vmem [shape: f32[32,64], index: 4, kind: input, shape index: {}]   ;;  %s9620_s5 = inlined_call_operand.vmem [shape: f32[4,64], index: 5, kind: input, shape index: {}]   ;;  %s9621_s6 = inlined_call_operand.vmem [shape: bf16[3,2,64,64], index: 6, kind: input, shape index: {}]   ;;  %s9622_s7 = inlined_call_operand.vmem [shape: bf16[3,64,128], index: 7, kind: input, shape index: {}]   ;;  %s9623_s8 = inlined_call_operand.vmem [shape: bf16[3,128,64], index: 8, kind: input, shape index: {}]   ;;  %s9624_s9 = inlined_call_operand.vmem [shape: f32[3,7,64], index: 9, kind: input, shape index: {}]   ;;  %s9625_s10 = inlined_call_operand.vmem [shape: bf16[64,128], index: 10, kind: input, shape index: {}]   ;;  %s9626_s11 = inlined_call_operand.hbm [shape: f32[2,16,128], index: 11, kind: output, shape index: {}]  }
   0x1   :  { %9719 = sst [smem:[#allocation51_spill]] %s9615_s0 }
   0x2   :  { %9720 = sst [smem:[#allocation52_spill]] %s9616_s1 }
   0x3   :  { %16 = vsyncpa [#allocation3], 0 }
   0x4   :  { %18 = vsyncpa [#allocation3 + $0x1], 0  ;;  %s7325_s17 = smov 0   ;;  %s7327_s18 = smov 0  }
   0x5   :  { %s7329_s19 = smov 0   ;;  %s7331_s20 = smov 0  }
   0x6 LB: > { %s7346_s21 = sadd.s32 4294967295, %s7257_s20   ;;  %s5499_s22 = sadd.s32 4294967294, %s7257_s20   ;;  %s7257_s20 = sphi %s7331_s20, %s9877_s20   ;;  %s7253_s19 = sphi %s7329_s19, %s9876_s19   ;;  %s7249_s18 = sphi %s7327_s18, %s9875_s18   ;;  %s7245_s17 = sphi %s7325_s17, %s9874_s17  }
   0x7   : > { %s7350_s23 = sadd.s32 1, %s7257_s20   ;;  %s282_s24 = sadd.s32 1, %s7253_s19 }
   0x8   : > { %s279_s25 = ssub.s32 %s7257_s20, %s7350_s23  ;;  %p292_p0 = scmp.ne.s32.totalorder %s7253_s19, %s7249_s18 }
   0x9   : > { %p280_p1 = scmp.eq.s32.totalorder %s279_s25, 0  ;;  %p293_p2 = scmp.eq.s32.totalorder %s7346_s21, 1 }
   0xa   : > { %p298_p3 = scmp.ne.s32.totalorder %s7249_s18, %s7245_s17  ;;  %p299_p4 = scmp.eq.s32.totalorder %s5499_s22, 1 }
   0xb   : > { %s7361_s26 = scalar_select %p280_p1, %s7253_s19, %s282_s24  }
   0xc   : > { %p7363_p5 = por %p293_p2, %p292_p0  ;;  %p7367_p6 = por %p299_p4, %p298_p3 }
   0xd   : > { %p5502_p7 = scmp.ge.s32.totalorder %s7257_s20, 1  ;;  %p370_p8 = scmp.lt.s32.totalorder %s7257_s20, 3 }
   0xf   : > { %p371_p9 = pnand %p5502_p7, %p370_p8 }
  0x11   : > { %374 = sbr.rel (%p371_p9) target bundleno = 5481 (0x1569), region = 64 }
  0x16   : > { %v498_v0 = vld [vmem:[%s9619_s4 + $0x18] sm:$0xff]  ;;  %v497_v1 = vld [vmem:[%s9619_s4 + $0x10] sm:$0xff]  ;;  %p425_p10 = scmp.lt.s32.totalorder %s7346_s21, 1  ;;  %v496_v2 = vld [vmem:[%s9619_s4 + $0x8] sm:$0xff]  ;;  %vm499_vm0 = vcmask 261120   ;;  %s9723_s0 = sld [smem:[#allocation51_spill]]  ;;  %v949_v22 = vlaneseq }
  0x17   : > { %6314 = vmatprep.subr.mxu0 %v498_v0  ;;  %v495_v3 = vld [vmem:[%s9619_s4] sm:$0xff]  ;;  %vm1059_vm1 = vcmask 523264   ;;  %s9726_s1 = sld [smem:[#allocation52_spill]]  ;;  %vm7261_vm2 = vmmov 0   ;;  %s5827_s22 = sshll.u32 %s7346_s21, 8 }
  0x18   : > { %6315 = vmatpush3.msra.mxu0 %v498_v0  ;;  %s7384_s16 = scalar_select %p425_p10, %s7346_s21, 1  ;;  %v7435_v25 = vshrl.u32 %v949_v22, 7  ;;  %v446_v29 = vld [vmem:[%s9620_s5] sm:$0xf] }
  0x19   : > { %6316 = vmatprep.subr.mxu0 %v497_v1  ;;  %s7262_s21 = smov [#allocation2]  }
  0x1a   : > { %6317 = vmatpush3.msra.mxu0 %v497_v1  ;;  %s6882_s25 = smul.u32 384, %s7384_s16  ;;  %9724 = vst [vmem:[#allocation5_spill] sm:$0xff] %v7435_v25  ;;  %v7442_v28 = vsub.s32 0, %v7435_v25  ;;  %s5824_s15 = sshll.u32 %s7384_s16, 7 }
  0x1b   : > { %6318 = vmatprep.subr.mxu0 %v496_v2  ;;  %s7879_s14 = scalar_lea.vmem %s9617_s2, %s5824_s15  ;;  %s5826_s30 = sshll.u32 %s7384_s16, 3 }
  0x1c   : > { %6319 = vmatpush3.msra.mxu0 %v496_v2  ;;  %s7393_s12 = scalar_lea.vmem %s9723_s0, %s6882_s25  ;;  %9725 = vst [vmem:[#allocation6_spill] sm:$0xff] %v7442_v28  ;;  %v7448_v32 = vrot.slane %v446_v29, %v7442_v28 }
  0x1d   : > { %6320 = vmatprep.subr.mxu0 %v495_v3  ;;  %v447_v4 = vld [vmem:[%s7393_s12] sm:$0xff]  ;;  %v448_v5 = vld [vmem:[%s7393_s12 + $0x8] sm:$0xff]  ;;  %v449_v6 = vld [vmem:[%s7393_s12 + $0x10] sm:$0xff]  ;;  %s7600_s25 = scalar_lea.vmem %s9726_s1, %s5824_s15  ;;  %s7259_s15 = smov 64  }
  0x1e   : > { %6321 = vmatpush3.msra.mxu0 %v495_v3  ;;  %6322 = vmatprep.mubr.msk.f32.mxu0 %vm499_vm0, %v447_v4  ;;  %v450_v7 = vld [vmem:[%s7393_s12 + $0x18] sm:$0xff]  ;;  %v451_v8 = vld [vmem:[%s7393_s12 + $0x20] sm:$0xff]  ;;  %v452_v9 = vld [vmem:[%s7393_s12 + $0x28] sm:$0xff]  ;;  %s9515_s1 = scalar_lea.vmem %s9618_s3, %s5826_s30 }
  0x1f   : > { %6323 = vmatmul.mubr.msk.f32.vlgmr.msra.gmra.mxu0 %vm499_vm0, %v448_v5  ;;  %v453_v10 = vld [vmem:[%s7393_s12 + $0x30] sm:$0xff]  ;;  %v454_v11 = vld [vmem:[%s7393_s12 + $0x38] sm:$0xff]  ;;  %v455_v12 = vld [vmem:[%s7393_s12 + $0x40] sm:$0xff] }
  0x20   : > { %6325 = vmatprep.mubr.msk.f32.mxu0 %vm499_vm0, %v449_v6  ;;  %v456_v13 = vld [vmem:[%s7393_s12 + $0x48] sm:$0xff]  ;;  %v457_v14 = vld [vmem:[%s7393_s12 + $0x50] sm:$0xff]  ;;  %v458_v15 = vld [vmem:[%s7393_s12 + $0x58] sm:$0xff] }
  0x21   : > { %v459_v16 = vld [vmem:[%s7393_s12 + $0x60] sm:$0xff]  ;;  %v460_v17 = vld [vmem:[%s7393_s12 + $0x68] sm:$0xff]  ;;  %v461_v18 = vld [vmem:[%s7393_s12 + $0x70] sm:$0xff] }
  0x22   : > { %v462_v19 = vld [vmem:[%s7393_s12 + $0x78] sm:$0xff] }
  0x23   : > { %6326 = vmatmul.mubr.msk.f32.gmra.mxu0 %vm499_vm0, %v450_v7 }
  0x24   : > { %6328 = vmatprep.mubr.msk.f32.mxu0 %vm499_vm0, %v451_v8 }
  0x27   : > { %6329 = vmatmul.mubr.msk.f32.gmra.mxu0 %vm499_vm0, %v452_v9 }
  0x28   : > { %6331 = vmatprep.mubr.msk.f32.mxu0 %vm499_vm0, %v453_v10 }
  0x2b   : > { %6332 = vmatmul.mubr.msk.f32.gmra.mxu0 %vm499_vm0, %v454_v11 }
  0x2c   : > { %6334 = vmatprep.mubr.msk.f32.mxu0 %vm499_vm0, %v455_v12 }
  0x2f   : > { %6335 = vmatmul.mubr.msk.f32.gmra.mxu0 %vm499_vm0, %v456_v13 }
  0x30   : > { %6337 = vmatprep.mubr.msk.f32.mxu0 %vm499_vm0, %v457_v14 }
  0x33   : > { %6338 = vmatmul.mubr.msk.f32.gmra.mxu0 %vm499_vm0, %v458_v15 }
  0x34   : > { %6340 = vmatprep.mubr.msk.f32.mxu0 %vm499_vm0, %v459_v16 }
  0x37   : > { %6341 = vmatmul.mubr.msk.f32.gmra.mxu0 %vm499_vm0, %v460_v17 }
  0x38   : > { %6343 = vmatprep.mubr.msk.f32.mxu0 %vm499_vm0, %v461_v18 }
  0x3b   : > { %6344 = vmatmul.mubr.msk.f32.gmra.mxu0 %vm499_vm0, %v462_v19 }
  0xdf   : > { %v7427_v20 = vpop.f32.mrf.mxu0 }
  0xe1   : > { %v7429_v21 = vpop.f32.mrf.mxu0 }
  0xe3   : > { %v7431_v23 = vpop.f32.mrf.mxu0 }
  0xe5   : > { %v7433_v24 = vpop.f32.mrf.mxu0 }
  0xe7   : > { %v7437_v26 = vpop.f32.mrf.mxu0 }
  0xe8   : > { %v7530_v15 = vadd.f32 %v7437_v26, %v7448_v32 }
  0xe9   : > { %v7439_v27 = vpop.f32.mrf.mxu0 }
  0xea   : > { %v7535_v17 = vadd.f32 %v7448_v32, %v7439_v27  ;;  %v1076_v19 = vsel %vm1059_vm1, %v7530_v15, 0.0  ;;  %v1131_v22 = vmul.f32 %v7530_v15, %v7530_v15  ;;  %v7548_v27 = vadd.f32 %v7431_v23, %v7448_v32 }
  0xeb   : > { %v6333_v30 = vpop.f32.mrf.mxu0 }
  0xec   : > { %v7498_v62 = vadd.f32 %v6333_v30, %v7448_v32  ;;  %v1073_v26 = vsel %vm1059_vm1, %v7535_v17, 0.0  ;;  %v1130_v29 = vmul.f32 %v7535_v17, %v7535_v17  ;;  %v1157_v30 = vsel %vm1059_vm1, %v1131_v22, 0.0  ;;  %v488_v22 = vld [vmem:[%s7393_s12 + $0x148] sm:$0xff] }
  0xed   : > { %v740_v31 = vpop.f32.mrf.mxu0 }
  0xee   : > { %v1082_v4 = vsel %vm1059_vm1, %v7498_v62, 0.0  ;;  %v7517_v9 = vadd.f32 %v7448_v32, %v740_v31  ;;  %v1133_v12 = vmul.f32 %v7498_v62, %v7498_v62  ;;  %v7553_v31 = vadd.f32 %v7448_v32, %v7433_v24 }
  0xef   : > { %v6336_v33 = vpop.f32.mrf.mxu0  ;;  %v7566_v24 = vadd.f32 %v7427_v20, %v7448_v32 }
  0xf0   : > { %v7451_v34 = vadd.f32 %v6336_v33, %v7448_v32  ;;  %v1079_v13 = vsel %vm1059_vm1, %v7517_v9, 0.0  ;;  %v1132_v14 = vmul.f32 %v7517_v9, %v7517_v9  ;;  %v1163_v16 = vsel %vm1059_vm1, %v1133_v12, 0.0  ;;  %v485_v12 = vld [vmem:[%s7393_s12 + $0x130] sm:$0xff] }
  0xf1   : > { %v750_v35 = vpop.f32.mrf.mxu0  ;;  %v1154_v33 = vsel %vm1059_vm1, %v1130_v29, 0.0  ;;  %v1067_v23 = vsel %vm1059_vm1, %v7553_v31, 0.0  ;;  %v1127_v20 = vmul.f32 %v7566_v24, %v7566_v24  ;;  %v489_v29 = vld [vmem:[%s7393_s12 + $0x150] sm:$0xff] }
  0xf2   : > { %v7454_v36 = vadd.f32 %v7448_v32, %v750_v35  ;;  %v1088_v37 = vsel %vm1059_vm1, %v7451_v34, 0.0  ;;  %v1135_v38 = vmul.f32 %v7451_v34, %v7451_v34  ;;  %v1160_v18 = vsel %vm1059_vm1, %v1132_v14, 0.0  ;;  %v486_v14 = vld [vmem:[%s7393_s12 + $0x138] sm:$0xff] }
  0xf3   : > { %1089 = vadd.xlane.f32.xlu1 %v1088_v37  ;;  %v6339_v39 = vpop.f32.mrf.mxu0  ;;  %v1070_v35 = vsel %vm1059_vm1, %v7548_v27, 0.0  ;;  %v1129_v37 = vmul.f32 %v7548_v27, %v7548_v27 }
  0xf4   : > { %v1085_v40 = vsel %vm1059_vm1, %v7454_v36, 0.0  ;;  %v7463_v41 = vadd.f32 %v6339_v39, %v7448_v32  ;;  %v1134_v42 = vmul.f32 %v7454_v36, %v7454_v36  ;;  %v1169_v44 = vsel %vm1059_vm1, %v1135_v38, 0.0 }
  0xf5   : > { %1086 = vadd.xlane.f32.xlu0 %v1085_v40  ;;  %v760_v43 = vpop.f32.mrf.mxu0  ;;  %v1128_v38 = vmul.f32 %v7553_v31, %v7553_v31  ;;  %v1151_v39 = vsel %vm1059_vm1, %v1129_v37, 0.0  ;;  %v7571_v40 = vadd.f32 %v7448_v32, %v7429_v21  ;;  %v491_v37 = vld [vmem:[%s7393_s12 + $0x160] sm:$0xff] }
  0xf6   : > { %v7469_v45 = vadd.f32 %v7448_v32, %v760_v43  ;;  %v1166_v46 = vsel %vm1059_vm1, %v1134_v42, 0.0  ;;  %v1094_v47 = vsel %vm1059_vm1, %v7463_v41, 0.0  ;;  %v1137_v49 = vmul.f32 %v7463_v41, %v7463_v41 }
  0xf7   : > { %1170 = vadd.xlane.f32.xlu1 %v1169_v44  ;;  %v6342_v48 = vpop.f32.mrf.mxu0  ;;  %v1148_v42 = vsel %vm1059_vm1, %v1128_v38, 0.0  ;;  %v1064_v43 = vsel %vm1059_vm1, %v7566_v24, 0.0  ;;  %v1061_v44 = vsel %vm1059_vm1, %v7571_v40, 0.0  ;;  %v1126_v21 = vmul.f32 %v7571_v40, %v7571_v40  ;;  %v492_v38 = vld [vmem:[%s7393_s12 + $0x168] sm:$0xff] }
  0xf8   : > { %v1091_v50 = vsel %vm1059_vm1, %v7469_v45, 0.0  ;;  %v7479_v51 = vadd.f32 %v6342_v48, %v7448_v32  ;;  %v1136_v52 = vmul.f32 %v7469_v45, %v7469_v45  ;;  %v1175_v54 = vsel %vm1059_vm1, %v1137_v49, 0.0  ;;  %v464_v48 = vld [vmem:[%s7393_s12 + $0x88] sm:$0xff]  ;;  %v465_v49 = vld [vmem:[%s7393_s12 + $0x90] sm:$0xff] }
  0xf9   : > { %1167 = vadd.xlane.f32.xlu0 %v1166_v46  ;;  %v770_v53 = vpop.f32.mrf.mxu0  ;;  %v1142_v46 = vsel %vm1059_vm1, %v1126_v21, 0.0 }
  0xfa   : > { %v7485_v55 = vadd.f32 %v7448_v32, %v770_v53  ;;  %v1172_v56 = vsel %vm1059_vm1, %v1136_v52, 0.0  ;;  %v1100_v57 = vsel %vm1059_vm1, %v7479_v51, 0.0  ;;  %v1139_v60 = vmul.f32 %v7479_v51, %v7479_v51  ;;  %v467_v52 = vld [vmem:[%s7393_s12 + $0xa0] sm:$0xff]  ;;  %v468_v53 = vld [vmem:[%s7393_s12 + $0xa8] sm:$0xff] }
  0xfb   : > { %1095 = vadd.xlane.f32.xlu1 %v1094_v47  ;;  %v6345_v58 = vpop.f32.mrf.mxu0  ;;  %v463_v47 = vld [vmem:[%s7393_s12 + $0x80] sm:$0xff] }
  0xfc   : > { %v7491_v59 = vadd.f32 %v6345_v58, %v7448_v32  ;;  %v1097_v61 = vsel %vm1059_vm1, %v7485_v55, 0.0  ;;  %v1181_v63 = vsel %vm1059_vm1, %v1139_v60, 0.0  ;;  %v1138_v2 = vmul.f32 %v7485_v55, %v7485_v55  ;;  %6346 = vmatprep.mubr.msk.f32.mxu0 %vm499_vm0, %v463_v47  ;;  %v471_v58 = vld [vmem:[%s7393_s12 + $0xc0] sm:$0xff]  ;;  %v472_v60 = vld [vmem:[%s7393_s12 + $0xc8] sm:$0xff] }
  0xfd   : > { %1092 = vadd.xlane.f32.xlu0 %v1091_v50  ;;  %v780_v1 = vpop.f32.mrf.mxu0  ;;  %6347 = vmatmul.mubr.msk.f32.gmra.mxu0 %vm499_vm0, %v464_v48  ;;  %v466_v50 = vld [vmem:[%s7393_s12 + $0x98] sm:$0xff] }
  0xfe   : > { %v1106_v0 = vsel %vm1059_vm1, %v7491_v59, 0.0  ;;  %v7506_v3 = vadd.f32 %v7448_v32, %v780_v1  ;;  %v1141_v5 = vmul.f32 %v7491_v59, %v7491_v59  ;;  %v1178_v6 = vsel %vm1059_vm1, %v1138_v2, 0.0  ;;  %6349 = vmatprep.mubr.msk.f32.mxu0 %vm499_vm0, %v465_v49  ;;  %v476_v1 = vld [vmem:[%s7393_s12 + $0xe8] sm:$0xff]  ;;  %v477_v2 = vld [vmem:[%s7393_s12 + $0xf0] sm:$0xff] }
  0xff   : > { %1176 = vadd.xlane.f32.xlu1 %v1175_v54  ;;  %v1145_v32 = vsel %vm1059_vm1, %v1127_v20, 0.0  ;;  %v6927_v54 = vld [vmem:[%s7600_s25] sm:$0xff]   ;;  %v494_v20 = vld [vmem:[%s7393_s12 + $0x178] sm:$0xff] }
 0x100   : > { %v1187_v7 = vsel %vm1059_vm1, %v1141_v5, 0.0  ;;  %v1140_v8 = vmul.f32 %v7506_v3, %v7506_v3  ;;  %v1103_v10 = vsel %vm1059_vm1, %v7506_v3, 0.0  ;;  %6410 = vmatprep.mubr.bf16.mxu1 %v6927_v54  ;;  %v479_v5 = vld [vmem:[%s7393_s12 + $0x100] sm:$0xff] }
 0x101   : > { %1173 = vadd.xlane.f32.xlu0 %v1172_v56  ;;  %6350 = vmatmul.mubr.msk.f32.gmra.mxu0 %vm499_vm0, %v466_v50  ;;  %v469_v56 = vld [vmem:[%s7393_s12 + $0xb0] sm:$0xff] }
 0x102   : > { %v1184_v11 = vsel %vm1059_vm1, %v1140_v8, 0.0  ;;  %6352 = vmatprep.mubr.msk.f32.mxu0 %vm499_vm0, %v467_v52  ;;  %v482_v8 = vld [vmem:[%s7393_s12 + $0x118] sm:$0xff] }
 0x103   : > { %1101 = vadd.xlane.f32.xlu1 %v1100_v57  ;;  %v470_v57 = vld [vmem:[%s7393_s12 + $0xb8] sm:$0xff] }
 0x105   : > { %1098 = vadd.xlane.f32.xlu0 %v1097_v61  ;;  %6353 = vmatmul.mubr.msk.f32.gmra.mxu0 %vm499_vm0, %v468_v53  ;;  %v473_v61 = vld [vmem:[%s7393_s12 + $0xd0] sm:$0xff] }
 0x106   : > { %6355 = vmatprep.mubr.msk.f32.mxu0 %vm499_vm0, %v469_v56 }
 0x107   : > { %1182 = vadd.xlane.f32.xlu1 %v1181_v63  ;;  %v474_v63 = vld [vmem:[%s7393_s12 + $0xd8] sm:$0xff] }
 0x109   : > { %1107 = vadd.xlane.f32.xlu0 %v1106_v0  ;;  %6356 = vmatmul.mubr.msk.f32.gmra.mxu0 %vm499_vm0, %v470_v57  ;;  %v475_v0 = vld [vmem:[%s7393_s12 + $0xe0] sm:$0xff] }
 0x10a   : > { %6358 = vmatprep.mubr.msk.f32.mxu0 %vm499_vm0, %v471_v58 }
 0x10b   : > { %1083 = vadd.xlane.f32.xlu1 %v1082_v4  ;;  %v478_v4 = vld [vmem:[%s7393_s12 + $0xf8] sm:$0xff] }
 0x10d   : > { %1179 = vadd.xlane.f32.xlu0 %v1178_v6  ;;  %6359 = vmatmul.mubr.msk.f32.gmra.mxu0 %vm499_vm0, %v472_v60  ;;  %v480_v6 = vld [vmem:[%s7393_s12 + $0x108] sm:$0xff] }
 0x10e   : > { %6361 = vmatprep.mubr.msk.f32.mxu0 %vm499_vm0, %v473_v61 }
 0x10f   : > { %1188 = vadd.xlane.f32.xlu1 %v1187_v7  ;;  %v481_v7 = vld [vmem:[%s7393_s12 + $0x110] sm:$0xff] }
 0x111   : > { %1104 = vadd.xlane.f32.xlu0 %v1103_v10  ;;  %6362 = vmatmul.mubr.msk.f32.gmra.mxu0 %vm499_vm0, %v474_v63  ;;  %v483_v10 = vld [vmem:[%s7393_s12 + $0x120] sm:$0xff] }
 0x112   : > { %6364 = vmatprep.mubr.msk.f32.mxu0 %vm499_vm0, %v475_v0 }
 0x113   : > { %1185 = vadd.xlane.f32.xlu1 %v1184_v11  ;;  %v484_v11 = vld [vmem:[%s7393_s12 + $0x128] sm:$0xff] }
 0x115   : > { %1080 = vadd.xlane.f32.xlu0 %v1079_v13  ;;  %6365 = vmatmul.mubr.msk.f32.gmra.mxu0 %vm499_vm0, %v476_v1 }
 0x116   : > { %6367 = vmatprep.mubr.msk.f32.mxu0 %vm499_vm0, %v477_v2 }
 0x117   : > { %1164 = vadd.xlane.f32.xlu1 %v1163_v16 }
 0x119   : > { %1161 = vadd.xlane.f32.xlu0 %v1160_v18  ;;  %6368 = vmatmul.mubr.msk.f32.gmra.mxu0 %vm499_vm0, %v478_v4  ;;  %v487_v18 = vld [vmem:[%s7393_s12 + $0x140] sm:$0xff] }
 0x11a   : > { %6370 = vmatprep.mubr.msk.f32.mxu0 %vm499_vm0, %v479_v5 }
 0x11b   : > { %1077 = vadd.xlane.f32.xlu1 %v1076_v19 }
 0x11d   : > { %1074 = vadd.xlane.f32.xlu0 %v1073_v26  ;;  %6371 = vmatmul.mubr.msk.f32.gmra.mxu0 %vm499_vm0, %v480_v6 }
 0x11e   : > { %6373 = vmatprep.mubr.msk.f32.mxu0 %vm499_vm0, %v481_v7 }
 0x11f   : > { %1158 = vadd.xlane.f32.xlu1 %v1157_v30 }
 0x121   : > { %1155 = vadd.xlane.f32.xlu0 %v1154_v33  ;;  %6374 = vmatmul.mubr.msk.f32.gmra.mxu0 %vm499_vm0, %v482_v8  ;;  %v490_v33 = vld [vmem:[%s7393_s12 + $0x158] sm:$0xff] }
 0x122   : > { %6376 = vmatprep.mubr.msk.f32.mxu0 %vm499_vm0, %v483_v10 }
 0x123   : > { %1071 = vadd.xlane.f32.xlu1 %v1070_v35 }
 0x125   : > { %1068 = vadd.xlane.f32.xlu0 %v1067_v23  ;;  %6377 = vmatmul.mubr.msk.f32.gmra.mxu0 %vm499_vm0, %v484_v11 }
 0x126   : > { %6379 = vmatprep.mubr.msk.f32.mxu0 %vm499_vm0, %v485_v12 }
 0x127   : > { %1152 = vadd.xlane.f32.xlu1 %v1151_v39 }
 0x129   : > { %1149 = vadd.xlane.f32.xlu0 %v1148_v42  ;;  %6380 = vmatmul.mubr.msk.f32.gmra.mxu0 %vm499_vm0, %v486_v14  ;;  %v493_v42 = vld [vmem:[%s7393_s12 + $0x170] sm:$0xff]  ;;  %s7201_s12 = sshll.u32 %s7262_s21, 4  ;;  %s7202_s12 = int_to_ptr.vmem [resolvable:$false] %s7201_s12 }
 0x12a   : > { %6382 = vmatprep.mubr.msk.f32.mxu0 %vm499_vm0, %v487_v18  ;;  %s7203_s13 = scalar_lea.vmem %s7202_s12, 512 }
 0x12b   : > { %1065 = vadd.xlane.f32.xlu1 %v1064_v43 }
 0x12d   : > { %1062 = vadd.xlane.f32.xlu0 %v1061_v44  ;;  %6383 = vmatmul.mubr.msk.f32.gmra.mxu0 %vm499_vm0, %v488_v22 }
 0x12e   : > { %6385 = vmatprep.mubr.msk.f32.mxu0 %vm499_vm0, %v489_v29 }
 0x12f   : > { %1146 = vadd.xlane.f32.xlu1 %v1145_v32 }
 0x131   : > { %1143 = vadd.xlane.f32.xlu0 %v1142_v46  ;;  %6386 = vmatmul.mubr.msk.f32.gmra.mxu0 %vm499_vm0, %v490_v33 }
 0x132   : > { %6388 = vmatprep.mubr.msk.f32.mxu0 %vm499_vm0, %v491_v37 }
 0x135   : > { %6389 = vmatmul.mubr.msk.f32.gmra.mxu0 %vm499_vm0, %v492_v38 }
 0x136   : > { %6391 = vmatprep.mubr.msk.f32.mxu0 %vm499_vm0, %v493_v42 }
 0x139   : > { %6392 = vmatmul.mubr.msk.f32.gmra.mxu0 %vm499_vm0, %v494_v20 }
 0x17c   : > { %v1090_v13 = vpop.xlane.xlu1 %1089 }
 0x17d   : > { %v7673_v0 = vmul.f32 0.015625, %v1090_v13 }
 0x17e   : > { %v1087_v16 = vpop.xlane.xlu0 %1086 }
 0x17f   : > { %v7667_v54 = vmul.f32 0.015625, %v1087_v16  ;;  %v1215_v33 = vmul.f32 %v7673_v0, %v7673_v0 }
 0x180   : > { %v1171_v19 = vpop.xlane.xlu1 %1170 }
 0x181   : > { %v1214_v11 = vmul.f32 %v7667_v54, %v7667_v54  ;;  %v1199_v12 = vmul.f32 0.015625, %v1171_v19 }
 0x182   : > { %v1168_v26 = vpop.xlane.xlu0 %1167 }
 0x183   : > { %v1198_v1 = vmul.f32 0.015625, %v1168_v26 }
 0x184   : > { %v1096_v30 = vpop.xlane.xlu1 %1095 }
 0x185   : > { %v7663_v52 = vmul.f32 0.015625, %v1096_v30 }
 0x186   : > { %v1093_v35 = vpop.xlane.xlu0 %1092 }
 0x187   : > { %v7661_v48 = vmul.f32 0.015625, %v1093_v35  ;;  %v1217_v6 = vmul.f32 %v7663_v52, %v7663_v52  ;;  %v1230_v35 = vsub.f32 %v1198_v1, %v1214_v11 }
 0x188   : > { %v1177_v23 = vpop.xlane.xlu1 %1176 }
 0x189   : > { %v1201_v60 = vmul.f32 0.015625, %v1177_v23  ;;  %v1216_v2 = vmul.f32 %v7661_v48, %v7661_v48 }
 0x18a   : > { %v1174_v39 = vpop.xlane.xlu0 %1173 }
 0x18b   : > { %v1200_v56 = vmul.f32 0.015625, %v1174_v39  ;;  %v1233_v16 = vsub.f32 %v1201_v60, %v1217_v6 }
 0x18c   : > { %v1102_v43 = vpop.xlane.xlu1 %1101 }
 0x18d   : > { %v7657_v32 = vmul.f32 0.015625, %v1102_v43  ;;  %v1232_v13 = vsub.f32 %v1200_v56, %v1216_v2  ;;  %v1231_v43 = vsub.f32 %v1199_v12, %v1215_v33  ;;  %v1265_v20 = vadd.f32 1e-05, %v1233_v16 }
 0x18e   : > { %v1099_v44 = vpop.xlane.xlu0 %1098 }
 0x18f   : > { %v7659_v47 = vmul.f32 0.015625, %v1099_v44  ;;  %v1219_v57 = vmul.f32 %v7657_v32, %v7657_v32  ;;  %v1264_v38 = vadd.f32 1e-05, %v1232_v13  ;;  %v1263_v60 = vadd.f32 1e-05, %v1231_v43 }
 0x190   : > { %v1183_v21 = vpop.xlane.xlu1 %1182 }
 0x191   : > { %v1203_v49 = vmul.f32 0.015625, %v1183_v21  ;;  %v1218_v61 = vmul.f32 %v7659_v47, %v7659_v47  ;;  %v1250_v33 = vsub.f32 %v7485_v55, %v7659_v47  ;;  %v1251_v55 = vsub.f32 %v7479_v51, %v7657_v32 }
 0x192   : > { %v1108_v46 = vpop.xlane.xlu0 %1107 }
 0x193   : > { %v7665_v53 = vmul.f32 0.015625, %v1108_v46  ;;  %v1235_v4 = vsub.f32 %v1203_v49, %v1219_v57  ;;  %v1262_v49 = vadd.f32 1e-05, %v1230_v35 }
 0x194   : > { %v1084_v50 = vpop.xlane.xlu1 %1083 }
 0x195   : > { %v1221_v7 = vmul.f32 %v7665_v53, %v7665_v53  ;;  %v1267_v29 = vadd.f32 1e-05, %v1235_v4  ;;  %v7689_v39 = vmul.f32 0.015625, %v1084_v50  ;;  %v1253_v35 = vsub.f32 %v7491_v59, %v7665_v53 }
 0x196   : > { %v1180_v58 = vpop.xlane.xlu0 %1179 }
 0x197   : > { %v1202_v63 = vmul.f32 0.015625, %v1180_v58  ;;  %v1213_v57 = vmul.f32 %v7689_v39, %v7689_v39 }
 0x198   : > { %v1189_v5 = vpop.xlane.xlu1 %1188 }
 0x199   : > { %v1234_v8 = vsub.f32 %v1202_v63, %v1218_v61  ;;  %v1205_v10 = vmul.f32 0.015625, %v1189_v5 }
 0x19a   : > { %v1105_v14 = vpop.xlane.xlu0 %1104 }
 0x19b   : > { %v1266_v18 = vadd.f32 1e-05, %v1234_v8  ;;  %v1237_v22 = vsub.f32 %v1205_v10, %v1221_v7  ;;  %v7683_v26 = vmul.f32 0.015625, %v1105_v14 }
 0x19c   : > { %v1186_v30 = vpop.xlane.xlu1 %1185 }
 0x19d   : > { %v1269_v37 = vadd.f32 1e-05, %v1237_v22  ;;  %v1220_v23 = vmul.f32 %v7683_v26, %v7683_v26  ;;  %7032 = vrsqrt.f32 %v1266_v18  ;;  %v1204_v19 = vmul.f32 0.015625, %v1186_v30 }
 0x19e   : > { %v1081_v42 = vpop.xlane.xlu0 %1080 }
 0x19f   : > { %7034 = vrsqrt.f32 %v1269_v37  ;;  %v7691_v44 = vmul.f32 0.015625, %v1081_v42  ;;  %v1236_v21 = vsub.f32 %v1204_v19, %v1220_v23  ;;  %v1053_v23 = vld [vmem:[%s9624_s9] sm:$0x7f] }
 0x1a0   : > { %7036 = vrsqrt.f32 %v1267_v29  ;;  %v1165_v46 = vpop.xlane.xlu1 %1164 }
 0x1a1   : > { %v1197_v56 = vmul.f32 0.015625, %v1165_v46  ;;  %7038 = vrsqrt.f32 %v1264_v38  ;;  %v1268_v58 = vadd.f32 1e-05, %v1236_v21  ;;  %v1212_v61 = vmul.f32 %v7691_v44, %v7691_v44 }
 0x1a2   : > { %v1162_v50 = vpop.xlane.xlu0 %1161  ;;  %7040 = vrsqrt.f32 %v1265_v20  ;;  %v7715_v20 = vsub.s32 1, %v7435_v25  ;;  %v1246_v46 = vsub.f32 %v7454_v36, %v7667_v54  ;;  %v1249_v36 = vsub.f32 %v7463_v41, %v7663_v52 }
 0x1a3   : > { %v1196_v63 = vmul.f32 0.015625, %v1162_v50  ;;  %7042 = vrsqrt.f32 %v1268_v58  ;;  %v1229_v1 = vsub.f32 %v1197_v56, %v1213_v57  ;;  %v7724_v57 = vrot.slane %v1053_v23, %v7442_v28 }
 0x1a4   : > { %v1078_v2 = vpop.xlane.xlu1 %1077  ;;  %7044 = vrsqrt.f32 %v1262_v49  ;;  %9727 = vst [vmem:[#allocation7_spill] sm:$0xff] %v7715_v20  ;;  %v1248_v49 = vsub.f32 %v7469_v45, %v7661_v48  ;;  %v1252_v50 = vsub.f32 %v7506_v3, %v7683_v26  ;;  %v1247_v52 = vsub.f32 %v7451_v34, %v7673_v0 }
 0x1a5   : > { %v1228_v4 = vsub.f32 %v1196_v63, %v1212_v61  ;;  %v7697_v5 = vmul.f32 0.015625, %v1078_v2  ;;  %7046 = vrsqrt.f32 %v1263_v60  ;;  %v1261_v8 = vadd.f32 1e-05, %v1229_v1 }
 0x1a6   : > { %v1075_v6 = vpop.xlane.xlu0 %1074 }
 0x1a7   : > { %v1260_v7 = vadd.f32 1e-05, %v1228_v4  ;;  %v7699_v10 = vmul.f32 0.015625, %v1075_v6  ;;  %v1211_v12 = vmul.f32 %v7697_v5, %v7697_v5 }
 0x1a8   : > { %v1159_v11 = vpop.xlane.xlu1 %1158 }
 0x1a9   : > { %v1195_v13 = vmul.f32 0.015625, %v1159_v11  ;;  %7048 = vrsqrt.f32 %v1260_v7  ;;  %v1210_v18 = vmul.f32 %v7699_v10, %v7699_v10 }
 0x1aa   : > { %v1156_v14 = vpop.xlane.xlu0 %1155  ;;  %v7033_v16 = vpop.eup %7032  ;;  %7050 = vrsqrt.f32 %v1261_v8 }
 0x1ab   : > { %v1227_v22 = vsub.f32 %v1195_v13, %v1211_v12  ;;  %v1194_v29 = vmul.f32 0.015625, %v1156_v14  ;;  %v1298_v59 = vmul.f32 %v7033_v16, %v1250_v33  ;;  %v7742_v13 = vrot.slane %v1053_v23, %v7715_v20 }
 0x1ac   : > { %v7035_v30 = vpop.eup %7034  ;;  %v1072_v37 = vpop.xlane.xlu1 %1071 }
 0x1ad   : > { %v7037_v38 = vpop.eup %7036  ;;  %v1259_v19 = vadd.f32 1e-05, %v1227_v22  ;;  %v1226_v42 = vsub.f32 %v1194_v29, %v1210_v18  ;;  %v7712_v43 = vmul.f32 0.015625, %v1072_v37  ;;  %v1301_v21 = vmul.f32 %v7035_v30, %v1253_v35 }
 0x1ae   : > { %v1069_v47 = vpop.xlane.xlu0 %1068  ;;  %v7039_v53 = vpop.eup %7038  ;;  %v1299_v60 = vmul.f32 %v7037_v38, %v1251_v55  ;;  %v1318_v3 = vmul.f32 %v7724_v57, %v1298_v59 }
 0x1af   : > { %v1258_v56 = vadd.f32 1e-05, %v1226_v42  ;;  %v7041_v58 = vpop.eup %7040  ;;  %7052 = vrsqrt.f32 %v1259_v19  ;;  %v7728_v51 = vmul.f32 0.015625, %v1069_v47  ;;  %v1209_v45 = vmul.f32 %v7712_v43, %v7712_v43 }
 0x1b0   : > { %v1153_v32 = vpop.xlane.xlu1 %1152  ;;  %v7043_v61 = vpop.eup %7042  ;;  %v1321_v2 = vmul.f32 %v7724_v57, %v1301_v21  ;;  %v1296_v26 = vmul.f32 %v7039_v53, %v1248_v49  ;;  %v1297_v8 = vmul.f32 %v7041_v58, %v1249_v36  ;;  %v1319_v14 = vmul.f32 %v7724_v57, %v1299_v60 }
 0x1b1   : > { %7054 = vrsqrt.f32 %v1258_v56  ;;  %v1193_v48 = vmul.f32 0.015625, %v1153_v32  ;;  %v7045_v54 = vpop.eup %7044  ;;  %v1300_v1 = vmul.f32 %v7043_v61, %v1252_v50  ;;  %v1208_v4 = vmul.f32 %v7728_v51, %v7728_v51 }
 0x1b2   : > { %v1150_v63 = vpop.xlane.xlu0 %1149  ;;  %v7047_v41 = vpop.eup %7046  ;;  %v1294_v29 = vmul.f32 %v7045_v54, %v1246_v46  ;;  %v7751_v35 = vadd.f32 %v7742_v13, %v1321_v2  ;;  %v7754_v34 = vadd.f32 %v7742_v13, %v1318_v3  ;;  %v1316_v0 = vmul.f32 %v7724_v57, %v1296_v26 }
 0x1b3   : > { %v1225_v6 = vsub.f32 %v1193_v48, %v1209_v45  ;;  %v1192_v7 = vmul.f32 0.015625, %v1150_v63  ;;  %v1320_v12 = vmul.f32 %v7724_v57, %v1300_v1  ;;  %v1317_v38 = vmul.f32 %v7724_v57, %v1297_v8 }
 0x1b4   : > { %v1066_v11 = vpop.xlane.xlu1 %1065  ;;  %9729 = vst [vmem:[#allocation9_spill] sm:$0xff] %v7751_v35  ;;  %9730 = vst [vmem:[#allocation10_spill] sm:$0xff] %v7754_v34  ;;  %v1295_v19 = vmul.f32 %v7047_v41, %v1247_v52  ;;  %v1244_v42 = vsub.f32 %v7517_v9, %v7691_v44  ;;  %v7765_v59 = vadd.f32 %v7742_v13, %v1319_v14 }
 0x1b5   : > { %v1257_v16 = vadd.f32 1e-05, %v1225_v6  ;;  %v1224_v18 = vsub.f32 %v1192_v7, %v1208_v4  ;;  %v7745_v22 = vmul.f32 0.015625, %v1066_v11  ;;  %v7748_v33 = vadd.f32 %v7742_v13, %v1320_v12 }
 0x1b6   : > { %v1063_v30 = vpop.xlane.xlu0 %1062  ;;  %v7049_v37 = vpop.eup %7048  ;;  %9731 = vst [vmem:[#allocation11_spill] sm:$0xff] %v7765_v59  ;;  %v1245_v46 = vsub.f32 %v7498_v62, %v7689_v39  ;;  %v1348_v44 = vpack.c.bf16 %v7765_v59, %v7754_v34  ;;  %v7774_v58 = vadd.f32 %v7742_v13, %v1316_v0  ;;  %v1314_v50 = vmul.f32 %v7724_v57, %v1294_v29 }
 0x1b7   : > { %9728 = vst [vmem:[#allocation8_spill] sm:$0xff] %v7748_v33  ;;  %7056 = vrsqrt.f32 %v1257_v16  ;;  %v1256_v23 = vadd.f32 1e-05, %v1224_v18  ;;  %v7760_v55 = vmul.f32 0.015625, %v1063_v30  ;;  %v1349_v21 = vpack.c.bf16 %v7751_v35, %v7748_v33  ;;  %v7051_v53 = vpop.eup %7050 }
 0x1b8   : > { %v1147_v47 = vpop.xlane.xlu1 %1146  ;;  %v1207_v49 = vmul.f32 %v7745_v22, %v7745_v22  ;;  %9732 = vst [vmem:[#allocation12_spill] sm:$0xff] %v7774_v58  ;;  %v1292_v32 = vmul.f32 %v7049_v37, %v1244_v42  ;;  %v7780_v61 = vadd.f32 %v7742_v13, %v1317_v38  ;;  %v1315_v36 = vmul.f32 %v7724_v57, %v1295_v19 }
 0x1b9   : > { %7058 = vrsqrt.f32 %v1256_v23  ;;  %v1191_v56 = vmul.f32 0.015625, %v1147_v47  ;;  %6394 = vmatprep.subr.bf16.mxu1 %v1349_v21  ;;  %v1206_v60 = vmul.f32 %v7760_v55, %v7760_v55  ;;  %v1293_v45 = vmul.f32 %v7051_v53, %v1245_v46 }
 0x1ba   : > { %v1144_v9 = vpop.xlane.xlu0 %1143  ;;  %6395 = vmatpush3.bf16.msra.mxu1 %v1349_v21  ;;  %9733 = vst [vmem:[#allocation13_spill] sm:$0xff] %v7780_v61  ;;  %v1242_v54 = vsub.f32 %v7535_v17, %v7699_v10  ;;  %v1243_v3 = vsub.f32 %v7530_v15, %v7697_v5  ;;  %v1347_v26 = vpack.c.bf16 %v7780_v61, %v7774_v58 }
 0x1bb   : > { %v1223_v62 = vsub.f32 %v1191_v56, %v1207_v49  ;;  %v1190_v39 = vmul.f32 0.015625, %v1144_v9  ;;  %6396 = vmatprep.subr.bf16.mxu1 %v1348_v44  ;;  %v7790_v4 = vadd.f32 %v7742_v13, %v1314_v50  ;;  %v1312_v6 = vmul.f32 %v7724_v57, %v1292_v32  ;;  %v6929_v50 = vld [vmem:[%s7600_s25 + $0x10] sm:$0xff]   ;;  %v6931_v32 = vld [vmem:[%s7600_s25 + $0x20] sm:$0xff]  }
 0x1bc   : > { %v7053_v48 = vpop.eup %7052  ;;  %v7794_v17 = vadd.f32 %v7742_v13, %v1315_v36  ;;  %v1313_v10 = vmul.f32 %v7724_v57, %v1293_v45  ;;  %v1241_v11 = vsub.f32 %v7548_v27, %v7712_v43  ;;  %v1240_v18 = vsub.f32 %v7553_v31, %v7728_v51  ;;  %v6936_v36 = vld [vmem:[%s7600_s25 + $0x48] sm:$0xff]   ;;  %v6937_v45 = vld [vmem:[%s7600_s25 + $0x50] sm:$0xff]  }
 0x1bd   : > { %v1255_v63 = vadd.f32 1e-05, %v1223_v62  ;;  %v1222_v1 = vsub.f32 %v1190_v39, %v1206_v60  ;;  %9734 = vst [vmem:[#allocation14_spill] sm:$0xff] %v7790_v4  ;;  %v1291_v41 = vmul.f32 %v7053_v48, %v1243_v3  ;;  %v7800_v5 = vadd.f32 %v7742_v13, %v1312_v6  ;;  %v6933_v60 = vld [vmem:[%s7600_s25 + $0x30] sm:$0xff]   ;;  %v6934_v62 = vld [vmem:[%s7600_s25 + $0x38] sm:$0xff]   ;;  %v6935_v39 = vld [vmem:[%s7600_s25 + $0x40] sm:$0xff]   ;;  %v7860_v3 = vpop.f32.mrf.mxu0 }
 0x1be   : > { %v7055_v2 = vpop.eup %7054  ;;  %6397 = vmatpush3.bf16.msra.mxu1 %v1348_v44  ;;  %9735 = vst [vmem:[#allocation15_spill] sm:$0xff] %v7794_v17  ;;  %v1346_v15 = vpack.c.bf16 %v7794_v17, %v7790_v4  ;;  %v7806_v14 = vadd.f32 %v7742_v13, %v1313_v10  ;;  %v1239_v51 = vsub.f32 %v7566_v24, %v7745_v22  ;;  %v6928_v44 = vld [vmem:[%s7600_s25 + $0x8] sm:$0xff]   ;;  %v6938_v48 = vld [vmem:[%s7600_s25 + $0x58] sm:$0xff]  }
 0x1bf   : > { %7060 = vrsqrt.f32 %v1255_v63  ;;  %v1254_v7 = vadd.f32 1e-05, %v1222_v1  ;;  %v1290_v8 = vmul.f32 %v7055_v2, %v1242_v54  ;;  %6398 = vmatprep.subr.bf16.mxu1 %v1347_v26  ;;  %9736 = vst [vmem:[#allocation16_spill] sm:$0xff] %v7800_v5  ;;  %v1311_v16 = vmul.f32 %v7724_v57, %v1291_v41  ;;  %v6939_v54 = vld [vmem:[%s7600_s25 + $0x60] sm:$0xff]   ;;  %v6940_v63 = vld [vmem:[%s7600_s25 + $0x68] sm:$0xff]   ;;  %v6941_v1 = vld [vmem:[%s7600_s25 + $0x70] sm:$0xff]  }
 0x1c0   : > { %9737 = vst [vmem:[#allocation17_spill] sm:$0xff] %v7806_v14  ;;  %v1345_v0 = vpack.c.bf16 %v7806_v14, %v7800_v5  ;;  %v1238_v21 = vsub.f32 %v7571_v40, %v7760_v55  ;;  %v6942_v2 = vld [vmem:[%s7600_s25 + $0x78] sm:$0xff]  }
 0x1c1   : > { %7062 = vrsqrt.f32 %v1254_v7  ;;  %v1310_v52 = vmul.f32 %v7724_v57, %v1290_v8  ;;  %v7818_v23 = vadd.f32 %v7742_v13, %v1311_v16  ;;  %v6945_v16 = vld [vmem:[%s7879_s14 + $0x4] ss:$8 sps:$4 sm:$0xff]  }
 0x1c2   : > { %6399 = vmatpush3.bf16.msra.mxu1 %v1347_v26  ;;  %v7862_v26 = vpop.f32.mrf.mxu0 }
 0x1c3   : > { %6400 = vmatprep.subr.bf16.mxu1 %v1346_v15  ;;  %v7814_v37 = vadd.f32 %v7742_v13, %v1310_v52  ;;  %9739 = vst [vmem:[#allocation19_spill] sm:$0xff] %v7818_v23 }
 0x1c4   : > { %v7057_v12 = vpop.eup %7056  ;;  %v6351_v6 = vpop.f32.mrf.mxu0 }
 0x1c5   : > { %v1289_v29 = vmul.f32 %v7057_v12, %v1241_v11  ;;  %9738 = vst [vmem:[#allocation18_spill] sm:$0xff] %v7814_v37  ;;  %v1344_v31 = vpack.c.bf16 %v7818_v23, %v7814_v37 }
 0x1c6   : > { %v7059_v30 = vpop.eup %7058  ;;  %6401 = vmatpush3.bf16.msra.mxu1 %v1346_v15  ;;  %v800_v7 = vpop.f32.mrf.mxu0 }
 0x1c7   : > { %v1288_v27 = vmul.f32 %v7059_v30, %v1240_v18  ;;  %v1309_v43 = vmul.f32 %v7724_v57, %v1289_v29  ;;  %6402 = vmatprep.subr.bf16.mxu1 %v1345_v0 }
 0x1c8   : > { %v7864_v8 = vpop.f32.mrf.mxu0 }
 0x1c9   : > { %v1308_v38 = vmul.f32 %v7724_v57, %v1288_v27  ;;  %v7829_v42 = vadd.f32 %v7742_v13, %v1309_v43 }
 0x1ca   : > { %6403 = vmatpush3.bf16.msra.mxu1 %v1345_v0  ;;  %v7866_v10 = vpop.f32.mrf.mxu0 }
 0x1cb   : > { %v7826_v19 = vadd.f32 %v7742_v13, %v1308_v38  ;;  %9741 = vst [vmem:[#allocation21_spill] sm:$0xff] %v7829_v42  ;;  %6404 = vmatprep.subr.bf16.mxu1 %v1344_v31 }
 0x1cc   : > { %v7061_v47 = vpop.eup %7060  ;;  %v6357_v41 = vpop.f32.mrf.mxu0 }
 0x1cd   : > { %9740 = vst [vmem:[#allocation20_spill] sm:$0xff] %v7826_v19  ;;  %v1343_v53 = vpack.c.bf16 %v7829_v42, %v7826_v19  ;;  %v1287_v46 = vmul.f32 %v7061_v47, %v1239_v51 }
 0x1ce   : > { %v7063_v49 = vpop.eup %7062  ;;  %6405 = vmatpush3.bf16.msra.mxu1 %v1344_v31  ;;  %v820_v15 = vpop.f32.mrf.mxu0  ;;  %v7128_v31 = vld [vmem:[%s9620_s5] sm:$0xf] }
 0x1cf   : > { %v1286_v24 = vmul.f32 %v7063_v49, %v1238_v21  ;;  %v1307_v22 = vmul.f32 %v7724_v57, %v1287_v46  ;;  %6406 = vmatprep.subr.bf16.mxu1 %v1343_v53  ;;  %v7900_v51 = vrot.slane %v7128_v31, %v7715_v20 }
 0x1d0   : > { %v7868_v52 = vpop.f32.mrf.mxu0 }
 0x1d1   : > { %v1306_v56 = vmul.f32 %v7724_v57, %v1286_v24  ;;  %v7841_v55 = vadd.f32 %v7742_v13, %v1307_v22  ;;  %v6930_v57 = vld [vmem:[%s7600_s25 + $0x18] sm:$0xff]   ;;  %v7903_v47 = vadd.f32 %v7900_v51, %v800_v7  ;;  %v7910_v49 = vadd.f32 %v6351_v6, %v7900_v51 }
 0x1d2   : > { %6407 = vmatpush3.bf16.msra.mxu1 %v1343_v53  ;;  %v7870_v11 = vpop.f32.mrf.mxu0 }
 0x1d3   : > { %v7838_v40 = vadd.f32 %v7742_v13, %v1306_v56  ;;  %9743 = vst [vmem:[#allocation23_spill] sm:$0xff] %v7841_v55  ;;  %v6932_v13 = vld [vmem:[%s7600_s25 + $0x28] sm:$0xff]   ;;  %9744 = vst [vmem:[#allocation24_spill] sm:$0xff] %v7903_v47 }
 0x1d4   : > { %v7872_v12 = vpop.f32.mrf.mxu0  ;;  %9745 = vst [vmem:[#allocation25_spill] sm:$0xff] %v7910_v49 }
 0x1d5   : > { %9742 = vst [vmem:[#allocation22_spill] sm:$0xff] %v7838_v40  ;;  %v1342_v9 = vpack.c.bf16 %v7841_v55, %v7838_v40 }
 0x1d6   : > { %v7882_v18 = vpop.f32.mrf.mxu0 }
 0x1d7   : > { %6408 = vmatprep.subr.bf16.mxu1 %v1342_v9 }
 0x1d8   : > { %6409 = vmatpush3.bf16.msra.mxu1 %v1342_v9  ;;  %v7884_v29 = vpop.f32.mrf.mxu0 }
 0x1da   : > { %v7886_v30 = vpop.f32.mrf.mxu0 }
 0x1db   : > { %6411 = vmatmul.mubr.bf16.vlgmr.msra.gmra.mxu1 %v6928_v44 }
 0x1dc   : > { %6414 = vmatprep.mubr.bf16.mxu1 %v6929_v50  ;;  %v7888_v0 = vpop.f32.mrf.mxu0 }
 0x1dd   : > { %v7977_v14 = vadd.f32 %v7888_v0, %v7900_v51  ;;  %v7993_v0 = vadd.f32 %v7884_v29, %v7900_v51  ;;  %v8009_v29 = vadd.f32 %v7872_v12, %v7900_v51 }
 0x1de   : > { %v7890_v27 = vpop.f32.mrf.mxu0 }
 0x1df   : > { %9750 = vst [vmem:[#allocation30_spill] sm:$0xff] %v7977_v14  ;;  %v7981_v5 = vadd.f32 %v7900_v51, %v7890_v27  ;;  %9754 = vst [vmem:[#allocation34_spill] sm:$0xff] %v7993_v0 }
 0x1e0   : > { %v7892_v43 = vpop.f32.mrf.mxu0 }
 0x1e1   : > { %9751 = vst [vmem:[#allocation31_spill] sm:$0xff] %v7981_v5 }
 0x1e2   : > { %v7894_v38 = vpop.f32.mrf.mxu0 }
 0x1e3   : > { %6415 = vmatmul.mubr.bf16.gmra.mxu1 %v6930_v57 }
 0x1e4   : > { %6418 = vmatprep.mubr.bf16.mxu1 %v6931_v32  ;;  %v7905_v53 = vpop.f32.mrf.mxu0  ;;  %v7919_v32 = vadd.f32 %v7900_v51, %v820_v15 }
 0x1e6   : > { %v7913_v56 = vpop.f32.mrf.mxu0  ;;  %9746 = vst [vmem:[#allocation26_spill] sm:$0xff] %v7919_v32 }
 0x1eb   : > { %6419 = vmatmul.mubr.bf16.gmra.mxu1 %v6932_v13 }
 0x1ec   : > { %6422 = vmatprep.mubr.bf16.mxu1 %v6933_v60  ;;  %v7921_v60 = vpop.f32.mrf.mxu0 }
 0x1f3   : > { %6423 = vmatmul.mubr.bf16.gmra.mxu1 %v6934_v62 }
 0x1f4   : > { %6426 = vmatprep.mubr.bf16.mxu1 %v6935_v39 }
 0x1fb   : > { %6427 = vmatmul.mubr.bf16.gmra.mxu1 %v6936_v36  ;;  %v7928_v36 = vadd.f32 %v6357_v41, %v7900_v51 }
 0x1fc   : > { %6430 = vmatprep.mubr.bf16.mxu1 %v6937_v45 }
 0x1fd   : > { %9748 = vst [vmem:[#allocation28_spill] sm:$0xff] %v7928_v36 }
 0x203   : > { %6431 = vmatmul.mubr.bf16.gmra.mxu1 %v6938_v48 }
 0x204   : > { %6434 = vmatprep.mubr.bf16.mxu1 %v6939_v54  ;;  %v7931_v54 = vpop.f32.mrf.mxu0 }
 0x206   : > { %v7938_v15 = vpop.f32.mrf.mxu0 }
 0x20b   : > { %6435 = vmatmul.mubr.bf16.gmra.mxu1 %v6940_v63 }
 0x20c   : > { %6438 = vmatprep.mubr.bf16.mxu1 %v6941_v1 }
 0x213   : > { %6439 = vmatmul.mubr.bf16.gmra.mxu1 %v6942_v2 }
 0x214   : > { %1767 = vmatprep.mubr.bf16.mxu1 %v6945_v16 }
 0x29b   : > { %v6412_v21 = vpop.f32.mrf.mxu1 }
 0x29c   : > { %v1489_v24 = vadd.f32 %v6412_v21, %v7903_v47  ;;  %v7946_v21 = vpop.f32.mrf.mxu0 }
 0x29d   : > { %v7907_v46 = vpop.f32.mrf.mxu1 }
 0x29e   : > { %v1609_v50 = vmax.f32 %v1489_v24, 0.0 }
 0x29f   : > { %v6413_v22 = vpop.f32.mrf.mxu1 }
 0x2a0   : > { %v1492_v9 = vadd.f32 %v6413_v22, %v7910_v49 }
 0x2a1   : > { %v7916_v44 = vpop.f32.mrf.mxu1 }
 0x2a2   : > { %v1610_v57 = vmax.f32 %v1492_v9, 0.0  ;;  %v6384_v9 = vpop.f32.mrf.mxu0 }
 0x2a3   : > { %v6416_v13 = vpop.f32.mrf.mxu1 }
 0x2a4   : > { %v7923_v62 = vpack.c.bf16 %v1610_v57, %v1609_v50  ;;  %v1505_v45 = vadd.f32 %v6416_v13, %v7919_v32  ;;  %v6967_v57 = vld [vmem:[%s9621_s6 + $0x18] sm:$0xff]   ;;  %v6968_v13 = vld [vmem:[%s9621_s6 + $0x10] sm:$0xff]  }
 0x2a5   : > { %v7925_v39 = vpop.f32.mrf.mxu1  ;;  %6442 = vmatprep.subr.bf16.mxu0 %v6967_v57 }
 0x2a6   : > { %9747 = vst [vmem:[#allocation27_spill] sm:$0xff] %v7923_v62  ;;  %v1613_v2 = vmax.f32 %v1505_v45, 0.0  ;;  %6443 = vmatpush3.bf16.msra.mxu0 %v6967_v57 }
 0x2a7   : > { %v6417_v48 = vpop.f32.mrf.mxu1  ;;  %6444 = vmatprep.subr.bf16.mxu0 %v6968_v13 }
 0x2a8   : > { %v1508_v63 = vadd.f32 %v6417_v48, %v7928_v36  ;;  %v910_v48 = vpop.f32.mrf.mxu0 }
 0x2a9   : > { %v7934_v1 = vpop.f32.mrf.mxu1 }
 0x2aa   : > { %v1614_v6 = vmax.f32 %v1508_v63, 0.0  ;;  %6445 = vmatpush3.bf16.msra.mxu0 %v6968_v13 }
 0x2ab   : > { %v7936_v7 = vpop.f32.mrf.mxu1 }
 0x2ac   : > { %v7940_v16 = vpack.c.bf16 %v1614_v6, %v1613_v2  ;;  %v6387_v6 = vpop.f32.mrf.mxu0 }
 0x2ad   : > { %v7942_v31 = vpop.f32.mrf.mxu1  ;;  %v7997_v27 = vadd.f32 %v6387_v6, %v7900_v51 }
 0x2ae   : > { %v920_v49 = vpop.f32.mrf.mxu0 }
 0x2af   : > { %v7944_v41 = vpop.f32.mrf.mxu1 }
 0x2b0   : > { %v6390_v28 = vpop.f32.mrf.mxu0 }
 0x2b1   : > { %v7948_v24 = vpop.f32.mrf.mxu1 }
 0x2b2   : > { %v930_v57 = vpop.f32.mrf.mxu0 }
 0x2b3   : > { %v6424_v22 = vpop.f32.mrf.mxu1  ;;  %v7985_v19 = vadd.f32 %v7900_v51, %v930_v57  ;;  %v8003_v57 = vadd.f32 %v6390_v28, %v7900_v51 }
 0x2b4   : > { %v6393_v34 = vpop.f32.mrf.mxu0  ;;  %v1537_v40 = vadd.f32 %v6424_v22, %v7981_v5  ;;  %v8013_v22 = vadd.f32 %v7900_v51, %v7886_v30  ;;  %v8024_v30 = vadd.f32 %v6384_v9, %v7900_v51  ;;  %v8035_v9 = vadd.f32 %v7868_v52, %v7900_v51 }
 0x2b5   : > { %v1528_v50 = vpop.f32.mrf.mxu1  ;;  %9752 = vst [vmem:[#allocation32_spill] sm:$0xff] %v7985_v19  ;;  %v7988_v55 = vadd.f32 %v6393_v34, %v7900_v51  ;;  %v8050_v52 = vadd.f32 %v7900_v51, %v7870_v11 }
 0x2b6   : > { %v940_v13 = vpop.f32.mrf.mxu0  ;;  %v1621_v12 = vmax.f32 %v1537_v40, 0.0  ;;  %9757 = vst [vmem:[#allocation37_spill] sm:$0xff] %v8035_v9 }
 0x2b7   : > { %v6425_v45 = vpop.f32.mrf.mxu1  ;;  %v7973_v4 = vadd.f32 %v7900_v51, %v940_v13  ;;  %9753 = vst [vmem:[#allocation33_spill] sm:$0xff] %v7988_v55  ;;  %9760 = vst [vmem:[#allocation40_spill] sm:$0xff] %v8050_v52 }
 0x2b8   : > { %v1540_v37 = vadd.f32 %v6425_v45, %v7977_v14  ;;  %v8000_v45 = vadd.f32 %v7900_v51, %v920_v49 }
 0x2b9   : > { %v1531_v63 = vpop.f32.mrf.mxu1  ;;  %9749 = vst [vmem:[#allocation29_spill] sm:$0xff] %v7973_v4 }
 0x2ba   : > { %v1622_v6 = vmax.f32 %v1540_v37, 0.0  ;;  %v1532_v5 = vadd.f32 %v1531_v63, %v7993_v0 }
 0x2bb   : > { %v7956_v2 = vpop.f32.mrf.mxu1 }
 0x2bd   : > { %v7958_v36 = vpop.f32.mrf.mxu1 }
 0x2bf   : > { %v7960_v32 = vpop.f32.mrf.mxu1 }
 0x2c1   : > { %v7962_v47 = vpop.f32.mrf.mxu1 }
 0x2c3   : > { %v7964_v20 = vpop.f32.mrf.mxu1 }
 0x2c5   : > { %v7966_v25 = vpop.f32.mrf.mxu1 }
 0x2c7   : > { %v7968_v35 = vpop.f32.mrf.mxu1 }
 0x2c9   : > { %v7970_v33 = vpop.f32.mrf.mxu1 }
 0x2cb   : > { %v6436_v59 = vpop.f32.mrf.mxu1 }
 0x2cc   : > { %v1585_v37 = vadd.f32 %v6436_v59, %v8000_v45 }
 0x2cd   : > { %v1576_v61 = vpop.f32.mrf.mxu1 }
 0x2cf   : > { %v6437_v58 = vpop.f32.mrf.mxu1 }
 0x2d1   : > { %v1579_v17 = vpop.f32.mrf.mxu1 }
 0x2d2   : > { %v1580_v40 = vadd.f32 %v1579_v17, %v8024_v30  ;;  %v1633_v17 = vmax.f32 %v1585_v37, 0.0 }
 0x2d3   : > { %v6440_v23 = vpop.f32.mrf.mxu1 }
 0x2d4   : > { %v1601_v13 = vadd.f32 %v6440_v23, %v7973_v4  ;;  %v1588_v4 = vadd.f32 %v6437_v58, %v7997_v27  ;;  %v1524_v58 = vadd.f32 %v7944_v41, %v8009_v29 }
 0x2d5   : > { %v1592_v42 = vpop.f32.mrf.mxu1 }
 0x2d6   : > { %v1593_v34 = vadd.f32 %v1592_v42, %v7985_v19  ;;  %v1637_v28 = vmax.f32 %v1601_v13, 0.0  ;;  %v1646_v13 = vpack.c.bf16 %v1622_v6, %v1621_v12  ;;  %v1618_v41 = vmax.f32 %v1524_v58, 0.0 }
 0x2d7   : > { %v6441_v62 = vpop.f32.mrf.mxu1 }
 0x2d8   : > { %v1604_v23 = vadd.f32 %v6441_v62, %v7988_v55  ;;  %v8020_v62 = vadd.f32 %v7900_v51, %v7882_v18  ;;  %v1529_v55 = vadd.f32 %v1528_v50, %v8013_v22  ;;  %v1635_v63 = vmax.f32 %v1593_v34, 0.0 }
 0x2d9   : > { %v1595_v49 = vpop.f32.mrf.mxu1  ;;  %v1634_v18 = vmax.f32 %v1588_v4, 0.0  ;;  %v8045_v4 = vadd.f32 %v7900_v51, %v7946_v21  ;;  %v1513_v34 = vadd.f32 %v7942_v31, %v8050_v52 }
 0x2da   : > { %v1638_v14 = vmax.f32 %v1604_v23, 0.0  ;;  %v1596_v42 = vadd.f32 %v1595_v49, %v8003_v57  ;;  %9755 = vst [vmem:[#allocation35_spill] sm:$0xff] %v8020_v62  ;;  %v1620_v23 = vmax.f32 %v1532_v5, 0.0  ;;  %v8030_v49 = vadd.f32 %v7900_v51, %v910_v48 }
 0x2db   : > { %v1521_v59 = vadd.f32 %v7936_v7, %v8020_v62  ;;  %v8041_v5 = vadd.f32 %v7938_v15, %v7900_v51  ;;  %9759 = vst [vmem:[#allocation39_spill] sm:$0xff] %v8045_v4  ;;  %v1652_v48 = vpack.c.bf16 %v1634_v18, %v1633_v17  ;;  %v1569_v11 = vadd.f32 %v7964_v20, %v8045_v4 }
 0x2dc   : > { %v1654_v0 = vpack.c.bf16 %v1638_v14, %v1637_v28  ;;  %v1636_v19 = vmax.f32 %v1596_v42, 0.0  ;;  %9756 = vst [vmem:[#allocation36_spill] sm:$0xff] %v8030_v49  ;;  %v1619_v14 = vmax.f32 %v1529_v55, 0.0  ;;  %v1516_v55 = vadd.f32 %v7948_v24, %v8035_v9 }
 0x2dd   : > { %9758 = vst [vmem:[#allocation38_spill] sm:$0xff] %v8041_v5  ;;  %v1572_v15 = vadd.f32 %v7968_v35, %v8041_v5  ;;  %v1617_v21 = vmax.f32 %v1521_v59, 0.0  ;;  %v8066_v35 = vadd.f32 %v7900_v51, %v7931_v54  ;;  %v1615_v37 = vmax.f32 %v1513_v34, 0.0  ;;  %v6952_v34 = vld [vmem:[%s7879_s14 + $0x34] ss:$8 sps:$4 sm:$0xff]  }
 0x2de   : > { %5904 = vmatprep.subr.bf16.mxu1 %v1654_v0  ;;  %v1653_v50 = vpack.c.bf16 %v1636_v19, %v1635_v63  ;;  %v1577_v19 = vadd.f32 %v1576_v61, %v8030_v49  ;;  %v1645_v7 = vpack.c.bf16 %v1620_v23, %v1619_v14  ;;  %v1632_v0 = vmax.f32 %v1580_v40, 0.0 }
 0x2df   : > { %5905 = vmatpush3.bf16.msra.mxu1 %v1646_v13  ;;  %v8060_v61 = vadd.f32 %v7921_v60, %v7900_v51  ;;  %v1644_v24 = vpack.c.bf16 %v1618_v41, %v1617_v21  ;;  %v1616_v28 = vmax.f32 %v1516_v55, 0.0  ;;  %9762 = vst [vmem:[#allocation42_spill] sm:$0xff] %v8066_v35  ;;  %v1630_v42 = vmax.f32 %v1572_v15, 0.0  ;;  %v6943_v15 = vld [vmem:[%s7879_s14] ss:$8 sps:$4 sm:$0xff]  }
 0x2e0   : > { %5906 = vmatprep.subr.bf16.mxu1 %v1653_v50  ;;  %v1631_v6 = vmax.f32 %v1577_v19, 0.0  ;;  %v8072_v60 = vadd.f32 %v7864_v8, %v7900_v51  ;;  %v8076_v20 = vadd.f32 %v7905_v53, %v7900_v51  ;;  %v8080_v63 = vadd.f32 %v7900_v51, %v7913_v56  ;;  %v6951_v21 = vld [vmem:[%s7879_s14 + $0x20] ss:$8 sps:$4 sm:$0xff]  }
 0x2e1   : > { %9761 = vst [vmem:[#allocation41_spill] sm:$0xff] %v8060_v61  ;;  %v1564_v31 = vadd.f32 %v7970_v33, %v8060_v61  ;;  %v1629_v54 = vmax.f32 %v1569_v11, 0.0  ;;  %v1561_v58 = vadd.f32 %v7966_v25, %v8066_v35  ;;  %v8086_v33 = vadd.f32 %v7900_v51, %v7866_v10  ;;  %v6954_v11 = vld [vmem:[%s7879_s14 + $0x30] ss:$8 sps:$4 sm:$0xff]  }
 0x2e2   : > { %v1651_v12 = vpack.c.bf16 %v1632_v0, %v1631_v6  ;;  %9763 = vst [vmem:[#allocation43_spill] sm:$0xff] %v8072_v60  ;;  %9764 = vst [vmem:[#allocation44_spill] sm:$0xff] %v8076_v20  ;;  %v1500_v8 = vadd.f32 %v7934_v1, %v8072_v60  ;;  %v1643_v13 = vpack.c.bf16 %v1616_v28, %v1615_v37  ;;  %v6949_v0 = vld [vmem:[%s7879_s14 + $0x24] ss:$8 sps:$4 sm:$0xff]   ;;  %v6958_v28 = vld [vmem:[%s7879_s14 + $0x54] ss:$8 sps:$4 sm:$0xff]  }
 0x2e3   : > { %5907 = vmatpush3.bf16.msra.mxu1 %v1645_v7  ;;  %9765 = vst [vmem:[#allocation45_spill] sm:$0xff] %v8080_v63  ;;  %9766 = vst [vmem:[#allocation46_spill] sm:$0xff] %v8086_v33  ;;  %v1556_v53 = vadd.f32 %v7960_v32, %v8076_v20  ;;  %v1650_v23 = vpack.c.bf16 %v1630_v42, %v1629_v54  ;;  %v1628_v18 = vmax.f32 %v1564_v31, 0.0  ;;  %v1627_v40 = vmax.f32 %v1561_v58, 0.0  ;;  %v9771_v7 = vld [vmem:[#allocation27_spill] sm:$0xff]  ;;  %v6969_v58 = vld [vmem:[%s9621_s6 + $0x8] sm:$0xff]  }
 0x2e4   : > { %5908 = vmatprep.subr.bf16.mxu1 %v1652_v48  ;;  %v1497_v56 = vadd.f32 %v7925_v39, %v8086_v33  ;;  %v8096_v25 = vadd.f32 %v7892_v43, %v7900_v51  ;;  %v1553_v10 = vadd.f32 %v7956_v2, %v8080_v63  ;;  %v1612_v1 = vmax.f32 %v1500_v8, 0.0  ;;  %v6946_v48 = vld [vmem:[%s7879_s14 + $0x14] ss:$8 sps:$4 sm:$0xff]   ;;  %v6955_v6 = vld [vmem:[%s7879_s14 + $0x44] ss:$8 sps:$4 sm:$0xff]   ;;  %6446 = vmatprep.subr.bf16.mxu0 %v6969_v58 }
 0x2e5   : > { %v8102_v50 = vadd.f32 %v7900_v51, %v7894_v38  ;;  %v1626_v32 = vmax.f32 %v1556_v53, 0.0  ;;  %v1649_v39 = vpack.c.bf16 %v1628_v18, %v1627_v40  ;;  %v8108_v14 = vadd.f32 %v7860_v3, %v7900_v51  ;;  %v6960_v42 = vld [vmem:[%s7879_s14 + $0x50] ss:$8 sps:$4 sm:$0xff]   ;;  %v6961_v31 = vld [vmem:[%s7879_s14 + $0x64] ss:$8 sps:$4 sm:$0xff]   ;;  %6447 = vmatpush3.bf16.msra.mxu0 %v6969_v58 }
 0x2e6   : > { %9767 = vst [vmem:[#allocation47_spill] sm:$0xff] %v8096_v25  ;;  %v1548_v59 = vadd.f32 %v7962_v47, %v8096_v25  ;;  %v1611_v43 = vmax.f32 %v1497_v56, 0.0  ;;  %v1625_v2 = vmax.f32 %v1553_v10, 0.0  ;;  %v8115_v38 = vadd.f32 %v7900_v51, %v7862_v26  ;;  %v6964_v37 = vld [vmem:[%s7879_s14 + $0x74] ss:$8 sps:$4 sm:$0xff]   ;;  %v6970_v8 = vld [vmem:[%s9621_s6] sm:$0xff]  }
 0x2e7   : > { %5909 = vmatpush3.bf16.msra.mxu1 %v1644_v24  ;;  %9768 = vst [vmem:[#allocation48_spill] sm:$0xff] %v8102_v50  ;;  %9769 = vst [vmem:[#allocation49_spill] sm:$0xff] %v8108_v14  ;;  %v1545_v17 = vadd.f32 %v7958_v36, %v8102_v50  ;;  %v1484_v47 = vadd.f32 %v7916_v44, %v8108_v14  ;;  %v6957_v24 = vld [vmem:[%s7879_s14 + $0x40] ss:$8 sps:$4 sm:$0xff]   ;;  %v6966_v54 = vld [vmem:[%s7879_s14 + $0x70] ss:$8 sps:$4 sm:$0xff]   ;;  %6448 = vmatprep.subr.bf16.mxu0 %v6970_v8 }
 0x2e8   : > { %5910 = vmatprep.subr.bf16.mxu1 %v1651_v12  ;;  %9770 = vst [vmem:[#allocation50_spill] sm:$0xff] %v8115_v38  ;;  %v1641_v19 = vpack.c.bf16 %v1612_v1, %v1611_v43  ;;  %v1648_v3 = vpack.c.bf16 %v1626_v32, %v1625_v2  ;;  %v1624_v41 = vmax.f32 %v1548_v59, 0.0  ;;  %v6963_v12 = vld [vmem:[%s7879_s14 + $0x60] ss:$8 sps:$4 sm:$0xff]  }
 0x2e9   : > { %v1623_v36 = vmax.f32 %v1545_v17, 0.0  ;;  %v1608_v55 = vmax.f32 %v1484_v47, 0.0  ;;  %6449 = vmatpush3.bf16.msra.mxu0 %v6970_v8  ;;  %v9772_v32 = vld [vmem:[#allocation22_spill] sm:$0xff]  ;;  %v9778_v8 = vld [vmem:[#allocation16_spill] sm:$0xff] }
 0x2eb   : > { %5911 = vmatpush3.bf16.msra.mxu1 %v1643_v13  ;;  %v1647_v26 = vpack.c.bf16 %v1624_v41, %v1623_v36  ;;  %v6971_v13 = vld [vmem:[%s9621_s6 + $0x38] sm:$0xff]  }
 0x2ec   : > { %5912 = vmatprep.subr.bf16.mxu1 %v1650_v23  ;;  %6466 = vmatprep.subr.bf16.mxu0 %v6971_v13  ;;  %v9774_v36 = vld [vmem:[#allocation20_spill] sm:$0xff] }
 0x2ef   : > { %5913 = vmatpush3.bf16.msra.mxu1 %v7940_v16  ;;  %v1481_v16 = vadd.f32 %v7907_v46, %v8115_v38  ;;  %v6948_v46 = vld [vmem:[%s7879_s14 + $0x10] ss:$8 sps:$4 sm:$0xff]  }
 0x2f0   : > { %5914 = vmatprep.subr.bf16.mxu1 %v1649_v39  ;;  %v9773_v39 = vld [vmem:[#allocation23_spill] sm:$0xff] }
 0x2f1   : > { %v1607_v51 = vmax.f32 %v1481_v16, 0.0 }
 0x2f3   : > { %5915 = vmatpush3.bf16.msra.mxu1 %v1641_v19  ;;  %v1639_v44 = vpack.c.bf16 %v1608_v55, %v1607_v51 }
 0x2f4   : > { %5916 = vmatprep.subr.bf16.mxu1 %v1648_v3 }
 0x2f7   : > { %5917 = vmatpush3.bf16.msra.mxu1 %v9771_v7 }
 0x2f8   : > { %5918 = vmatprep.subr.bf16.mxu1 %v1647_v26  ;;  %v9775_v26 = vld [vmem:[#allocation21_spill] sm:$0xff] }
 0x2fb   : > { %5919 = vmatpush3.bf16.msra.mxu1 %v1639_v44 }
 0x2fe   : > { %1768 = vmatmul.mubr.bf16.vlgmr.msra.gmra.mxu1 %v6943_v15 }
 0x2ff   : > { %1775 = vmatprep.mubr.bf16.mxu1 %v6946_v48 }
 0x306   : > { %1776 = vmatmul.mubr.bf16.gmra.mxu1 %v6948_v46 }
 0x307   : > { %1783 = vmatprep.mubr.bf16.mxu1 %v6949_v0 }
 0x30e   : > { %1784 = vmatmul.mubr.bf16.gmra.mxu1 %v6951_v21 }
 0x30f   : > { %1791 = vmatprep.mubr.bf16.mxu1 %v6952_v34  ;;  %v9776_v34 = vld [vmem:[#allocation18_spill] sm:$0xff] }
 0x316   : > { %1792 = vmatmul.mubr.bf16.gmra.mxu1 %v6954_v11 }
 0x317   : > { %1799 = vmatprep.mubr.bf16.mxu1 %v6955_v6  ;;  %v9777_v6 = vld [vmem:[#allocation19_spill] sm:$0xff] }
 0x31e   : > { %1800 = vmatmul.mubr.bf16.gmra.mxu1 %v6957_v24 }
 0x31f   : > { %1807 = vmatprep.mubr.bf16.mxu1 %v6958_v28 }
 0x326   : > { %1808 = vmatmul.mubr.bf16.gmra.mxu1 %v6960_v42 }
 0x327   : > { %1815 = vmatprep.mubr.bf16.mxu1 %v6961_v31 }
 0x32e   : > { %1816 = vmatmul.mubr.bf16.gmra.mxu1 %v6963_v12 }
 0x32f   : > { %1823 = vmatprep.mubr.bf16.mxu1 %v6964_v37 }
 0x336   : > { %1824 = vmatmul.mubr.bf16.gmra.mxu1 %v6966_v54 }
 0x3be   : > { %v5920_v53 = vpop.f32.mrf.mxu1 }
 0x3c0   : > { %v5921_v23 = vpop.f32.mrf.mxu1 }
 0x3c1   : > { %v5922_v56 = vadd.f32 %v5921_v23, %v5920_v53  ;;  %v9779_v23 = vld [vmem:[#allocation17_spill] sm:$0xff] }
 0x3c2   : > { %v5923_v18 = vpop.f32.mrf.mxu1 }
 0x3c3   : > { %v1832_v59 = vadd.f32 %v5922_v56, %v9772_v32 }
 0x3c4   : > { %v5924_v10 = vpop.f32.mrf.mxu1 }
 0x3c5   : > { %v5925_v40 = vadd.f32 %v5924_v10, %v5923_v18 }
 0x3c6   : > { %v5926_v1 = vpop.f32.mrf.mxu1 }
 0x3c7   : > { %v1833_v43 = vadd.f32 %v5925_v40, %v9773_v39  ;;  %v9780_v39 = vld [vmem:[#allocation14_spill] sm:$0xff] }
 0x3c8   : > { %v5927_v2 = vpop.f32.mrf.mxu1 }
 0x3c9   : > { %v1848_v17 = vpack.c.bf16 %v1833_v43, %v1832_v59  ;;  %v5928_v19 = vadd.f32 %v5927_v2, %v5926_v1  ;;  %v9781_v2 = vld [vmem:[#allocation15_spill] sm:$0xff] }
 0x3ca   : > { %v5929_v47 = vpop.f32.mrf.mxu1 }
 0x3cb   : > { %6450 = vmatprep.mubr.msk.bf16.mxu0 %vm1059_vm1, %v1848_v17  ;;  %v1834_v55 = vadd.f32 %v5928_v19, %v9774_v36 }
 0x3cc   : > { %v5930_v3 = vpop.f32.mrf.mxu1 }
 0x3cd   : > { %v5931_v41 = vadd.f32 %v5930_v3, %v5929_v47 }
 0x3ce   : > { %v5932_v16 = vpop.f32.mrf.mxu1 }
 0x3cf   : > { %v1835_v51 = vadd.f32 %v5931_v41, %v9775_v26  ;;  %v9782_v26 = vld [vmem:[#allocation12_spill] sm:$0xff] }
 0x3d0   : > { %v5933_v7 = vpop.f32.mrf.mxu1 }
 0x3d1   : > { %v1849_v44 = vpack.c.bf16 %v1835_v51, %v1834_v55  ;;  %v5934_v48 = vadd.f32 %v5933_v7, %v5932_v16  ;;  %v9783_v7 = vld [vmem:[#allocation13_spill] sm:$0xff] }
 0x3d2   : > { %v5935_v15 = vpop.f32.mrf.mxu1 }
 0x3d3   : > { %6451 = vmatmul.mubr.msk.bf16.vlgmr.msra.gmra.mxu0 %vm1059_vm1, %v1849_v44  ;;  %v1836_v11 = vadd.f32 %v5934_v48, %v9776_v34 }
 0x3d4   : > { %v5936_v46 = vpop.f32.mrf.mxu1  ;;  %6467 = vmatpush3.bf16.msra.mxu0 %v6971_v13 }
 0x3d5   : > { %v5937_v0 = vadd.f32 %v5936_v46, %v5935_v15 }
 0x3d6   : > { %v5938_v21 = vpop.f32.mrf.mxu1 }
 0x3d7   : > { %v1837_v24 = vadd.f32 %v5937_v0, %v9777_v6  ;;  %v9784_v6 = vld [vmem:[#allocation10_spill] sm:$0xff] }
 0x3d8   : > { %v5939_v28 = vpop.f32.mrf.mxu1 }
 0x3d9   : > { %v1850_v42 = vpack.c.bf16 %v1837_v24, %v1836_v11  ;;  %v5940_v12 = vadd.f32 %v5939_v28, %v5938_v21  ;;  %v9785_v28 = vld [vmem:[#allocation11_spill] sm:$0xff] }
 0x3da   : > { %v5941_v31 = vpop.f32.mrf.mxu1 }
 0x3db   : > { %6454 = vmatprep.mubr.msk.bf16.mxu0 %vm1059_vm1, %v1850_v42  ;;  %v1838_v53 = vadd.f32 %v5940_v12, %v9778_v8 }
 0x3dc   : > { %v5942_v37 = vpop.f32.mrf.mxu1 }
 0x3dd   : > { %v5943_v54 = vadd.f32 %v5942_v37, %v5941_v31 }
 0x3de   : > { %v5944_v58 = vpop.f32.mrf.mxu1 }
 0x3df   : > { %v1839_v18 = vadd.f32 %v5943_v54, %v9779_v23 }
 0x3e0   : > { %v5945_v13 = vpop.f32.mrf.mxu1 }
 0x3e1   : > { %v1851_v56 = vpack.c.bf16 %v1839_v18, %v1838_v53  ;;  %v5946_v40 = vadd.f32 %v5945_v13, %v5944_v58  ;;  %v9786_v53 = vld [vmem:[#allocation8_spill] sm:$0xff]  ;;  %v9787_v18 = vld [vmem:[#allocation9_spill] sm:$0xff] }
 0x3e2   : > { %v5947_v10 = vpop.f32.mrf.mxu1 }
 0x3e3   : > { %6455 = vmatmul.mubr.msk.bf16.gmra.mxu0 %vm1059_vm1, %v1851_v56  ;;  %v1840_v43 = vadd.f32 %v5946_v40, %v9780_v39  ;;  %v6973_v40 = vld [vmem:[%s9621_s6 + $0x28] sm:$0xff]  }
 0x3e4   : > { %v5948_v1 = vpop.f32.mrf.mxu1 }
 0x3e5   : > { %v5949_v32 = vadd.f32 %v5948_v1, %v5947_v10  ;;  %v6972_v10 = vld [vmem:[%s9621_s6 + $0x30] sm:$0xff]   ;;  %v6974_v1 = vld [vmem:[%s9621_s6 + $0x20] sm:$0xff]  }
 0x3e6   : > { %v5950_v59 = vpop.f32.mrf.mxu1  ;;  %6468 = vmatprep.subr.bf16.mxu0 %v6972_v10 }
 0x3e7   : > { %v1841_v17 = vadd.f32 %v5949_v32, %v9781_v2  ;;  %6469 = vmatpush3.bf16.msra.mxu0 %v6972_v10  ;;  %v6975_v32 = vld [vmem:[%s9622_s7 + $0x18] sm:$0xff]   ;;  %v8188_v2 = vld [vmem:[%s9624_s9] sm:$0x7f] }
 0x3e8   : > { %v5951_v47 = vpop.f32.mrf.mxu1  ;;  %6470 = vmatprep.subr.bf16.mxu0 %v6973_v40  ;;  %6490 = vmatprep.subr.bf16.mxu1 %v6975_v32 }
 0x3e9   : > { %v1852_v19 = vpack.c.bf16 %v1841_v17, %v1840_v43  ;;  %v5952_v41 = vadd.f32 %v5951_v47, %v5950_v59  ;;  %6491 = vmatpush3.bf16.msra.mxu1 %v6975_v32  ;;  %v9788_v59 = vld [vmem:[#allocation5_spill] sm:$0xff] }
 0x3ea   : > { %v5953_v3 = vpop.f32.mrf.mxu1  ;;  %v8183_v39 = vsub.s32 2, %v9788_v59 }
 0x3eb   : > { %6458 = vmatprep.mubr.msk.bf16.mxu0 %vm1059_vm1, %v1852_v19  ;;  %v1842_v51 = vadd.f32 %v5952_v41, %v9782_v26  ;;  %6471 = vmatpush3.bf16.msra.mxu0 %v6973_v40 }
 0x3ec   : > { %v5954_v16 = vpop.f32.mrf.mxu1  ;;  %6472 = vmatprep.subr.bf16.mxu0 %v6974_v1  ;;  %9789 = vst [vmem:[#allocation27_spill] sm:$0xff] %v8183_v39  ;;  %v1867_v17 = vrot.slane %v8188_v2, %v8183_v39 }
 0x3ed   : > { %v5955_v36 = vadd.f32 %v5954_v16, %v5953_v3 }
 0x3ee   : > { %v5956_v55 = vpop.f32.mrf.mxu1 }
 0x3ef   : > { %v1843_v44 = vadd.f32 %v5955_v36, %v9783_v7  ;;  %6473 = vmatpush3.bf16.msra.mxu0 %v6974_v1 }
 0x3f0   : > { %v5957_v15 = vpop.f32.mrf.mxu1 }
 0x3f1   : > { %v1853_v48 = vpack.c.bf16 %v1843_v44, %v1842_v51  ;;  %v5958_v0 = vadd.f32 %v5957_v15, %v5956_v55 }
 0x3f2   : > { %v5959_v46 = vpop.f32.mrf.mxu1 }
 0x3f3   : > { %6459 = vmatmul.mubr.msk.bf16.gmra.mxu0 %vm1059_vm1, %v1853_v48  ;;  %v1844_v24 = vadd.f32 %v5958_v0, %v9784_v6 }
 0x3f4   : > { %v5960_v21 = vpop.f32.mrf.mxu1 }
 0x3f5   : > { %v5961_v34 = vadd.f32 %v5960_v21, %v5959_v46 }
 0x3f6   : > { %v5962_v11 = vpop.f32.mrf.mxu1 }
 0x3f7   : > { %v1845_v42 = vadd.f32 %v5961_v34, %v9785_v28 }
 0x3f8   : > { %v5963_v31 = vpop.f32.mrf.mxu1 }
 0x3f9   : > { %v1854_v12 = vpack.c.bf16 %v1845_v42, %v1844_v24  ;;  %v5964_v54 = vadd.f32 %v5963_v31, %v5962_v11 }
 0x3fa   : > { %v5965_v37 = vpop.f32.mrf.mxu1 }
 0x3fb   : > { %6462 = vmatprep.mubr.msk.bf16.mxu0 %vm1059_vm1, %v1854_v12  ;;  %v1846_v23 = vadd.f32 %v5964_v54, %v9786_v53 }
 0x3fc   : > { %v5966_v58 = vpop.f32.mrf.mxu1 }
 0x3fd   : > { %v5967_v8 = vadd.f32 %v5966_v58, %v5965_v37 }
 0x3ff   : > { %v1847_v13 = vadd.f32 %v5967_v8, %v9787_v18 }
 0x401   : > { %v1855_v56 = vpack.c.bf16 %v1847_v13, %v1846_v23 }
 0x403   : > { %6463 = vmatmul.mubr.msk.bf16.gmra.mxu0 %vm1059_vm1, %v1855_v56 }
 0x493   : > { %v6452_v43 = vpop.f32.mrf.mxu0 }
 0x494   : > { %v1959_v16 = vadd.f32 %v6452_v43, %v1867_v17 }
 0x495   : > { %v1950_v47 = vpop.f32.mrf.mxu0 }
 0x496   : > { %v1951_v3 = vadd.f32 %v1950_v47, %v1867_v17  ;;  %v2015_v44 = vmax.f32 %v1959_v16, 0.0 }
 0x497   : > { %v6453_v19 = vpop.f32.mrf.mxu0 }
 0x498   : > { %v1962_v41 = vadd.f32 %v6453_v19, %v1867_v17  ;;  %v2013_v51 = vmax.f32 %v1951_v3, 0.0 }
 0x499   : > { %v1953_v36 = vpop.f32.mrf.mxu0 }
 0x49a   : > { %v1954_v55 = vadd.f32 %v1953_v36, %v1867_v17  ;;  %v2016_v26 = vmax.f32 %v1962_v41, 0.0 }
 0x49c   : > { %v2014_v7 = vmax.f32 %v1954_v55, 0.0  ;;  %v2030_v48 = vpack.c.bf16 %v2016_v26, %v2015_v44 }
 0x49e   : > { %v2029_v15 = vpack.c.bf16 %v2014_v7, %v2013_v51 }
 0x4a0   : > { %6474 = vmatprep.mubr.msk.bf16.mxu0 %vm1059_vm1, %v2029_v15 }
 0x4a1   : > { %6475 = vmatmul.mubr.msk.bf16.vlgmr.msra.gmra.mxu0 %vm1059_vm1, %v2030_v48 }
 0x4a3   : > { %v6456_v46 = vpop.f32.mrf.mxu0 }
 0x4a4   : > { %v1975_v6 = vadd.f32 %v6456_v46, %v1867_v17 }
 0x4a5   : > { %v1966_v0 = vpop.f32.mrf.mxu0 }
 0x4a6   : > { %v1967_v34 = vadd.f32 %v1966_v0, %v1867_v17  ;;  %v2019_v37 = vmax.f32 %v1975_v6, 0.0  ;;  %v6978_v6 = vld [vmem:[%s9622_s7] sm:$0xff]  }
 0x4a7   : > { %v6457_v21 = vpop.f32.mrf.mxu0 }
 0x4a8   : > { %v1978_v11 = vadd.f32 %v6457_v21, %v1867_v17  ;;  %v2017_v31 = vmax.f32 %v1967_v34, 0.0 }
 0x4a9   : > { %v1969_v24 = vpop.f32.mrf.mxu0 }
 0x4aa   : > { %v1970_v28 = vadd.f32 %v1969_v24, %v1867_v17  ;;  %v2020_v42 = vmax.f32 %v1978_v11, 0.0  ;;  %v6976_v11 = vld [vmem:[%s9622_s7 + $0x10] sm:$0xff]   ;;  %v1055_v24 = vrot.slane %v8188_v2, 1 }
 0x4ab   : > { %6492 = vmatprep.subr.bf16.mxu1 %v6976_v11 }
 0x4ac   : > { %v2018_v12 = vmax.f32 %v1970_v28, 0.0  ;;  %v2032_v58 = vpack.c.bf16 %v2020_v42, %v2019_v37  ;;  %6493 = vmatpush3.bf16.msra.mxu1 %v6976_v11  ;;  %v6979_v28 = vld [vmem:[%s9623_s8 + $0x38] sm:$0xff]   ;;  %v6980_v42 = vld [vmem:[%s9623_s8 + $0x30] sm:$0xff]   ;;  %1056 = vrot.lane.b32.xlu0 %v1055_v24, %s7259_s15 }
 0x4ad   : > { %6514 = vmatprep.subr.bf16.mxu0 %v6979_v28  ;;  %v6983_v37 = vld [vmem:[%s9623_s8 + $0x18] sm:$0xff]  }
 0x4ae   : > { %v2031_v54 = vpack.c.bf16 %v2018_v12, %v2017_v31  ;;  %6515 = vmatpush3.bf16.msra.mxu0 %v6979_v28  ;;  %v6981_v31 = vld [vmem:[%s9623_s8 + $0x28] sm:$0xff]   ;;  %v6982_v12 = vld [vmem:[%s9623_s8 + $0x20] sm:$0xff]  }
 0x4af   : > { %6516 = vmatprep.subr.bf16.mxu0 %v6980_v42 }
 0x4b0   : > { %6478 = vmatprep.mubr.msk.bf16.mxu0 %vm1059_vm1, %v2031_v54  ;;  %v8227_v54 = vsub.s32 3, %v9788_v59 }
 0x4b1   : > { %6479 = vmatmul.mubr.msk.bf16.gmra.mxu0 %vm1059_vm1, %v2032_v58 }
 0x4b2   : > { %6517 = vmatpush3.bf16.msra.mxu0 %v6980_v42  ;;  %9790 = vst [vmem:[#allocation22_spill] sm:$0xff] %v8227_v54 }
 0x4b3   : > { %v6460_v8 = vpop.f32.mrf.mxu0  ;;  %6518 = vmatprep.subr.bf16.mxu0 %v6981_v31 }
 0x4b4   : > { %v1991_v56 = vadd.f32 %v6460_v8, %v1867_v17 }
 0x4b5   : > { %v1982_v53 = vpop.f32.mrf.mxu0 }
 0x4b6   : > { %v1983_v18 = vadd.f32 %v1982_v53, %v1867_v17  ;;  %v2023_v47 = vmax.f32 %v1991_v56, 0.0  ;;  %6519 = vmatpush3.bf16.msra.mxu0 %v6981_v31  ;;  %v2049_v53 = vrot.slane %v8188_v2, %v8227_v54 }
 0x4b7   : > { %v6461_v23 = vpop.f32.mrf.mxu0  ;;  %6520 = vmatprep.subr.bf16.mxu0 %v6982_v12 }
 0x4b8   : > { %v1994_v13 = vadd.f32 %v6461_v23, %v1867_v17  ;;  %v2021_v32 = vmax.f32 %v1983_v18, 0.0 }
 0x4b9   : > { %v1985_v10 = vpop.f32.mrf.mxu0 }
 0x4ba   : > { %v1986_v40 = vadd.f32 %v1985_v10, %v1867_v17  ;;  %v2024_v1 = vmax.f32 %v1994_v13, 0.0  ;;  %6521 = vmatpush3.bf16.msra.mxu0 %v6982_v12 }
 0x4bb   : > { %6522 = vmatprep.subr.bf16.mxu0 %v6983_v37 }
 0x4bc   : > { %v2022_v43 = vmax.f32 %v1986_v40, 0.0  ;;  %v2034_v3 = vpack.c.bf16 %v2024_v1, %v2023_v47 }
 0x4be   : > { %v2033_v19 = vpack.c.bf16 %v2022_v43, %v2021_v32  ;;  %6523 = vmatpush3.bf16.msra.mxu0 %v6983_v37 }
 0x4c0   : > { %6482 = vmatprep.mubr.msk.bf16.mxu0 %vm1059_vm1, %v2033_v19 }
 0x4c1   : > { %6483 = vmatmul.mubr.msk.bf16.gmra.mxu0 %vm1059_vm1, %v2034_v3 }
 0x4c3   : > { %v6464_v41 = vpop.f32.mrf.mxu0 }
 0x4c4   : > { %v2007_v51 = vadd.f32 %v6464_v41, %v1867_v17 }
 0x4c5   : > { %v1998_v16 = vpop.f32.mrf.mxu0 }
 0x4c6   : > { %v1999_v55 = vadd.f32 %v1998_v16, %v1867_v17  ;;  %v2027_v0 = vmax.f32 %v2007_v51, 0.0 }
 0x4c7   : > { %v6465_v36 = vpop.f32.mrf.mxu0 }
 0x4c8   : > { %v2010_v26 = vadd.f32 %v6465_v36, %v1867_v17  ;;  %v2025_v48 = vmax.f32 %v1999_v55, 0.0 }
 0x4c9   : > { %v2001_v7 = vpop.f32.mrf.mxu0 }
 0x4ca   : > { %v2002_v44 = vadd.f32 %v2001_v7, %v1867_v17  ;;  %v2028_v15 = vmax.f32 %v2010_v26, 0.0  ;;  %v6977_v17 = vld [vmem:[%s9622_s7 + $0x8] sm:$0xff]  }
 0x4cb   : > { %6494 = vmatprep.subr.bf16.mxu1 %v6977_v17 }
 0x4cc   : > { %v2026_v46 = vmax.f32 %v2002_v44, 0.0  ;;  %v2036_v34 = vpack.c.bf16 %v2028_v15, %v2027_v0  ;;  %6495 = vmatpush3.bf16.msra.mxu1 %v6977_v17 }
 0x4cd   : > { %6496 = vmatprep.subr.bf16.mxu1 %v6978_v6 }
 0x4ce   : > { %v2035_v21 = vpack.c.bf16 %v2026_v46, %v2025_v48 }
 0x4d0   : > { %6486 = vmatprep.mubr.msk.bf16.mxu0 %vm1059_vm1, %v2035_v21  ;;  %6497 = vmatpush3.bf16.msra.mxu1 %v6978_v6 }
 0x4d1   : > { %6487 = vmatmul.mubr.msk.bf16.gmra.mxu0 %vm1059_vm1, %v2036_v34 }
 0x561   : > { %v6476_v58 = vpop.f32.mrf.mxu0 }
 0x562   : > { %v8237_v40 = vadd.f32 %v6476_v58, %v2049_v53 }
 0x563   : > { %v2132_v8 = vpop.f32.mrf.mxu0 }
 0x564   : > { %v8233_v56 = vadd.f32 %v2132_v8, %v2049_v53 }
 0x565   : > { %v6477_v23 = vpop.f32.mrf.mxu0 }
 0x566   : > { %v8231_v18 = vadd.f32 %v6477_v23, %v2049_v53 }
 0x567   : > { %v2135_v13 = vpop.f32.mrf.mxu0 }
 0x568   : > { %v8235_v10 = vadd.f32 %v2135_v13, %v2049_v53  ;;  %v2196_v32 = vpack.c.bf16 %v8231_v18, %v8237_v40  ;;  %v7130_v13 = vld [vmem:[%s7600_s25] sm:$0xff]  }
 0x56a   : > { %v2195_v1 = vpack.c.bf16 %v8235_v10, %v8233_v56 }
 0x56c   : > { %6498 = vmatprep.mubr.msk.bf16.mxu1 %vm1059_vm1, %v2195_v1  ;;  %v6984_v1 = vld [vmem:[%s9623_s8 + $0x10] sm:$0xff]  }
 0x56d   : > { %6499 = vmatmul.mubr.msk.bf16.vlgmr.msra.gmra.mxu1 %vm1059_vm1, %v2196_v32  ;;  %6524 = vmatprep.subr.bf16.mxu0 %v6984_v1  ;;  %v6986_v32 = vld [vmem:[%s9623_s8] sm:$0xff]  }
 0x56e   : > { %6525 = vmatpush3.bf16.msra.mxu0 %v6984_v1 }
 0x571   : > { %v6480_v43 = vpop.f32.mrf.mxu0 }
 0x572   : > { %v8251_v55 = vadd.f32 %v6480_v43, %v2049_v53  ;;  %v1057_v43 = vpop.permute.xlu0 %1056 }
 0x573   : > { %v2148_v47 = vpop.f32.mrf.mxu0 }
 0x574   : > { %v8247_v16 = vadd.f32 %v2148_v47, %v2049_v53  ;;  %v8298_v47 = vsub.s32 5, %v9788_v59 }
 0x575   : > { %v6481_v19 = vpop.f32.mrf.mxu0 }
 0x576   : > { %v8245_v3 = vadd.f32 %v6481_v19, %v2049_v53  ;;  %9791 = vst [vmem:[#allocation23_spill] sm:$0xff] %v8298_v47  ;;  %v1060_v19 = vsel %vm1059_vm1, %v8188_v2, %v1057_v43 }
 0x577   : > { %v2151_v41 = vpop.f32.mrf.mxu0 }
 0x578   : > { %v8249_v36 = vadd.f32 %v2151_v41, %v2049_v53  ;;  %v2198_v51 = vpack.c.bf16 %v8245_v3, %v8251_v55 }
 0x57a   : > { %v2197_v26 = vpack.c.bf16 %v8249_v36, %v8247_v16 }
 0x57c   : > { %6502 = vmatprep.mubr.msk.bf16.mxu1 %vm1059_vm1, %v2197_v26  ;;  %v2214_v26 = vrot.slane %v1060_v19, %v8298_v47 }
 0x57d   : > { %6503 = vmatmul.mubr.msk.bf16.gmra.mxu1 %vm1059_vm1, %v2198_v51 }
 0x581   : > { %v6484_v7 = vpop.f32.mrf.mxu0 }
 0x582   : > { %v8265_v34 = vadd.f32 %v6484_v7, %v2049_v53 }
 0x583   : > { %v2164_v44 = vpop.f32.mrf.mxu0 }
 0x584   : > { %v8261_v0 = vadd.f32 %v2164_v44, %v2049_v53 }
 0x585   : > { %v6485_v15 = vpop.f32.mrf.mxu0 }
 0x586   : > { %v8259_v48 = vadd.f32 %v6485_v15, %v2049_v53 }
 0x587   : > { %v2167_v46 = vpop.f32.mrf.mxu0 }
 0x588   : > { %v8263_v21 = vadd.f32 %v2167_v46, %v2049_v53  ;;  %v2200_v17 = vpack.c.bf16 %v8259_v48, %v8265_v34 }
 0x58a   : > { %v2199_v11 = vpack.c.bf16 %v8263_v21, %v8261_v0 }
 0x58c   : > { %6506 = vmatprep.mubr.msk.bf16.mxu1 %vm1059_vm1, %v2199_v11 }
 0x58d   : > { %6507 = vmatmul.mubr.msk.bf16.gmra.mxu1 %vm1059_vm1, %v2200_v17 }
 0x591   : > { %v6488_v6 = vpop.f32.mrf.mxu0 }
 0x592   : > { %v8279_v58 = vadd.f32 %v6488_v6, %v2049_v53 }
 0x593   : > { %v2180_v24 = vpop.f32.mrf.mxu0 }
 0x594   : > { %v8275_v12 = vadd.f32 %v2180_v24, %v2049_v53 }
 0x595   : > { %v6489_v28 = vpop.f32.mrf.mxu0 }
 0x596   : > { %v8273_v42 = vadd.f32 %v6489_v28, %v2049_v53 }
 0x597   : > { %v2183_v31 = vpop.f32.mrf.mxu0 }
 0x598   : > { %v8277_v37 = vadd.f32 %v2183_v31, %v2049_v53  ;;  %v2202_v23 = vpack.c.bf16 %v8273_v42, %v8279_v58  ;;  %v6985_v53 = vld [vmem:[%s9623_s8 + $0x8] sm:$0xff]  }
 0x599   : > { %6526 = vmatprep.subr.bf16.mxu0 %v6985_v53 }
 0x59a   : > { %v2201_v8 = vpack.c.bf16 %v8277_v37, %v8275_v12  ;;  %6527 = vmatpush3.bf16.msra.mxu0 %v6985_v53 }
 0x59b   : > { %6528 = vmatprep.subr.bf16.mxu0 %v6986_v32 }
 0x59c   : > { %6510 = vmatprep.mubr.msk.bf16.mxu1 %vm1059_vm1, %v2201_v8 }
 0x59d   : > { %6511 = vmatmul.mubr.msk.bf16.gmra.mxu1 %vm1059_vm1, %v2202_v23 }
 0x59e   : > { %6562 = vmatprep.mubr.bf16.mxu1 %v7130_v13  ;;  %6529 = vmatpush3.bf16.msra.mxu0 %v6986_v32 }
 0x62d   : > { %v6500_v41 = vpop.f32.mrf.mxu1 }
 0x62e   : > { %v2306_v46 = vadd.f32 %v6500_v41, %v2214_v26 }
 0x62f   : > { %v2297_v51 = vpop.f32.mrf.mxu1 }
 0x630   : > { %v2298_v44 = vadd.f32 %v2297_v51, %v2214_v26  ;;  %v2362_v31 = vmax.f32 %v2306_v46, 0.0 }
 0x631   : > { %v6501_v7 = vpop.f32.mrf.mxu1 }
 0x632   : > { %v2309_v15 = vadd.f32 %v6501_v7, %v2214_v26  ;;  %v2360_v24 = vmax.f32 %v2298_v44, 0.0 }
 0x633   : > { %v2300_v11 = vpop.f32.mrf.mxu1 }
 0x634   : > { %v2301_v17 = vadd.f32 %v2300_v11, %v2214_v26  ;;  %v2363_v6 = vmax.f32 %v2309_v15, 0.0 }
 0x636   : > { %v2361_v28 = vmax.f32 %v2301_v17, 0.0  ;;  %v2377_v23 = vpack.c.bf16 %v2363_v6, %v2362_v31 }
 0x638   : > { %v2376_v8 = vpack.c.bf16 %v2361_v28, %v2360_v24 }
 0x63a   : > { %6530 = vmatprep.mubr.bf16.mxu0 %v2376_v8 }
 0x63b   : > { %6531 = vmatmul.mubr.bf16.vlgmr.msra.gmra.mxu0 %v2377_v23 }
 0x63d   : > { %v6504_v13 = vpop.f32.mrf.mxu1 }
 0x63e   : > { %v2322_v19 = vadd.f32 %v6504_v13, %v2214_v26 }
 0x63f   : > { %v2313_v1 = vpop.f32.mrf.mxu1 }
 0x640   : > { %v2314_v32 = vadd.f32 %v2313_v1, %v2214_v26  ;;  %v2366_v11 = vmax.f32 %v2322_v19, 0.0 }
 0x641   : > { %v6505_v53 = vpop.f32.mrf.mxu1 }
 0x642   : > { %v2325_v43 = vadd.f32 %v6505_v53, %v2214_v26  ;;  %v2364_v41 = vmax.f32 %v2314_v32, 0.0 }
 0x643   : > { %v2316_v47 = vpop.f32.mrf.mxu1 }
 0x644   : > { %v2317_v51 = vadd.f32 %v2316_v47, %v2214_v26  ;;  %v2367_v7 = vmax.f32 %v2325_v43, 0.0 }
 0x646   : > { %v2365_v54 = vmax.f32 %v2317_v51, 0.0  ;;  %v2379_v44 = vpack.c.bf16 %v2367_v7, %v2366_v11 }
 0x648   : > { %v2378_v15 = vpack.c.bf16 %v2365_v54, %v2364_v41 }
 0x64a   : > { %6534 = vmatprep.mubr.bf16.mxu0 %v2378_v15 }
 0x64b   : > { %6535 = vmatmul.mubr.bf16.gmra.mxu0 %v2379_v44 }
 0x64d   : > { %v6508_v46 = vpop.f32.mrf.mxu1 }
 0x64e   : > { %v2338_v31 = vadd.f32 %v6508_v46, %v2214_v26 }
 0x64f   : > { %v2329_v17 = vpop.f32.mrf.mxu1 }
 0x650   : > { %v2330_v24 = vadd.f32 %v2329_v17, %v2214_v26  ;;  %v2370_v47 = vmax.f32 %v2338_v31, 0.0  ;;  %v7131_v31 = vld [vmem:[%s7879_s14 + $0x4] ss:$8 sps:$4 sm:$0xff]  }
 0x651   : > { %v6509_v6 = vpop.f32.mrf.mxu1 }
 0x652   : > { %v2341_v28 = vadd.f32 %v6509_v6, %v2214_v26  ;;  %v2368_v13 = vmax.f32 %v2330_v24, 0.0 }
 0x653   : > { %v2332_v8 = vpop.f32.mrf.mxu1 }
 0x654   : > { %v2333_v23 = vadd.f32 %v2332_v8, %v2214_v26  ;;  %v2371_v1 = vmax.f32 %v2341_v28, 0.0 }
 0x656   : > { %v2369_v53 = vmax.f32 %v2333_v23, 0.0  ;;  %v2381_v32 = vpack.c.bf16 %v2371_v1, %v2370_v47  ;;  %v8305_v23 = vsub.s32 4, %v9788_v59 }
 0x658   : > { %v2380_v43 = vpack.c.bf16 %v2369_v53, %v2368_v13  ;;  %9792 = vst [vmem:[#allocation20_spill] sm:$0xff] %v8305_v23  ;;  %v8309_v1 = vrot.slane %v8188_v2, %v8305_v23 }
 0x65a   : > { %6538 = vmatprep.mubr.bf16.mxu0 %v2380_v43 }
 0x65b   : > { %6539 = vmatmul.mubr.bf16.gmra.mxu0 %v2381_v32 }
 0x65d   : > { %v6512_v54 = vpop.f32.mrf.mxu1 }
 0x65e   : > { %v2354_v11 = vadd.f32 %v6512_v54, %v2214_v26 }
 0x65f   : > { %v2345_v19 = vpop.f32.mrf.mxu1 }
 0x660   : > { %v2346_v7 = vadd.f32 %v2345_v19, %v2214_v26  ;;  %v2374_v28 = vmax.f32 %v2354_v11, 0.0 }
 0x661   : > { %v6513_v51 = vpop.f32.mrf.mxu1 }
 0x662   : > { %v2357_v41 = vadd.f32 %v6513_v51, %v2214_v26  ;;  %v2372_v17 = vmax.f32 %v2346_v7, 0.0 }
 0x663   : > { %v2348_v15 = vpop.f32.mrf.mxu1 }
 0x664   : > { %v2349_v44 = vadd.f32 %v2348_v15, %v2214_v26  ;;  %v2375_v46 = vmax.f32 %v2357_v41, 0.0 }
 0x666   : > { %v2373_v6 = vmax.f32 %v2349_v44, 0.0  ;;  %v2383_v8 = vpack.c.bf16 %v2375_v46, %v2374_v28 }
 0x668   : > { %v2382_v24 = vpack.c.bf16 %v2373_v6, %v2372_v17 }
 0x66a   : > { %6542 = vmatprep.mubr.bf16.mxu0 %v2382_v24 }
 0x66b   : > { %6543 = vmatmul.mubr.bf16.gmra.mxu0 %v2383_v8 }
 0x66c   : > { %3102 = vmatprep.mubr.bf16.mxu0 %v7131_v31 }
 0x6fb   : > { %v6532_v13 = vpop.f32.mrf.mxu0 }
 0x6fc   : > { %v8312_v26 = vadd.f32 %v6532_v13, %v8309_v1 }
 0x6fd   : > { %v2486_v53 = vpop.f32.mrf.mxu0 }
 0x6fe   : > { %v8315_v47 = vadd.f32 %v2486_v53, %v8309_v1 }
 0x6ff   : > { %v6533_v43 = vpop.f32.mrf.mxu0 }
 0x701   : > { %v8317_v32 = vpop.f32.mrf.mxu0 }
 0x70b   : > { %v6536_v54 = vpop.f32.mrf.mxu0 }
 0x70c   : > { %v2511_v19 = vadd.f32 %v6536_v54, %v8309_v1 }
 0x70d   : > { %v2502_v59 = vpop.f32.mrf.mxu0 }
 0x70e   : > { %v8321_v51 = vadd.f32 %v2511_v19, %v8251_v55  ;;  %v8324_v2 = vadd.f32 %v2502_v59, %v8309_v1 }
 0x70f   : > { %v6537_v7 = vpop.f32.mrf.mxu0 }
 0x710   : > { %v2514_v41 = vadd.f32 %v6537_v7, %v8309_v1  ;;  %v2591_v11 = vsel %vm1059_vm1, %v8321_v51, 0.0  ;;  %v2643_v15 = vmul.f32 %v8321_v51, %v8321_v51 }
 0x711   : > { %2592 = vadd.xlane.f32.xlu1 %v2591_v11  ;;  %v2505_v28 = vpop.f32.mrf.mxu0 }
 0x712   : > { %v8332_v44 = vadd.f32 %v2514_v41, %v8245_v3  ;;  %v2671_v46 = vsel %vm1059_vm1, %v2643_v15, 0.0 }
 0x714   : > { %v2594_v55 = vsel %vm1059_vm1, %v8332_v44, 0.0  ;;  %v2644_v17 = vmul.f32 %v8332_v44, %v8332_v44 }
 0x715   : > { %2672 = vadd.xlane.f32.xlu1 %v2671_v46  ;;  %2595 = vadd.xlane.f32.xlu0 %v2594_v55 }
 0x716   : > { %v2674_v6 = vsel %vm1059_vm1, %v2644_v17, 0.0 }
 0x719   : > { %2675 = vadd.xlane.f32.xlu0 %v2674_v6 }
 0x71b   : > { %v6540_v24 = vpop.f32.mrf.mxu0 }
 0x71c   : > { %v2527_v8 = vadd.f32 %v6540_v24, %v8309_v1 }
 0x71d   : > { %v2518_v31 = vpop.f32.mrf.mxu0 }
 0x71e   : > { %v8342_v3 = vadd.f32 %v2527_v8, %v8265_v34  ;;  %v2519_v53 = vadd.f32 %v2518_v31, %v8309_v1 }
 0x71f   : > { %v6541_v13 = vpop.f32.mrf.mxu0 }
 0x720   : > { %v2603_v54 = vsel %vm1059_vm1, %v8342_v3, 0.0  ;;  %v2647_v19 = vmul.f32 %v8342_v3, %v8342_v3  ;;  %v8351_v41 = vadd.f32 %v2519_v53, %v8261_v0  ;;  %v2530_v11 = vadd.f32 %v6541_v13, %v8309_v1 }
 0x721   : > { %2604 = vadd.xlane.f32.xlu1 %v2603_v54  ;;  %v2521_v59 = vpop.f32.mrf.mxu0 }
 0x722   : > { %v2522_v7 = vadd.f32 %v2521_v59, %v8309_v1  ;;  %v2683_v15 = vsel %vm1059_vm1, %v2647_v19, 0.0  ;;  %v8361_v55 = vadd.f32 %v2530_v11, %v8259_v48  ;;  %v2597_v0 = vsel %vm1059_vm1, %v8351_v41, 0.0 }
 0x723   : > { %v2645_v24 = vmul.f32 %v8351_v41, %v8351_v41  ;;  %v2506_v48 = vadd.f32 %v2505_v28, %v8309_v1 }
 0x724   : > { %v8355_v34 = vadd.f32 %v2522_v7, %v8263_v21  ;;  %v2606_v21 = vsel %vm1059_vm1, %v8361_v55, 0.0  ;;  %v2648_v54 = vmul.f32 %v8361_v55, %v8361_v55 }
 0x725   : > { %2684 = vadd.xlane.f32.xlu1 %v2683_v15  ;;  %v2677_v53 = vsel %vm1059_vm1, %v2645_v24, 0.0  ;;  %v8381_v59 = vadd.f32 %v2506_v48, %v8249_v36  ;;  %v2490_v24 = vadd.f32 %v8317_v32, %v8309_v1 }
 0x726   : > { %v2646_v46 = vmul.f32 %v8355_v34, %v8355_v34  ;;  %v2686_v28 = vsel %vm1059_vm1, %v2648_v54, 0.0 }
 0x727   : > { %v2588_v36 = vsel %vm1059_vm1, %v8381_v59, 0.0 }
 0x728   : > { %v2680_v17 = vsel %vm1059_vm1, %v2646_v46, 0.0  ;;  %v2600_v46 = vsel %vm1059_vm1, %v8355_v34, 0.0 }
 0x729   : > { %2681 = vadd.xlane.f32.xlu0 %v2680_v17  ;;  %2598 = vadd.xlane.f32.xlu1 %v2597_v0  ;;  %v2642_v17 = vmul.f32 %v8381_v59, %v8381_v59 }
 0x72b   : > { %v6544_v6 = vpop.f32.mrf.mxu0 }
 0x72c   : > { %v2543_v7 = vadd.f32 %v6544_v6, %v8309_v1 }
 0x72d   : > { %v2534_v8 = vpop.f32.mrf.mxu0  ;;  %2607 = vadd.xlane.f32.xlu1 %v2606_v21 }
 0x72e   : > { %v2535_v31 = vadd.f32 %v2534_v8, %v8309_v1  ;;  %v8388_v15 = vadd.f32 %v2543_v7, %v8279_v58  ;;  %v2668_v58 = vsel %vm1059_vm1, %v2642_v17, 0.0 }
 0x72f   : > { %v6545_v21 = vpop.f32.mrf.mxu0 }
 0x730   : > { %v8373_v13 = vadd.f32 %v2535_v31, %v8275_v12  ;;  %v2498_v12 = vadd.f32 %v6533_v43, %v8309_v1  ;;  %v2615_v43 = vsel %vm1059_vm1, %v8388_v15, 0.0  ;;  %v2651_v6 = vmul.f32 %v8388_v15, %v8388_v15 }
 0x731   : > { %2678 = vadd.xlane.f32.xlu1 %v2677_v53  ;;  %v2546_v8 = vadd.f32 %v6545_v21, %v8309_v1  ;;  %v8413_v53 = vadd.f32 %v2490_v24, %v8235_v10  ;;  %v2537_v7 = vpop.f32.mrf.mxu0  ;;  %v8450_v24 = vadd.f32 %v8312_v26, %v8237_v40 }
 0x732   : > { %v2649_v19 = vmul.f32 %v8373_v13, %v8373_v13  ;;  %v8397_v0 = vadd.f32 %v2498_v12, %v8231_v18  ;;  %v2695_v31 = vsel %vm1059_vm1, %v2651_v6, 0.0  ;;  %v2609_v32 = vsel %vm1059_vm1, %v8373_v13, 0.0 }
 0x733   : > { %v8416_v54 = vadd.f32 %v2546_v8, %v8273_v42  ;;  %v2638_v12 = vmul.f32 %v8413_v53, %v8413_v53 }
 0x734   : > { %v2689_v11 = vsel %vm1059_vm1, %v2649_v19, 0.0  ;;  %v2582_v18 = vsel %vm1059_vm1, %v8397_v0, 0.0  ;;  %v2640_v48 = vmul.f32 %v8397_v0, %v8397_v0 }
 0x735   : > { %2690 = vadd.xlane.f32.xlu0 %v2689_v11  ;;  %2687 = vadd.xlane.f32.xlu1 %v2686_v28  ;;  %v2576_v11 = vsel %vm1059_vm1, %v8413_v53, 0.0  ;;  %v2538_v28 = vadd.f32 %v2537_v7, %v8309_v1  ;;  %v2618_v10 = vsel %vm1059_vm1, %v8416_v54, 0.0  ;;  %v2652_v42 = vmul.f32 %v8416_v54, %v8416_v54 }
 0x736   : > { %v2662_v19 = vsel %vm1059_vm1, %v2640_v48, 0.0  ;;  %v2656_v17 = vsel %vm1059_vm1, %v2638_v12, 0.0 }
 0x739   : > { %2601 = vadd.xlane.f32.xlu1 %v2600_v46  ;;  %2589 = vadd.xlane.f32.xlu0 %v2588_v36  ;;  %v8431_v46 = vadd.f32 %v2538_v28, %v8277_v37  ;;  %v2698_v36 = vsel %vm1059_vm1, %v2652_v42, 0.0 }
 0x73b   : > { %v2612_v1 = vsel %vm1059_vm1, %v8431_v46, 0.0 }
 0x73d   : > { %2616 = vadd.xlane.f32.xlu1 %v2615_v43  ;;  %2669 = vadd.xlane.f32.xlu0 %v2668_v58  ;;  %v2650_v43 = vmul.f32 %v8431_v46, %v8431_v46  ;;  %v8441_v58 = vadd.f32 %v8324_v2, %v8247_v16  ;;  %v2579_v16 = vsel %vm1059_vm1, %v8450_v24, 0.0  ;;  %v2639_v2 = vmul.f32 %v8450_v24, %v8450_v24 }
 0x73f   : > { %v2692_v37 = vsel %vm1059_vm1, %v2650_v43, 0.0  ;;  %v2585_v6 = vsel %vm1059_vm1, %v8441_v58, 0.0  ;;  %v2641_v21 = vmul.f32 %v8441_v58, %v8441_v58 }
 0x741   : > { %2696 = vadd.xlane.f32.xlu1 %v2695_v31  ;;  %2583 = vadd.xlane.f32.xlu0 %v2582_v18  ;;  %v2665_v8 = vsel %vm1059_vm1, %v2641_v21, 0.0  ;;  %v8459_v31 = vadd.f32 %v8315_v47, %v8233_v56  ;;  %v2659_v18 = vsel %vm1059_vm1, %v2639_v2, 0.0 }
 0x743   : > { %v2573_v40 = vsel %vm1059_vm1, %v8459_v31, 0.0  ;;  %v2637_v26 = vmul.f32 %v8459_v31, %v8459_v31 }
 0x745   : > { %2610 = vadd.xlane.f32.xlu1 %v2609_v32  ;;  %2663 = vadd.xlane.f32.xlu0 %v2662_v19  ;;  %v2653_v48 = vsel %vm1059_vm1, %v2637_v26, 0.0 }
 0x749   : > { %2619 = vadd.xlane.f32.xlu1 %v2618_v10  ;;  %2577 = vadd.xlane.f32.xlu0 %v2576_v11 }
 0x74d   : > { %2699 = vadd.xlane.f32.xlu1 %v2698_v36  ;;  %2657 = vadd.xlane.f32.xlu0 %v2656_v17 }
 0x751   : > { %2613 = vadd.xlane.f32.xlu1 %v2612_v1 }
 0x755   : > { %2693 = vadd.xlane.f32.xlu1 %v2692_v37 }
 0x759   : > { %2586 = vadd.xlane.f32.xlu1 %v2585_v6 }
 0x75d   : > { %2666 = vadd.xlane.f32.xlu1 %v2665_v8 }
 0x761   : > { %2580 = vadd.xlane.f32.xlu1 %v2579_v16 }
 0x765   : > { %2660 = vadd.xlane.f32.xlu1 %v2659_v18 }
 0x769   : > { %2574 = vadd.xlane.f32.xlu1 %v2573_v40 }
 0x76d   : > { %2654 = vadd.xlane.f32.xlu1 %v2653_v48 }
 0x79a   : > { %v2593_v32 = vpop.xlane.xlu1 %2592 }
 0x79b   : > { %v2627_v19 = vmul.f32 0.015625, %v2593_v32 }
 0x79d   : > { %v2723_v11 = vmul.f32 %v2627_v19, %v2627_v19  ;;  %v2755_v12 = vsub.f32 %v8321_v51, %v2627_v19 }
 0x79e   : > { %v2673_v7 = vpop.xlane.xlu1 %2672  ;;  %v2596_v43 = vpop.xlane.xlu0 %2595 }
 0x79f   : > { %v2707_v28 = vmul.f32 0.015625, %v2673_v7  ;;  %v8496_v25 = vmul.f32 0.015625, %v2596_v43 }
 0x7a1   : > { %v2739_v56 = vsub.f32 %v2707_v28, %v2723_v11  ;;  %v2724_v43 = vmul.f32 %v8496_v25, %v8496_v25 }
 0x7a2   : > { %v2676_v21 = vpop.xlane.xlu0 %2675 }
 0x7a3   : > { %v2771_v47 = vadd.f32 1e-05, %v2739_v56  ;;  %v2708_v60 = vmul.f32 0.015625, %v2676_v21 }
 0x7a5   : > { %7064 = vrsqrt.f32 %v2771_v47 }
 0x7aa   : > { %v2605_v10 = vpop.xlane.xlu1 %2604 }
 0x7ae   : > { %v2685_v42 = vpop.xlane.xlu1 %2684 }
 0x7af   : > { %v2711_v14 = vmul.f32 0.015625, %v2685_v42 }
 0x7b2   : > { %v7065_v36 = vpop.eup %7064  ;;  %v2599_v17 = vpop.xlane.xlu1 %2598 }
 0x7b3   : > { %v8468_v1 = vmul.f32 %v7065_v36, %v2755_v12  ;;  %v2682_v16 = vpop.xlane.xlu0 %2681  ;;  %v8478_v12 = vmul.f32 0.015625, %v2605_v10 }
 0x7b4   : > { %v2710_v33 = vmul.f32 0.015625, %v2682_v16 }
 0x7b6   : > { %v2608_v37 = vpop.xlane.xlu1 %2607 }
 0x7b7   : > { %v8476_v47 = vmul.f32 0.015625, %v2608_v37  ;;  %v2727_v37 = vmul.f32 %v8478_v12, %v8478_v12 }
 0x7b9   : > { %v2743_v63 = vsub.f32 %v2711_v14, %v2727_v37 }
 0x7ba   : > { %v2679_v6 = vpop.xlane.xlu1 %2678 }
 0x7bb   : > { %v2709_v20 = vmul.f32 0.015625, %v2679_v6  ;;  %v2740_v6 = vsub.f32 %v2708_v60, %v2724_v43 }
 0x7be   : > { %v2688_v8 = vpop.xlane.xlu1 %2687  ;;  %v2691_v18 = vpop.xlane.xlu0 %2690 }
 0x7bf   : > { %v2712_v36 = vmul.f32 0.015625, %v2688_v8 }
 0x7c2   : > { %v2602_v2 = vpop.xlane.xlu1 %2601  ;;  %v2590_v48 = vpop.xlane.xlu0 %2589 }
 0x7c3   : > { %v8480_v23 = vmul.f32 0.015625, %v2602_v2  ;;  %v8504_v16 = vmul.f32 0.015625, %v2590_v48 }
 0x7c5   : > { %v2726_v2 = vmul.f32 %v8480_v23, %v8480_v23  ;;  %v2722_v60 = vmul.f32 %v8504_v16, %v8504_v16 }
 0x7c6   : > { %v2617_v40 = vpop.xlane.xlu1 %2616  ;;  %v2670_v28 = vpop.xlane.xlu0 %2669 }
 0x7c7   : > { %v8470_v26 = vmul.f32 0.015625, %v2617_v40 }
 0x7c9   : > { %v2731_v51 = vmul.f32 %v8470_v26, %v8470_v26 }
 0x7ca   : > { %v2697_v32 = vpop.xlane.xlu1 %2696  ;;  %v2584_v10 = vpop.xlane.xlu0 %2583 }
 0x7cb   : > { %v2715_v7 = vmul.f32 0.015625, %v2697_v32  ;;  %v8510_v48 = vmul.f32 0.015625, %v2584_v10 }
 0x7cd   : > { %v2747_v19 = vsub.f32 %v2715_v7, %v2731_v51  ;;  %v2728_v7 = vmul.f32 %v8476_v47, %v8476_v47  ;;  %v2713_v51 = vmul.f32 0.015625, %v2691_v18  ;;  %v2720_v10 = vmul.f32 %v8510_v48, %v8510_v48 }
 0x7ce   : > { %v2611_v11 = vpop.xlane.xlu1 %2610  ;;  %v2664_v61 = vpop.xlane.xlu0 %2663 }
 0x7cf   : > { %v8474_v56 = vmul.f32 0.015625, %v2611_v11  ;;  %v2779_v40 = vadd.f32 1e-05, %v2747_v19  ;;  %v8490_v11 = vmul.f32 0.015625, %v2599_v17  ;;  %v2744_v8 = vsub.f32 %v2712_v36, %v2728_v7 }
 0x7d0   : > { %v2742_v7 = vsub.f32 %v2710_v33, %v2726_v2 }
 0x7d1   : > { %v2729_v32 = vmul.f32 %v8474_v56, %v8474_v56  ;;  %7066 = vrsqrt.f32 %v2779_v40  ;;  %v2725_v17 = vmul.f32 %v8490_v11, %v8490_v11  ;;  %v2776_v36 = vadd.f32 1e-05, %v2744_v8 }
 0x7d2   : > { %v2620_v39 = vpop.xlane.xlu1 %2619  ;;  %v2774_v21 = vadd.f32 1e-05, %v2742_v7  ;;  %v2706_v8 = vmul.f32 0.015625, %v2670_v28  ;;  %v2578_v2 = vpop.xlane.xlu0 %2577  ;;  %v8519_v28 = vld [vmem:[%s9624_s9 + $0x8] sm:$0x7f] }
 0x7d3   : > { %v8484_v38 = vmul.f32 0.015625, %v2620_v39  ;;  %v2745_v50 = vsub.f32 %v2713_v51, %v2729_v32  ;;  %v2741_v14 = vsub.f32 %v2709_v20, %v2725_v17  ;;  %9793 = vst [vmem:[#allocation21_spill] sm:$0xff] %v8519_v28 }
 0x7d4   : > { %v2738_v7 = vsub.f32 %v2706_v8, %v2722_v60 }
 0x7d5   : > { %v2732_v39 = vmul.f32 %v8484_v38, %v8484_v38  ;;  %v2777_v40 = vadd.f32 1e-05, %v2745_v50 }
 0x7d6   : > { %v2700_v19 = vpop.xlane.xlu1 %2699 }
 0x7d7   : > { %v2716_v42 = vmul.f32 0.015625, %v2700_v19  ;;  %v2775_v19 = vadd.f32 1e-05, %v2743_v63 }
 0x7d9   : > { %v2748_v18 = vsub.f32 %v2716_v42, %v2732_v39  ;;  %v2772_v42 = vadd.f32 1e-05, %v2740_v6 }
 0x7da   : > { %v2614_v35 = vpop.xlane.xlu1 %2613 }
 0x7db   : > { %v2780_v32 = vadd.f32 1e-05, %v2748_v18  ;;  %v8500_v51 = vmul.f32 0.015625, %v2614_v35  ;;  %v2773_v35 = vadd.f32 1e-05, %v2741_v14 }
 0x7dd   : > { %7068 = vrsqrt.f32 %v2780_v32  ;;  %v2730_v33 = vmul.f32 %v8500_v51, %v8500_v51 }
 0x7de   : > { %7070 = vrsqrt.f32 %v2776_v36  ;;  %v2694_v37 = vpop.xlane.xlu1 %2693  ;;  %v7067_v63 = vpop.eup %7066  ;;  %v2763_v36 = vsub.f32 %v8388_v15, %v8470_v26  ;;  %v9794_v15 = vld [vmem:[#allocation6_spill] sm:$0xff] }
 0x7df   : > { %7072 = vrsqrt.f32 %v2777_v40  ;;  %v2714_v50 = vmul.f32 0.015625, %v2694_v37  ;;  %v2704_v40 = vmul.f32 0.015625, %v2664_v61  ;;  %v8527_v26 = vrot.slane %v8519_v28, %v9794_v15 }
 0x7e0   : > { %7074 = vrsqrt.f32 %v2775_v19  ;;  %v2811_v43 = vmul.f32 %v7067_v63, %v2763_v36  ;;  %v2658_v19 = vpop.xlane.xlu0 %2657  ;;  %v8529_v37 = vmul.f32 0.015625, %v2578_v2  ;;  %v2760_v2 = vsub.f32 %v8361_v55, %v8476_v47 }
 0x7e1   : > { %v2746_v39 = vsub.f32 %v2714_v50, %v2730_v33  ;;  %7076 = vrsqrt.f32 %v2774_v21  ;;  %v2770_v21 = vadd.f32 1e-05, %v2738_v7  ;;  %v2736_v61 = vsub.f32 %v2704_v40, %v2720_v10 }
 0x7e2   : > { %v2587_v20 = vpop.xlane.xlu1 %2586  ;;  %7078 = vrsqrt.f32 %v2773_v35  ;;  %v2764_v33 = vsub.f32 %v8416_v54, %v8484_v38  ;;  %v2702_v8 = vmul.f32 0.015625, %v2658_v19  ;;  %v2718_v7 = vmul.f32 %v8529_v37, %v8529_v37  ;;  %v9795_v38 = vld [vmem:[#allocation7_spill] sm:$0xff] }
 0x7e3   : > { %v2778_v18 = vadd.f32 1e-05, %v2746_v39  ;;  %v8512_v17 = vmul.f32 0.015625, %v2587_v20  ;;  %v8542_v54 = vrot.slane %v8519_v28, %v9795_v38  ;;  %v2759_v19 = vsub.f32 %v8342_v3, %v8478_v12  ;;  %v9813_v28 = vld [vmem:[#allocation32_spill] sm:$0xff] }
 0x7e4   : > { %v2734_v55 = vsub.f32 %v2702_v8, %v2718_v7  ;;  %v2762_v12 = vsub.f32 %v8431_v46, %v8500_v51  ;;  %v2756_v51 = vsub.f32 %v8332_v44, %v8496_v25 }
 0x7e5   : > { %7080 = vrsqrt.f32 %v2778_v18  ;;  %v2721_v14 = vmul.f32 %v8512_v17, %v8512_v17 }
 0x7e6   : > { %7082 = vrsqrt.f32 %v2772_v42  ;;  %v2667_v32 = vpop.xlane.xlu1 %2666  ;;  %v2831_v42 = vmul.f32 %v8527_v26, %v2811_v43  ;;  %v2768_v43 = vadd.f32 1e-05, %v2736_v61 }
 0x7e7   : > { %v2705_v6 = vmul.f32 0.015625, %v2667_v32  ;;  %7084 = vrsqrt.f32 %v2770_v21  ;;  %v2761_v32 = vsub.f32 %v8373_v13, %v8474_v56  ;;  %v2758_v56 = vsub.f32 %v8355_v34, %v8480_v23 }
 0x7e9   : > { %v2737_v50 = vsub.f32 %v2705_v6, %v2721_v14  ;;  %v8550_v14 = vadd.f32 %v8542_v54, %v2831_v42 }
 0x7ea   : > { %v7069_v35 = vpop.eup %7068  ;;  %v2581_v39 = vpop.xlane.xlu1 %2580 }
 0x7eb   : > { %v7071_v60 = vpop.eup %7070  ;;  %v2769_v20 = vadd.f32 1e-05, %v2737_v50  ;;  %v8534_v63 = vmul.f32 0.015625, %v2581_v39  ;;  %v2812_v18 = vmul.f32 %v7069_v35, %v2764_v33  ;;  %9796 = vst [vmem:[#allocation18_spill] sm:$0xff] %v8550_v14 }
 0x7ec   : > { %v7073_v36 = vpop.eup %7072  ;;  %v2808_v6 = vmul.f32 %v7071_v60, %v2760_v2  ;;  %v2757_v60 = vsub.f32 %v8351_v41, %v8490_v11 }
 0x7ed   : > { %v7075_v40 = vpop.eup %7074  ;;  %7086 = vrsqrt.f32 %v2769_v20  ;;  %v2832_v10 = vmul.f32 %v8527_v26, %v2812_v18  ;;  %v2809_v33 = vmul.f32 %v7073_v36, %v2761_v32  ;;  %v2719_v50 = vmul.f32 %v8534_v63, %v8534_v63 }
 0x7ee   : > { %v2661_v47 = vpop.xlane.xlu1 %2660  ;;  %v7077_v21 = vpop.eup %7076  ;;  %v2807_v61 = vmul.f32 %v7075_v40, %v2759_v19  ;;  %7088 = vrsqrt.f32 %v2768_v43  ;;  %v2766_v18 = vadd.f32 1e-05, %v2734_v55  ;;  %v2828_v2 = vmul.f32 %v8527_v26, %v2808_v6 }
 0x7ef   : > { %v2703_v35 = vmul.f32 0.015625, %v2661_v47  ;;  %v8555_v13 = vadd.f32 %v8542_v54, %v2832_v10  ;;  %v7079_v3 = vpop.eup %7078  ;;  %v2806_v20 = vmul.f32 %v7077_v21, %v2758_v56  ;;  %v2829_v34 = vmul.f32 %v8527_v26, %v2809_v33 }
 0x7f0   : > { %v2827_v32 = vmul.f32 %v8527_v26, %v2807_v61  ;;  %v2805_v11 = vmul.f32 %v7079_v3, %v2757_v60  ;;  %v8575_v19 = vadd.f32 %v8542_v54, %v2828_v2 }
 0x7f1   : > { %9797 = vst [vmem:[#allocation19_spill] sm:$0xff] %v8555_v13  ;;  %v2735_v8 = vsub.f32 %v2703_v35, %v2719_v50  ;;  %v2860_v39 = vpack.c.bf16 %v8555_v13, %v8550_v14  ;;  %v2826_v43 = vmul.f32 %v8527_v26, %v2806_v20  ;;  %v8580_v25 = vadd.f32 %v8542_v54, %v2829_v34  ;;  %v9814_v14 = vld [vmem:[#allocation33_spill] sm:$0xff] }
 0x7f2   : > { %v7081_v42 = vpop.eup %7080  ;;  %v2575_v36 = vpop.xlane.xlu1 %2574  ;;  %9798 = vst [vmem:[#allocation16_spill] sm:$0xff] %v8575_v19  ;;  %v8586_v21 = vadd.f32 %v8542_v54, %v2827_v32  ;;  %v2753_v50 = vsub.f32 %v8441_v58, %v8512_v17  ;;  %v2825_v61 = vmul.f32 %v8527_v26, %v2805_v11  ;;  %v2751_v34 = vsub.f32 %v8450_v24, %v8534_v63 }
 0x7f3   : > { %v7083_v23 = vpop.eup %7082  ;;  %v2767_v7 = vadd.f32 1e-05, %v2735_v8  ;;  %v8567_v40 = vmul.f32 0.015625, %v2575_v36  ;;  %6546 = vmatprep.subr.bf16.mxu1 %v2860_v39  ;;  %v2810_v46 = vmul.f32 %v7081_v42, %v2762_v12  ;;  %9799 = vst [vmem:[#allocation17_spill] sm:$0xff] %v8580_v25  ;;  %v2754_v12 = vsub.f32 %v8381_v59, %v8504_v16 }
 0x7f4   : > { %6547 = vmatpush3.bf16.msra.mxu1 %v2860_v39  ;;  %v2804_v55 = vmul.f32 %v7083_v23, %v2756_v51  ;;  %9801 = vst [vmem:[#allocation15_spill] sm:$0xff] %v8586_v21  ;;  %v7085_v33 = vpop.eup %7084  ;;  %v2858_v42 = vpack.c.bf16 %v8575_v19, %v8586_v21  ;;  %v8599_v60 = vadd.f32 %v8542_v54, %v2826_v43  ;;  %v9815_v19 = vld [vmem:[#allocation34_spill] sm:$0xff] }
 0x7f5   : > { %7090 = vrsqrt.f32 %v2767_v7  ;;  %v2830_v41 = vmul.f32 %v8527_v26, %v2810_v46  ;;  %v2717_v47 = vmul.f32 %v8567_v40, %v8567_v40  ;;  %v8602_v17 = vadd.f32 %v8542_v54, %v2825_v61 }
 0x7f6   : > { %7092 = vrsqrt.f32 %v2766_v18  ;;  %v2655_v10 = vpop.xlane.xlu1 %2654  ;;  %v2824_v8 = vmul.f32 %v8527_v26, %v2804_v55  ;;  %9802 = vst [vmem:[#allocation12_spill] sm:$0xff] %v8599_v60  ;;  %v2823_v59 = vmul.f32 %v8527_v26, %v8468_v1  ;;  %v2802_v16 = vmul.f32 %v7085_v33, %v2754_v12  ;;  %v7133_v12 = vld [vmem:[%s7600_s25 + $0x10] sm:$0xff]  }
 0x7f7   : > { %v2701_v6 = vmul.f32 0.015625, %v2655_v10  ;;  %v8583_v44 = vadd.f32 %v8542_v54, %v2830_v41  ;;  %9803 = vst [vmem:[#allocation13_spill] sm:$0xff] %v8602_v17  ;;  %v2752_v18 = vsub.f32 %v8397_v0, %v8510_v48  ;;  %v2857_v36 = vpack.c.bf16 %v8599_v60, %v8602_v17 }
 0x7f8   : > { %v8611_v2 = vadd.f32 %v8542_v54, %v2824_v8  ;;  %v8617_v1 = vadd.f32 %v8542_v54, %v2823_v59  ;;  %v2822_v7 = vmul.f32 %v8527_v26, %v2802_v16  ;;  %v2750_v24 = vsub.f32 %v8413_v53, %v8529_v37  ;;  %v7135_v8 = vld [vmem:[%s7600_s25 + $0x20] sm:$0xff]   ;;  %v7140_v59 = vld [vmem:[%s7600_s25 + $0x48] sm:$0xff]   ;;  %v7141_v16 = vld [vmem:[%s7600_s25 + $0x50] sm:$0xff]  }
 0x7f9   : > { %9800 = vst [vmem:[#allocation14_spill] sm:$0xff] %v8583_v44  ;;  %v2733_v35 = vsub.f32 %v2701_v6, %v2717_v47  ;;  %v2859_v56 = vpack.c.bf16 %v8583_v44, %v8580_v25  ;;  %v2749_v6 = vsub.f32 %v8459_v31, %v8567_v40 }
 0x7fa   : > { %v7087_v3 = vpop.eup %7086  ;;  %9804 = vst [vmem:[#allocation10_spill] sm:$0xff] %v8611_v2  ;;  %9805 = vst [vmem:[#allocation11_spill] sm:$0xff] %v8617_v1  ;;  %v2856_v51 = vpack.c.bf16 %v8611_v2, %v8617_v1  ;;  %v8628_v63 = vadd.f32 %v8542_v54, %v2822_v7 }
 0x7fb   : > { %v2765_v39 = vadd.f32 1e-05, %v2733_v35  ;;  %6548 = vmatprep.subr.bf16.mxu1 %v2859_v56  ;;  %v2801_v58 = vmul.f32 %v7087_v3, %v2753_v50  ;;  %v7089_v20 = vpop.eup %7088  ;;  %v7132_v3 = vld [vmem:[%s7600_s25 + $0x8] sm:$0xff]  }
 0x7fc   : > { %6549 = vmatpush3.bf16.msra.mxu1 %v2859_v56  ;;  %v2800_v46 = vmul.f32 %v7089_v20, %v2752_v18  ;;  %v7142_v20 = vld [vmem:[%s7600_s25 + $0x58] sm:$0xff]   ;;  %v7143_v18 = vld [vmem:[%s7600_s25 + $0x60] sm:$0xff]  }
 0x7fd   : > { %7094 = vrsqrt.f32 %v2765_v39  ;;  %6550 = vmatprep.subr.bf16.mxu1 %v2858_v42  ;;  %v2821_v23 = vmul.f32 %v8527_v26, %v2801_v58  ;;  %v7137_v39 = vld [vmem:[%s7600_s25 + $0x30] sm:$0xff]   ;;  %v7139_v58 = vld [vmem:[%s7600_s25 + $0x40] sm:$0xff]  }
 0x7fe   : > { %v2820_v43 = vmul.f32 %v8527_v26, %v2800_v46 }
 0x7ff   : > { %v8623_v32 = vadd.f32 %v8542_v54, %v2821_v23  ;;  %v7145_v23 = vld [vmem:[%s7600_s25 + $0x70] sm:$0xff]  }
 0x800   : > { %6551 = vmatpush3.bf16.msra.mxu1 %v2858_v42  ;;  %v8640_v53 = vadd.f32 %v8542_v54, %v2820_v43  ;;  %v7138_v42 = vld [vmem:[%s7600_s25 + $0x38] sm:$0xff]  }
 0x801   : > { %6552 = vmatprep.subr.bf16.mxu1 %v2857_v36  ;;  %v2855_v10 = vpack.c.bf16 %v8628_v63, %v8623_v32 }
 0x802   : > { %v7091_v0 = vpop.eup %7090 }
 0x803   : > { %v7093_v48 = vpop.eup %7092  ;;  %v2799_v41 = vmul.f32 %v7091_v0, %v2751_v34  ;;  %v7146_v34 = vld [vmem:[%s7600_s25 + $0x78] sm:$0xff]  }
 0x804   : > { %6553 = vmatpush3.bf16.msra.mxu1 %v2857_v36  ;;  %v2798_v47 = vmul.f32 %v7093_v48, %v2750_v24  ;;  %v7144_v36 = vld [vmem:[%s7600_s25 + $0x68] sm:$0xff]   ;;  %v9806_v0 = vld [vmem:[#allocation24_spill] sm:$0xff] }
 0x805   : > { %6554 = vmatprep.subr.bf16.mxu1 %v2856_v51  ;;  %v2819_v11 = vmul.f32 %v8527_v26, %v2799_v41  ;;  %v9807_v41 = vld [vmem:[#allocation25_spill] sm:$0xff] }
 0x806   : > { %v2818_v35 = vmul.f32 %v8527_v26, %v2798_v47 }
 0x807   : > { %v8635_v55 = vadd.f32 %v8542_v54, %v2819_v11 }
 0x808   : > { %6555 = vmatpush3.bf16.msra.mxu1 %v2856_v51  ;;  %v8650_v56 = vadd.f32 %v8542_v54, %v2818_v35 }
 0x809   : > { %6556 = vmatprep.subr.bf16.mxu1 %v2855_v10  ;;  %v2854_v33 = vpack.c.bf16 %v8640_v53, %v8635_v55 }
 0x80a   : > { %v7095_v37 = vpop.eup %7094 }
 0x80b   : > { %v2797_v50 = vmul.f32 %v7095_v37, %v2749_v6 }
 0x80c   : > { %6557 = vmatpush3.bf16.msra.mxu1 %v2855_v10 }
 0x80d   : > { %6558 = vmatprep.subr.bf16.mxu1 %v2854_v33  ;;  %v2817_v31 = vmul.f32 %v8527_v26, %v2797_v50  ;;  %v7134_v26 = vld [vmem:[%s7600_s25 + $0x18] sm:$0xff]  }
 0x80f   : > { %v8647_v40 = vadd.f32 %v8542_v54, %v2817_v31  ;;  %v7136_v54 = vld [vmem:[%s7600_s25 + $0x28] sm:$0xff]   ;;  %v9809_v31 = vld [vmem:[#allocation28_spill] sm:$0xff] }
 0x810   : > { %6559 = vmatpush3.bf16.msra.mxu1 %v2854_v33  ;;  %v9808_v33 = vld [vmem:[#allocation26_spill] sm:$0xff] }
 0x811   : > { %v2853_v61 = vpack.c.bf16 %v8650_v56, %v8647_v40 }
 0x813   : > { %6560 = vmatprep.subr.bf16.mxu1 %v2853_v61 }
 0x814   : > { %6561 = vmatpush3.bf16.msra.mxu1 %v2853_v61 }
 0x817   : > { %6563 = vmatmul.mubr.bf16.vlgmr.msra.gmra.mxu1 %v7132_v3 }
 0x818   : > { %6566 = vmatprep.mubr.bf16.mxu1 %v7133_v12 }
 0x81f   : > { %6567 = vmatmul.mubr.bf16.gmra.mxu1 %v7134_v26 }
 0x820   : > { %6570 = vmatprep.mubr.bf16.mxu1 %v7135_v8 }
 0x827   : > { %6571 = vmatmul.mubr.bf16.gmra.mxu1 %v7136_v54 }
 0x828   : > { %6574 = vmatprep.mubr.bf16.mxu1 %v7137_v39 }
 0x82f   : > { %6575 = vmatmul.mubr.bf16.gmra.mxu1 %v7138_v42 }
 0x830   : > { %6578 = vmatprep.mubr.bf16.mxu1 %v7139_v58 }
 0x837   : > { %6579 = vmatmul.mubr.bf16.gmra.mxu1 %v7140_v59 }
 0x838   : > { %6582 = vmatprep.mubr.bf16.mxu1 %v7141_v16 }
 0x83f   : > { %6583 = vmatmul.mubr.bf16.gmra.mxu1 %v7142_v20 }
 0x840   : > { %6586 = vmatprep.mubr.bf16.mxu1 %v7143_v18 }
 0x847   : > { %6587 = vmatmul.mubr.bf16.gmra.mxu1 %v7144_v36 }
 0x848   : > { %6590 = vmatprep.mubr.bf16.mxu1 %v7145_v23 }
 0x84f   : > { %6591 = vmatmul.mubr.bf16.gmra.mxu1 %v7146_v34 }
 0x8d7   : > { %v6564_v7 = vpop.f32.mrf.mxu1 }
 0x8d8   : > { %v2904_v48 = vadd.f32 %v6564_v7, %v9806_v0  ;;  %v9812_v0 = vld [vmem:[#allocation31_spill] sm:$0xff] }
 0x8d9   : > { %v8669_v46 = vpop.f32.mrf.mxu1 }
 0x8da   : > { %v3024_v43 = vmax.f32 %v2904_v48, 0.0 }
 0x8db   : > { %v6565_v51 = vpop.f32.mrf.mxu1 }
 0x8dc   : > { %v2907_v24 = vadd.f32 %v6565_v51, %v9807_v41 }
 0x8dd   : > { %v8673_v11 = vpop.f32.mrf.mxu1 }
 0x8de   : > { %v3025_v10 = vmax.f32 %v2907_v24, 0.0 }
 0x8df   : > { %v6568_v47 = vpop.f32.mrf.mxu1 }
 0x8e0   : > { %v8675_v6 = vpack.c.bf16 %v3025_v10, %v3024_v43  ;;  %v2920_v50 = vadd.f32 %v6568_v47, %v9808_v33  ;;  %v9811_v33 = vld [vmem:[#allocation29_spill] sm:$0xff] }
 0x8e1   : > { %v8677_v37 = vpop.f32.mrf.mxu1 }
 0x8e2   : > { %v3028_v12 = vmax.f32 %v2920_v50, 0.0 }
 0x8e3   : > { %v6569_v35 = vpop.f32.mrf.mxu1 }
 0x8e4   : > { %v2923_v61 = vadd.f32 %v6569_v35, %v9809_v31 }
 0x8e5   : > { %v8681_v3 = vpop.f32.mrf.mxu1 }
 0x8e6   : > { %v3029_v26 = vmax.f32 %v2923_v61, 0.0 }
 0x8e7   : > { %v6572_v8 = vpop.f32.mrf.mxu1 }
 0x8e8   : > { %v8683_v54 = vpack.c.bf16 %v3029_v26, %v3028_v12  ;;  %v9810_v12 = vld [vmem:[#allocation30_spill] sm:$0xff] }
 0x8e9   : > { %v2927_v39 = vpop.f32.mrf.mxu1 }
 0x8eb   : > { %v6573_v42 = vpop.f32.mrf.mxu1 }
 0x8ed   : > { %v2930_v58 = vpop.f32.mrf.mxu1 }
 0x8ef   : > { %v6576_v59 = vpop.f32.mrf.mxu1 }
 0x8f0   : > { %v2952_v38 = vadd.f32 %v6576_v59, %v9812_v0 }
 0x8f1   : > { %v2943_v16 = vpop.f32.mrf.mxu1 }
 0x8f3   : > { %v6577_v20 = vpop.f32.mrf.mxu1 }
 0x8f4   : > { %v2955_v26 = vadd.f32 %v6577_v20, %v9810_v12  ;;  %v3036_v12 = vmax.f32 %v2952_v38, 0.0 }
 0x8f5   : > { %v2946_v18 = vpop.f32.mrf.mxu1 }
 0x8f6   : > { %v3037_v25 = vmax.f32 %v2955_v26, 0.0  ;;  %v2947_v21 = vadd.f32 %v2946_v18, %v9815_v19 }
 0x8f7   : > { %v8685_v36 = vpop.f32.mrf.mxu1 }
 0x8f8   : > { %v3061_v26 = vpack.c.bf16 %v3037_v25, %v3036_v12 }
 0x8f9   : > { %v8687_v23 = vpop.f32.mrf.mxu1 }
 0x8fb   : > { %v8689_v34 = vpop.f32.mrf.mxu1 }
 0x8fd   : > { %v8691_v7 = vpop.f32.mrf.mxu1 }
 0x8ff   : > { %v6584_v48 = vpop.f32.mrf.mxu1 }
 0x901   : > { %v2975_v51 = vpop.f32.mrf.mxu1 }
 0x903   : > { %v6585_v24 = vpop.f32.mrf.mxu1 }
 0x904   : > { %v2987_v25 = vadd.f32 %v6585_v24, %v8041_v5  ;;  %v9817_v24 = vld [vmem:[#allocation42_spill] sm:$0xff] }
 0x905   : > { %v2978_v43 = vpop.f32.mrf.mxu1 }
 0x907   : > { %v6588_v10 = vpop.f32.mrf.mxu1 }
 0x908   : > { %v3000_v59 = vadd.f32 %v6588_v10, %v8000_v45 }
 0x909   : > { %v2991_v47 = vpop.f32.mrf.mxu1 }
 0x90a   : > { %v3048_v38 = vmax.f32 %v3000_v59, 0.0 }
 0x90b   : > { %v6589_v50 = vpop.f32.mrf.mxu1 }
 0x90c   : > { %v3003_v17 = vadd.f32 %v6589_v50, %v7997_v27 }
 0x90d   : > { %v2994_v35 = vpop.f32.mrf.mxu1 }
 0x90e   : > { %v3049_v18 = vmax.f32 %v3003_v17, 0.0  ;;  %v2995_v19 = vadd.f32 %v2994_v35, %v8024_v30  ;;  %v9816_v35 = vld [vmem:[#allocation41_spill] sm:$0xff] }
 0x90f   : > { %v6592_v61 = vpop.f32.mrf.mxu1  ;;  %v2979_v12 = vadd.f32 %v2978_v43, %v9816_v35  ;;  %v9821_v43 = vld [vmem:[#allocation45_spill] sm:$0xff] }
 0x910   : > { %v3016_v41 = vadd.f32 %v6592_v61, %v9811_v33  ;;  %v2944_v61 = vadd.f32 %v2943_v16, %v8013_v22  ;;  %v3047_v17 = vmax.f32 %v2995_v19, 0.0  ;;  %v9818_v19 = vld [vmem:[#allocation43_spill] sm:$0xff] }
 0x911   : > { %v3007_v31 = vpop.f32.mrf.mxu1 }
 0x912   : > { %v3008_v13 = vadd.f32 %v3007_v31, %v9813_v28  ;;  %v3052_v2 = vmax.f32 %v3016_v41, 0.0  ;;  %v2992_v41 = vadd.f32 %v2991_v47, %v8030_v49  ;;  %v3045_v47 = vmax.f32 %v2987_v25, 0.0 }
 0x913   : > { %v6593_v15 = vpop.f32.mrf.mxu1 }
 0x914   : > { %v3019_v44 = vadd.f32 %v6593_v15, %v9814_v14  ;;  %v3050_v0 = vmax.f32 %v3008_v13, 0.0  ;;  %v2939_v15 = vadd.f32 %v6573_v42, %v8009_v29  ;;  %v3035_v14 = vmax.f32 %v2947_v21, 0.0 }
 0x915   : > { %v3010_v60 = vpop.f32.mrf.mxu1  ;;  %v3067_v21 = vpack.c.bf16 %v3049_v18, %v3048_v38  ;;  %v9820_v18 = vld [vmem:[#allocation46_spill] sm:$0xff] }
 0x916   : > { %v3053_v1 = vmax.f32 %v3019_v44, 0.0  ;;  %v3011_v20 = vadd.f32 %v3010_v60, %v8003_v57  ;;  %v2936_v44 = vadd.f32 %v6572_v8, %v8020_v62  ;;  %v3034_v60 = vmax.f32 %v2944_v61, 0.0 }
 0x917   : > { %v3033_v13 = vmax.f32 %v2939_v15, 0.0  ;;  %v3046_v8 = vmax.f32 %v2992_v41, 0.0  ;;  %v2976_v61 = vadd.f32 %v2975_v51, %v9817_v24  ;;  %v9822_v41 = vld [vmem:[#allocation47_spill] sm:$0xff] }
 0x918   : > { %v3069_v33 = vpack.c.bf16 %v3053_v1, %v3052_v2  ;;  %v3051_v31 = vmax.f32 %v3011_v20, 0.0  ;;  %v2931_v2 = vadd.f32 %v2930_v58, %v8035_v9  ;;  %v3060_v1 = vpack.c.bf16 %v3035_v14, %v3034_v60 }
 0x919   : > { %v3032_v42 = vmax.f32 %v2936_v44, 0.0  ;;  %v3066_v20 = vpack.c.bf16 %v3047_v17, %v3046_v8  ;;  %v2968_v44 = vadd.f32 %v8685_v36, %v9821_v43  ;;  %v3042_v60 = vmax.f32 %v2976_v61, 0.0  ;;  %v7156_v61 = vld [vmem:[%s7879_s14 + $0x54] ss:$8 sps:$4 sm:$0xff]  }
 0x91a   : > { %v3068_v50 = vpack.c.bf16 %v3051_v31, %v3050_v0  ;;  %6044 = vmatprep.subr.bf16.mxu0 %v3069_v33  ;;  %v2928_v0 = vadd.f32 %v2927_v39, %v8050_v52  ;;  %v2984_v33 = vadd.f32 %v6584_v48, %v8045_v4  ;;  %v3031_v10 = vmax.f32 %v2931_v2, 0.0  ;;  %v9819_v31 = vld [vmem:[#allocation44_spill] sm:$0xff] }
 0x91b   : > { %6045 = vmatpush3.bf16.msra.mxu0 %v3061_v26  ;;  %v3059_v16 = vpack.c.bf16 %v3033_v13, %v3032_v42  ;;  %v2915_v39 = vadd.f32 %v8681_v3, %v9818_v19  ;;  %v2971_v48 = vadd.f32 %v8689_v34, %v9819_v31  ;;  %v3043_v26 = vmax.f32 %v2979_v12, 0.0  ;;  %v7151_v12 = vld [vmem:[%s7879_s14 + $0x20] ss:$8 sps:$4 sm:$0xff]  }
 0x91c   : > { %6046 = vmatprep.subr.bf16.mxu0 %v3068_v50  ;;  %v3030_v58 = vmax.f32 %v2928_v0, 0.0  ;;  %v3044_v14 = vmax.f32 %v2984_v33, 0.0  ;;  %v2912_v50 = vadd.f32 %v8677_v37, %v9820_v18  ;;  %v2963_v3 = vadd.f32 %v8691_v7, %v9822_v41  ;;  %v9824_v37 = vld [vmem:[#allocation49_spill] sm:$0xff]  ;;  %v9825_v0 = vld [vmem:[#allocation50_spill] sm:$0xff] }
 0x91d   : > { %v3027_v51 = vmax.f32 %v2915_v39, 0.0  ;;  %v3041_v38 = vmax.f32 %v2971_v48, 0.0  ;;  %v3064_v13 = vpack.c.bf16 %v3043_v26, %v3042_v60  ;;  %v3040_v34 = vmax.f32 %v2968_v44, 0.0  ;;  %v7157_v39 = vld [vmem:[%s7879_s14 + $0x50] ss:$8 sps:$4 sm:$0xff]   ;;  %v6989_v60 = vld [vmem:[%s9621_s6 + $0x48] sm:$0xff]  }
 0x91e   : > { %v3058_v59 = vpack.c.bf16 %v3031_v10, %v3030_v58  ;;  %v3065_v15 = vpack.c.bf16 %v3045_v47, %v3044_v14  ;;  %v3026_v2 = vmax.f32 %v2912_v50, 0.0  ;;  %v2899_v36 = vadd.f32 %v8673_v11, %v9824_v37  ;;  %v7149_v10 = vld [vmem:[%s7879_s14 + $0x10] ss:$8 sps:$4 sm:$0xff]   ;;  %v7150_v47 = vld [vmem:[%s7879_s14 + $0x24] ss:$8 sps:$4 sm:$0xff]  }
 0x91f   : > { %6047 = vmatpush3.bf16.msra.mxu0 %v3060_v1  ;;  %v9823_v1 = vld [vmem:[#allocation48_spill] sm:$0xff]  ;;  %v3063_v17 = vpack.c.bf16 %v3041_v38, %v3040_v34  ;;  %v3039_v42 = vmax.f32 %v2963_v3, 0.0  ;;  %v2896_v7 = vadd.f32 %v8669_v46, %v9825_v0  ;;  %v7154_v58 = vld [vmem:[%s7879_s14 + $0x44] ss:$8 sps:$4 sm:$0xff]   ;;  %v7155_v14 = vld [vmem:[%s7879_s14 + $0x40] ss:$8 sps:$4 sm:$0xff]  }
 0x920   : > { %6048 = vmatprep.subr.bf16.mxu0 %v3067_v21  ;;  %v2960_v25 = vadd.f32 %v8687_v23, %v9823_v1  ;;  %v3056_v21 = vpack.c.bf16 %v3027_v51, %v3026_v2  ;;  %v3023_v33 = vmax.f32 %v2899_v36, 0.0  ;;  %v7148_v46 = vld [vmem:[%s7879_s14 + $0x14] ss:$8 sps:$4 sm:$0xff]   ;;  %v7159_v48 = vld [vmem:[%s7879_s14 + $0x60] ss:$8 sps:$4 sm:$0xff]  }
 0x921   : > { %v3022_v8 = vmax.f32 %v2896_v7, 0.0  ;;  %v7161_v26 = vld [vmem:[%s7879_s14 + $0x70] ss:$8 sps:$4 sm:$0xff]   ;;  %v6990_v51 = vld [vmem:[%s9621_s6 + $0x40] sm:$0xff]  }
 0x922   : > { %v6987_v50 = vld [vmem:[%s9621_s6 + $0x58] sm:$0xff]   ;;  %v6988_v44 = vld [vmem:[%s9621_s6 + $0x50] sm:$0xff]  }
 0x923   : > { %6049 = vmatpush3.bf16.msra.mxu0 %v3059_v16  ;;  %v3054_v11 = vpack.c.bf16 %v3023_v33, %v3022_v8  ;;  %v7147_v16 = vld [vmem:[%s7879_s14] ss:$8 sps:$4 sm:$0xff]   ;;  %6594 = vmatprep.subr.bf16.mxu1 %v6987_v50  ;;  %v6991_v38 = vld [vmem:[%s9621_s6 + $0x78] sm:$0xff]  }
 0x924   : > { %6050 = vmatprep.subr.bf16.mxu0 %v3066_v20  ;;  %v7153_v20 = vld [vmem:[%s7879_s14 + $0x30] ss:$8 sps:$4 sm:$0xff]   ;;  %6595 = vmatpush3.bf16.msra.mxu1 %v6987_v50 }
 0x925   : > { %6596 = vmatprep.subr.bf16.mxu1 %v6988_v44  ;;  %v9826_v50 = vld [vmem:[#allocation11_spill] sm:$0xff] }
 0x927   : > { %6051 = vmatpush3.bf16.msra.mxu0 %v3058_v59  ;;  %v7158_v59 = vld [vmem:[%s7879_s14 + $0x64] ss:$8 sps:$4 sm:$0xff]  }
 0x928   : > { %6052 = vmatprep.subr.bf16.mxu0 %v3065_v15  ;;  %v7160_v15 = vld [vmem:[%s7879_s14 + $0x74] ss:$8 sps:$4 sm:$0xff]   ;;  %6597 = vmatpush3.bf16.msra.mxu1 %v6988_v44 }
 0x929   : > { %6598 = vmatprep.subr.bf16.mxu1 %v6989_v60 }
 0x92b   : > { %6053 = vmatpush3.bf16.msra.mxu0 %v8683_v54  ;;  %v3038_v54 = vmax.f32 %v2960_v25, 0.0 }
 0x92c   : > { %6054 = vmatprep.subr.bf16.mxu0 %v3064_v13  ;;  %6599 = vmatpush3.bf16.msra.mxu1 %v6989_v60  ;;  %v9827_v60 = vld [vmem:[#allocation10_spill] sm:$0xff] }
 0x92d   : > { %v3062_v23 = vpack.c.bf16 %v3039_v42, %v3038_v54  ;;  %6600 = vmatprep.subr.bf16.mxu1 %v6990_v51 }
 0x92f   : > { %6055 = vmatpush3.bf16.msra.mxu0 %v3056_v21 }
 0x930   : > { %6056 = vmatprep.subr.bf16.mxu0 %v3063_v17  ;;  %6601 = vmatpush3.bf16.msra.mxu1 %v6990_v51 }
 0x933   : > { %6057 = vmatpush3.bf16.msra.mxu0 %v8675_v6  ;;  %v7152_v6 = vld [vmem:[%s7879_s14 + $0x34] ss:$8 sps:$4 sm:$0xff]  }
 0x934   : > { %6058 = vmatprep.subr.bf16.mxu0 %v3062_v23 }
 0x937   : > { %6059 = vmatpush3.bf16.msra.mxu0 %v3054_v11 }
 0x938   : > { %6618 = vmatprep.subr.bf16.mxu0 %v6991_v38 }
 0x93a   : > { %3103 = vmatmul.mubr.bf16.vlgmr.msra.gmra.mxu0 %v7147_v16 }
 0x93b   : > { %3110 = vmatprep.mubr.bf16.mxu0 %v7148_v46  ;;  %6619 = vmatpush3.bf16.msra.mxu0 %v6991_v38 }
 0x942   : > { %3111 = vmatmul.mubr.bf16.gmra.mxu0 %v7149_v10 }
 0x943   : > { %3118 = vmatprep.mubr.bf16.mxu0 %v7150_v47 }
 0x94a   : > { %3119 = vmatmul.mubr.bf16.gmra.mxu0 %v7151_v12 }
 0x94b   : > { %3126 = vmatprep.mubr.bf16.mxu0 %v7152_v6 }
 0x952   : > { %3127 = vmatmul.mubr.bf16.gmra.mxu0 %v7153_v20 }
 0x953   : > { %3134 = vmatprep.mubr.bf16.mxu0 %v7154_v58 }
 0x95a   : > { %3135 = vmatmul.mubr.bf16.gmra.mxu0 %v7155_v14 }
 0x95b   : > { %3142 = vmatprep.mubr.bf16.mxu0 %v7156_v61 }
 0x962   : > { %3143 = vmatmul.mubr.bf16.gmra.mxu0 %v7157_v39 }
 0x963   : > { %3150 = vmatprep.mubr.bf16.mxu0 %v7158_v59 }
 0x96a   : > { %3151 = vmatmul.mubr.bf16.gmra.mxu0 %v7159_v48 }
 0x96b   : > { %3158 = vmatprep.mubr.bf16.mxu0 %v7160_v15 }
 0x972   : > { %3159 = vmatmul.mubr.bf16.gmra.mxu0 %v7161_v26 }
 0x9fa   : > { %v6060_v3 = vpop.f32.mrf.mxu0 }
 0x9fc   : > { %v6061_v13 = vpop.f32.mrf.mxu0 }
 0x9fd   : > { %v6062_v34 = vadd.f32 %v6061_v13, %v6060_v3 }
 0x9fe   : > { %v6063_v2 = vpop.f32.mrf.mxu0 }
 0x9ff   : > { %v3167_v17 = vadd.f32 %v6062_v34, %v8647_v40 }
 0xa00   : > { %v6064_v25 = vpop.f32.mrf.mxu0 }
 0xa01   : > { %v6065_v36 = vadd.f32 %v6064_v25, %v6063_v2  ;;  %v9828_v25 = vld [vmem:[#allocation13_spill] sm:$0xff] }
 0xa02   : > { %v6066_v21 = vpop.f32.mrf.mxu0 }
 0xa03   : > { %v3168_v42 = vadd.f32 %v6065_v36, %v8650_v56 }
 0xa04   : > { %v6067_v7 = vpop.f32.mrf.mxu0 }
 0xa05   : > { %v3183_v54 = vpack.c.bf16 %v3168_v42, %v3167_v17  ;;  %v6068_v23 = vadd.f32 %v6067_v7, %v6066_v21  ;;  %v9829_v21 = vld [vmem:[#allocation12_spill] sm:$0xff] }
 0xa06   : > { %v6069_v33 = vpop.f32.mrf.mxu0 }
 0xa07   : > { %6602 = vmatprep.mubr.msk.bf16.mxu1 %vm1059_vm1, %v3183_v54  ;;  %v3169_v46 = vadd.f32 %v6068_v23, %v8635_v55 }
 0xa08   : > { %v6070_v8 = vpop.f32.mrf.mxu0 }
 0xa09   : > { %v6071_v11 = vadd.f32 %v6070_v8, %v6069_v33 }
 0xa0a   : > { %v6072_v16 = vpop.f32.mrf.mxu0 }
 0xa0b   : > { %v3170_v10 = vadd.f32 %v6071_v11, %v8640_v53 }
 0xa0c   : > { %v6073_v47 = vpop.f32.mrf.mxu0 }
 0xa0d   : > { %v3184_v12 = vpack.c.bf16 %v3170_v10, %v3169_v46  ;;  %v6074_v20 = vadd.f32 %v6073_v47, %v6072_v16  ;;  %v9830_v16 = vld [vmem:[#allocation15_spill] sm:$0xff]  ;;  %v9831_v10 = vld [vmem:[#allocation16_spill] sm:$0xff] }
 0xa0e   : > { %v6075_v6 = vpop.f32.mrf.mxu0 }
 0xa0f   : > { %6603 = vmatmul.mubr.msk.bf16.vlgmr.msra.gmra.mxu1 %vm1059_vm1, %v3184_v12  ;;  %v3171_v14 = vadd.f32 %v6074_v20, %v8623_v32 }
 0xa10   : > { %v6076_v40 = vpop.f32.mrf.mxu0 }
 0xa11   : > { %v6077_v56 = vadd.f32 %v6076_v40, %v6075_v6 }
 0xa12   : > { %v6078_v58 = vpop.f32.mrf.mxu0 }
 0xa13   : > { %v3172_v61 = vadd.f32 %v6077_v56, %v8628_v63 }
 0xa14   : > { %v6079_v39 = vpop.f32.mrf.mxu0 }
 0xa15   : > { %v3185_v59 = vpack.c.bf16 %v3172_v61, %v3171_v14  ;;  %v6080_v15 = vadd.f32 %v6079_v39, %v6078_v58  ;;  %v9832_v61 = vld [vmem:[#allocation17_spill] sm:$0xff] }
 0xa16   : > { %v6081_v48 = vpop.f32.mrf.mxu0 }
 0xa17   : > { %6606 = vmatprep.mubr.msk.bf16.mxu1 %vm1059_vm1, %v3185_v59  ;;  %v3173_v44 = vadd.f32 %v6080_v15, %v9826_v50  ;;  %v9833_v59 = vld [vmem:[#allocation14_spill] sm:$0xff] }
 0xa18   : > { %v6082_v55 = vpop.f32.mrf.mxu0 }
 0xa19   : > { %v6083_v53 = vadd.f32 %v6082_v55, %v6081_v48 }
 0xa1a   : > { %v6084_v26 = vpop.f32.mrf.mxu0 }
 0xa1b   : > { %v3174_v51 = vadd.f32 %v6083_v53, %v9827_v60  ;;  %v9834_v60 = vld [vmem:[#allocation18_spill] sm:$0xff] }
 0xa1c   : > { %v6085_v38 = vpop.f32.mrf.mxu0 }
 0xa1d   : > { %v3186_v3 = vpack.c.bf16 %v3174_v51, %v3173_v44  ;;  %v6086_v2 = vadd.f32 %v6085_v38, %v6084_v26  ;;  %v9835_v38 = vld [vmem:[#allocation19_spill] sm:$0xff] }
 0xa1e   : > { %v6087_v13 = vpop.f32.mrf.mxu0 }
 0xa1f   : > { %6607 = vmatmul.mubr.msk.bf16.gmra.mxu1 %vm1059_vm1, %v3186_v3  ;;  %v3175_v36 = vadd.f32 %v6086_v2, %v9828_v25  ;;  %v6992_v2 = vld [vmem:[%s9621_s6 + $0x70] sm:$0xff]  }
 0xa20   : > { %v6088_v32 = vpop.f32.mrf.mxu0  ;;  %6620 = vmatprep.subr.bf16.mxu0 %v6992_v2 }
 0xa21   : > { %v6089_v63 = vadd.f32 %v6088_v32, %v6087_v13  ;;  %6621 = vmatpush3.bf16.msra.mxu0 %v6992_v2  ;;  %v6993_v32 = vld [vmem:[%s9621_s6 + $0x68] sm:$0xff]  }
 0xa22   : > { %v6090_v34 = vpop.f32.mrf.mxu0  ;;  %6622 = vmatprep.subr.bf16.mxu0 %v6993_v32 }
 0xa23   : > { %v3176_v17 = vadd.f32 %v6089_v63, %v9829_v21  ;;  %v6994_v63 = vld [vmem:[%s9621_s6 + $0x60] sm:$0xff]  }
 0xa24   : > { %v6091_v42 = vpop.f32.mrf.mxu0  ;;  %v9837_v21 = vld [vmem:[#allocation21_spill] sm:$0xff] }
 0xa25   : > { %v3187_v7 = vpack.c.bf16 %v3176_v17, %v3175_v36  ;;  %v6092_v33 = vadd.f32 %v6091_v42, %v6090_v34  ;;  %6623 = vmatpush3.bf16.msra.mxu0 %v6993_v32  ;;  %v6995_v34 = vld [vmem:[%s9622_s7 + $0x38] sm:$0xff]   ;;  %v9836_v36 = vld [vmem:[#allocation27_spill] sm:$0xff] }
 0xa26   : > { %v6093_v54 = vpop.f32.mrf.mxu0  ;;  %6624 = vmatprep.subr.bf16.mxu0 %v6994_v63  ;;  %6642 = vmatprep.subr.bf16.mxu1 %v6995_v34  ;;  %v3203_v17 = vrot.slane %v9837_v21, %v9836_v36 }
 0xa27   : > { %6610 = vmatprep.mubr.msk.bf16.mxu1 %vm1059_vm1, %v3187_v7  ;;  %v3177_v46 = vadd.f32 %v6092_v33, %v9830_v16  ;;  %6643 = vmatpush3.bf16.msra.mxu1 %v6995_v34 }
 0xa28   : > { %v6094_v23 = vpop.f32.mrf.mxu0 }
 0xa29   : > { %v6095_v8 = vadd.f32 %v6094_v23, %v6093_v54  ;;  %6625 = vmatpush3.bf16.msra.mxu0 %v6994_v63 }
 0xa2a   : > { %v6096_v11 = vpop.f32.mrf.mxu0 }
 0xa2b   : > { %v3178_v47 = vadd.f32 %v6095_v8, %v9831_v10 }
 0xa2c   : > { %v6097_v12 = vpop.f32.mrf.mxu0 }
 0xa2d   : > { %v3188_v6 = vpack.c.bf16 %v3178_v47, %v3177_v46  ;;  %v6098_v40 = vadd.f32 %v6097_v12, %v6096_v11 }
 0xa2e   : > { %v6099_v20 = vpop.f32.mrf.mxu0 }
 0xa2f   : > { %6611 = vmatmul.mubr.msk.bf16.gmra.mxu1 %vm1059_vm1, %v3188_v6  ;;  %v3179_v39 = vadd.f32 %v6098_v40, %v9832_v61 }
 0xa30   : > { %v6100_v56 = vpop.f32.mrf.mxu0 }
 0xa31   : > { %v6101_v58 = vadd.f32 %v6100_v56, %v6099_v20 }
 0xa32   : > { %v6102_v14 = vpop.f32.mrf.mxu0 }
 0xa33   : > { %v3180_v48 = vadd.f32 %v6101_v58, %v9833_v59 }
 0xa34   : > { %v6103_v15 = vpop.f32.mrf.mxu0 }
 0xa35   : > { %v3189_v55 = vpack.c.bf16 %v3180_v48, %v3179_v39  ;;  %v6104_v26 = vadd.f32 %v6103_v15, %v6102_v14 }
 0xa36   : > { %v6105_v53 = vpop.f32.mrf.mxu0 }
 0xa37   : > { %6614 = vmatprep.mubr.msk.bf16.mxu1 %vm1059_vm1, %v3189_v55  ;;  %v3181_v51 = vadd.f32 %v6104_v26, %v9834_v60 }
 0xa38   : > { %v6106_v50 = vpop.f32.mrf.mxu0 }
 0xa39   : > { %v6107_v44 = vadd.f32 %v6106_v50, %v6105_v53 }
 0xa3b   : > { %v3182_v3 = vadd.f32 %v6107_v44, %v9835_v38 }
 0xa3d   : > { %v3190_v13 = vpack.c.bf16 %v3182_v3, %v3181_v51 }
 0xa3f   : > { %6615 = vmatmul.mubr.msk.bf16.gmra.mxu1 %vm1059_vm1, %v3190_v13 }
 0xacf   : > { %v6604_v25 = vpop.f32.mrf.mxu1 }
 0xad0   : > { %v3295_v23 = vadd.f32 %v6604_v25, %v3203_v17 }
 0xad1   : > { %v3286_v42 = vpop.f32.mrf.mxu1 }
 0xad2   : > { %v3287_v54 = vadd.f32 %v3286_v42, %v3203_v17  ;;  %v3351_v47 = vmax.f32 %v3295_v23, 0.0 }
 0xad3   : > { %v6605_v7 = vpop.f32.mrf.mxu1 }
 0xad4   : > { %v3298_v33 = vadd.f32 %v6605_v7, %v3203_v17  ;;  %v3349_v46 = vmax.f32 %v3287_v54, 0.0 }
 0xad5   : > { %v3289_v8 = vpop.f32.mrf.mxu1 }
 0xad6   : > { %v3290_v11 = vadd.f32 %v3289_v8, %v3203_v17  ;;  %v3352_v16 = vmax.f32 %v3298_v33, 0.0 }
 0xad8   : > { %v3350_v10 = vmax.f32 %v3290_v11, 0.0  ;;  %v3366_v6 = vpack.c.bf16 %v3352_v16, %v3351_v47 }
 0xada   : > { %v3365_v12 = vpack.c.bf16 %v3350_v10, %v3349_v46 }
 0xadc   : > { %6626 = vmatprep.mubr.msk.bf16.mxu0 %vm1059_vm1, %v3365_v12 }
 0xadd   : > { %6627 = vmatmul.mubr.msk.bf16.vlgmr.msra.gmra.mxu0 %vm1059_vm1, %v3366_v6 }
 0xadf   : > { %v6608_v20 = vpop.f32.mrf.mxu1 }
 0xae0   : > { %v3311_v61 = vadd.f32 %v6608_v20, %v3203_v17 }
 0xae1   : > { %v3302_v40 = vpop.f32.mrf.mxu1 }
 0xae2   : > { %v3303_v58 = vadd.f32 %v3302_v40, %v3203_v17  ;;  %v3355_v53 = vmax.f32 %v3311_v61, 0.0  ;;  %v6998_v61 = vld [vmem:[%s9622_s7 + $0x20] sm:$0xff]  }
 0xae3   : > { %v6609_v56 = vpop.f32.mrf.mxu1 }
 0xae4   : > { %v3314_v14 = vadd.f32 %v6609_v56, %v3203_v17  ;;  %v3353_v15 = vmax.f32 %v3303_v58, 0.0 }
 0xae5   : > { %v3305_v39 = vpop.f32.mrf.mxu1 }
 0xae6   : > { %v3306_v59 = vadd.f32 %v3305_v39, %v3203_v17  ;;  %v3356_v48 = vmax.f32 %v3314_v14, 0.0  ;;  %v6996_v14 = vld [vmem:[%s9622_s7 + $0x30] sm:$0xff]   ;;  %v2568_v39 = vrot.slane %v9837_v21, 1 }
 0xae7   : > { %6644 = vmatprep.subr.bf16.mxu1 %v6996_v14 }
 0xae8   : > { %v3354_v55 = vmax.f32 %v3306_v59, 0.0  ;;  %v3368_v50 = vpack.c.bf16 %v3356_v48, %v3355_v53  ;;  %6645 = vmatpush3.bf16.msra.mxu1 %v6996_v14  ;;  %v6999_v59 = vld [vmem:[%s9623_s8 + $0x78] sm:$0xff]   ;;  %v7000_v48 = vld [vmem:[%s9623_s8 + $0x70] sm:$0xff]   ;;  %2569 = vrot.lane.b32.xlu1 %v2568_v39, %s7259_s15 }
 0xae9   : > { %6666 = vmatprep.subr.bf16.mxu0 %v6999_v59  ;;  %v7003_v53 = vld [vmem:[%s9623_s8 + $0x58] sm:$0xff]  }
 0xaea   : > { %v3367_v26 = vpack.c.bf16 %v3354_v55, %v3353_v15  ;;  %6667 = vmatpush3.bf16.msra.mxu0 %v6999_v59  ;;  %v7001_v15 = vld [vmem:[%s9623_s8 + $0x68] sm:$0xff]   ;;  %v7002_v55 = vld [vmem:[%s9623_s8 + $0x60] sm:$0xff]  }
 0xaeb   : > { %6668 = vmatprep.subr.bf16.mxu0 %v7000_v48 }
 0xaec   : > { %6630 = vmatprep.mubr.msk.bf16.mxu0 %vm1059_vm1, %v3367_v26 }
 0xaed   : > { %6631 = vmatmul.mubr.msk.bf16.gmra.mxu0 %vm1059_vm1, %v3368_v50 }
 0xaee   : > { %6669 = vmatpush3.bf16.msra.mxu0 %v7000_v48 }
 0xaef   : > { %v6612_v44 = vpop.f32.mrf.mxu1  ;;  %6670 = vmatprep.subr.bf16.mxu0 %v7001_v15 }
 0xaf0   : > { %v3327_v13 = vadd.f32 %v6612_v44, %v3203_v17  ;;  %v9838_v44 = vld [vmem:[#allocation22_spill] sm:$0xff] }
 0xaf1   : > { %v3318_v60 = vpop.f32.mrf.mxu1 }
 0xaf2   : > { %v3319_v38 = vadd.f32 %v3318_v60, %v3203_v17  ;;  %v3359_v42 = vmax.f32 %v3327_v13, 0.0  ;;  %6671 = vmatpush3.bf16.msra.mxu0 %v7001_v15  ;;  %v3385_v60 = vrot.slane %v9837_v21, %v9838_v44 }
 0xaf3   : > { %v6613_v51 = vpop.f32.mrf.mxu1  ;;  %6672 = vmatprep.subr.bf16.mxu0 %v7002_v55 }
 0xaf4   : > { %v3330_v3 = vadd.f32 %v6613_v51, %v3203_v17  ;;  %v3357_v34 = vmax.f32 %v3319_v38, 0.0 }
 0xaf5   : > { %v3321_v2 = vpop.f32.mrf.mxu1 }
 0xaf6   : > { %v3322_v32 = vadd.f32 %v3321_v2, %v3203_v17  ;;  %v3360_v63 = vmax.f32 %v3330_v3, 0.0  ;;  %6673 = vmatpush3.bf16.msra.mxu0 %v7002_v55 }
 0xaf7   : > { %6674 = vmatprep.subr.bf16.mxu0 %v7003_v53 }
 0xaf8   : > { %v3358_v25 = vmax.f32 %v3322_v32, 0.0  ;;  %v3370_v54 = vpack.c.bf16 %v3360_v63, %v3359_v42 }
 0xafa   : > { %v3369_v7 = vpack.c.bf16 %v3358_v25, %v3357_v34  ;;  %6675 = vmatpush3.bf16.msra.mxu0 %v7003_v53 }
 0xafc   : > { %6634 = vmatprep.mubr.msk.bf16.mxu0 %vm1059_vm1, %v3369_v7 }
 0xafd   : > { %6635 = vmatmul.mubr.msk.bf16.gmra.mxu0 %vm1059_vm1, %v3370_v54 }
 0xaff   : > { %v6616_v33 = vpop.f32.mrf.mxu1 }
 0xb00   : > { %v3343_v46 = vadd.f32 %v6616_v33, %v3203_v17 }
 0xb01   : > { %v3334_v23 = vpop.f32.mrf.mxu1 }
 0xb02   : > { %v3335_v11 = vadd.f32 %v3334_v23, %v3203_v17  ;;  %v3363_v40 = vmax.f32 %v3343_v46, 0.0 }
 0xb03   : > { %v6617_v8 = vpop.f32.mrf.mxu1 }
 0xb04   : > { %v3346_v16 = vadd.f32 %v6617_v8, %v3203_v17  ;;  %v3361_v6 = vmax.f32 %v3335_v11, 0.0 }
 0xb05   : > { %v3337_v10 = vpop.f32.mrf.mxu1 }
 0xb06   : > { %v3338_v47 = vadd.f32 %v3337_v10, %v3203_v17  ;;  %v3364_v12 = vmax.f32 %v3346_v16, 0.0  ;;  %v6997_v17 = vld [vmem:[%s9622_s7 + $0x28] sm:$0xff]  }
 0xb07   : > { %6646 = vmatprep.subr.bf16.mxu1 %v6997_v17 }
 0xb08   : > { %v3362_v20 = vmax.f32 %v3338_v47, 0.0  ;;  %v3372_v58 = vpack.c.bf16 %v3364_v12, %v3363_v40  ;;  %6647 = vmatpush3.bf16.msra.mxu1 %v6997_v17 }
 0xb09   : > { %6648 = vmatprep.subr.bf16.mxu1 %v6998_v61 }
 0xb0a   : > { %v3371_v56 = vpack.c.bf16 %v3362_v20, %v3361_v6 }
 0xb0c   : > { %6638 = vmatprep.mubr.msk.bf16.mxu0 %vm1059_vm1, %v3371_v56  ;;  %6649 = vmatpush3.bf16.msra.mxu1 %v6998_v61 }
 0xb0d   : > { %6639 = vmatmul.mubr.msk.bf16.gmra.mxu0 %vm1059_vm1, %v3372_v58 }
 0xb9d   : > { %v6628_v26 = vpop.f32.mrf.mxu0 }
 0xb9e   : > { %v8841_v32 = vadd.f32 %v6628_v26, %v3385_v60 }
 0xb9f   : > { %v3468_v50 = vpop.f32.mrf.mxu0 }
 0xba0   : > { %v8837_v13 = vadd.f32 %v3468_v50, %v3385_v60 }
 0xba1   : > { %v6629_v51 = vpop.f32.mrf.mxu0 }
 0xba2   : > { %v8835_v38 = vadd.f32 %v6629_v51, %v3385_v60  ;;  %v7162_v51 = vld [vmem:[%s7600_s25] sm:$0xff]  }
 0xba3   : > { %v3471_v3 = vpop.f32.mrf.mxu0 }
 0xba4   : > { %v8839_v2 = vadd.f32 %v3471_v3, %v3385_v60  ;;  %v3532_v34 = vpack.c.bf16 %v8835_v38, %v8841_v32  ;;  %v7004_v3 = vld [vmem:[%s9623_s8 + $0x50] sm:$0xff]  }
 0xba5   : > { %6676 = vmatprep.subr.bf16.mxu0 %v7004_v3 }
 0xba6   : > { %v3531_v63 = vpack.c.bf16 %v8839_v2, %v8837_v13  ;;  %6677 = vmatpush3.bf16.msra.mxu0 %v7004_v3 }
 0xba8   : > { %6650 = vmatprep.mubr.msk.bf16.mxu1 %vm1059_vm1, %v3531_v63  ;;  %v7006_v63 = vld [vmem:[%s9623_s8 + $0x40] sm:$0xff]  }
 0xba9   : > { %6651 = vmatmul.mubr.msk.bf16.vlgmr.msra.gmra.mxu1 %vm1059_vm1, %v3532_v34  ;;  %v2570_v34 = vpop.permute.xlu1 %2569 }
 0xbad   : > { %v6632_v21 = vpop.f32.mrf.mxu0 }
 0xbae   : > { %v8855_v8 = vadd.f32 %v6632_v21, %v3385_v60  ;;  %v8904_v21 = vld [vmem:[%s9624_s9 + $0x8] sm:$0x7f] }
 0xbaf   : > { %v3484_v25 = vpop.f32.mrf.mxu0 }
 0xbb0   : > { %v8851_v33 = vadd.f32 %v3484_v25, %v3385_v60  ;;  %v2572_v25 = vsel %vm1059_vm1, %v8904_v21, %v2570_v34 }
 0xbb1   : > { %v6633_v42 = vpop.f32.mrf.mxu0 }
 0xbb2   : > { %v8849_v7 = vadd.f32 %v6633_v42, %v3385_v60 }
 0xbb3   : > { %v3487_v54 = vpop.f32.mrf.mxu0 }
 0xbb4   : > { %v8853_v23 = vadd.f32 %v3487_v54, %v3385_v60  ;;  %v3534_v16 = vpack.c.bf16 %v8849_v7, %v8855_v8  ;;  %v9839_v54 = vld [vmem:[#allocation23_spill] sm:$0xff] }
 0xbb6   : > { %v3533_v11 = vpack.c.bf16 %v8853_v23, %v8851_v33 }
 0xbb8   : > { %6654 = vmatprep.mubr.msk.bf16.mxu1 %vm1059_vm1, %v3533_v11  ;;  %v3551_v11 = vrot.slane %v2572_v25, %v9839_v54 }
 0xbb9   : > { %6655 = vmatmul.mubr.msk.bf16.gmra.mxu1 %vm1059_vm1, %v3534_v16 }
 0xbbd   : > { %v6636_v46 = vpop.f32.mrf.mxu0 }
 0xbbe   : > { %v8869_v56 = vadd.f32 %v6636_v46, %v3385_v60 }
 0xbbf   : > { %v3500_v10 = vpop.f32.mrf.mxu0 }
 0xbc0   : > { %v8865_v20 = vadd.f32 %v3500_v10, %v3385_v60 }
 0xbc1   : > { %v6637_v47 = vpop.f32.mrf.mxu0 }
 0xbc2   : > { %v8863_v12 = vadd.f32 %v6637_v47, %v3385_v60 }
 0xbc3   : > { %v3503_v6 = vpop.f32.mrf.mxu0 }
 0xbc4   : > { %v8867_v40 = vadd.f32 %v3503_v6, %v3385_v60  ;;  %v3536_v14 = vpack.c.bf16 %v8863_v12, %v8869_v56 }
 0xbc6   : > { %v3535_v58 = vpack.c.bf16 %v8867_v40, %v8865_v20 }
 0xbc8   : > { %6658 = vmatprep.mubr.msk.bf16.mxu1 %vm1059_vm1, %v3535_v58 }
 0xbc9   : > { %6659 = vmatmul.mubr.msk.bf16.gmra.mxu1 %vm1059_vm1, %v3536_v14 }
 0xbcd   : > { %v6640_v17 = vpop.f32.mrf.mxu0 }
 0xbce   : > { %v8883_v53 = vadd.f32 %v6640_v17, %v3385_v60 }
 0xbcf   : > { %v3516_v61 = vpop.f32.mrf.mxu0 }
 0xbd0   : > { %v8879_v15 = vadd.f32 %v3516_v61, %v3385_v60 }
 0xbd1   : > { %v6641_v39 = vpop.f32.mrf.mxu0 }
 0xbd2   : > { %v8877_v59 = vadd.f32 %v6641_v39, %v3385_v60 }
 0xbd3   : > { %v3519_v48 = vpop.f32.mrf.mxu0 }
 0xbd4   : > { %v8881_v55 = vadd.f32 %v3519_v48, %v3385_v60  ;;  %v3538_v50 = vpack.c.bf16 %v8877_v59, %v8883_v53  ;;  %v7005_v60 = vld [vmem:[%s9623_s8 + $0x48] sm:$0xff]  }
 0xbd5   : > { %6678 = vmatprep.subr.bf16.mxu0 %v7005_v60 }
 0xbd6   : > { %v3537_v26 = vpack.c.bf16 %v8881_v55, %v8879_v15  ;;  %6679 = vmatpush3.bf16.msra.mxu0 %v7005_v60 }
 0xbd7   : > { %6680 = vmatprep.subr.bf16.mxu0 %v7006_v63 }
 0xbd8   : > { %6662 = vmatprep.mubr.msk.bf16.mxu1 %vm1059_vm1, %v3537_v26 }
 0xbd9   : > { %6663 = vmatmul.mubr.msk.bf16.gmra.mxu1 %vm1059_vm1, %v3538_v50 }
 0xbda   : > { %6714 = vmatprep.mubr.bf16.mxu1 %v7162_v51  ;;  %6681 = vmatpush3.bf16.msra.mxu0 %v7006_v63 }
 0xc69   : > { %v6652_v42 = vpop.f32.mrf.mxu1 }
 0xc6a   : > { %v3643_v6 = vadd.f32 %v6652_v42, %v3551_v11 }
 0xc6b   : > { %v3634_v16 = vpop.f32.mrf.mxu1 }
 0xc6c   : > { %v3635_v10 = vadd.f32 %v3634_v16, %v3551_v11  ;;  %v3699_v48 = vmax.f32 %v3643_v6, 0.0 }
 0xc6d   : > { %v6653_v46 = vpop.f32.mrf.mxu1 }
 0xc6e   : > { %v3646_v47 = vadd.f32 %v6653_v46, %v3551_v11  ;;  %v3697_v61 = vmax.f32 %v3635_v10, 0.0 }
 0xc6f   : > { %v3637_v58 = vpop.f32.mrf.mxu1 }
 0xc70   : > { %v3638_v14 = vadd.f32 %v3637_v58, %v3551_v11  ;;  %v3700_v17 = vmax.f32 %v3646_v47, 0.0 }
 0xc72   : > { %v3698_v39 = vmax.f32 %v3638_v14, 0.0  ;;  %v3714_v50 = vpack.c.bf16 %v3700_v17, %v3699_v48 }
 0xc74   : > { %v3713_v26 = vpack.c.bf16 %v3698_v39, %v3697_v61 }
 0xc76   : > { %6682 = vmatprep.mubr.bf16.mxu0 %v3713_v26 }
 0xc77   : > { %6683 = vmatmul.mubr.bf16.vlgmr.msra.gmra.mxu0 %v3714_v50 }
 0xc79   : > { %v6656_v51 = vpop.f32.mrf.mxu1 }
 0xc7a   : > { %v3659_v25 = vadd.f32 %v6656_v51, %v3551_v11 }
 0xc7b   : > { %v3650_v3 = vpop.f32.mrf.mxu1 }
 0xc7c   : > { %v3651_v63 = vadd.f32 %v3650_v3, %v3551_v11  ;;  %v3703_v58 = vmax.f32 %v3659_v25, 0.0 }
 0xc7d   : > { %v6657_v60 = vpop.f32.mrf.mxu1 }
 0xc7e   : > { %v3662_v34 = vadd.f32 %v6657_v60, %v3551_v11  ;;  %v3701_v42 = vmax.f32 %v3651_v63, 0.0 }
 0xc7f   : > { %v3653_v54 = vpop.f32.mrf.mxu1 }
 0xc80   : > { %v3654_v16 = vadd.f32 %v3653_v54, %v3551_v11  ;;  %v3704_v46 = vmax.f32 %v3662_v34, 0.0 }
 0xc82   : > { %v3702_v44 = vmax.f32 %v3654_v16, 0.0  ;;  %v3716_v10 = vpack.c.bf16 %v3704_v46, %v3703_v58 }
 0xc84   : > { %v3715_v47 = vpack.c.bf16 %v3702_v44, %v3701_v42 }
 0xc86   : > { %6686 = vmatprep.mubr.bf16.mxu0 %v3715_v47 }
 0xc87   : > { %6687 = vmatmul.mubr.bf16.gmra.mxu0 %v3716_v10 }
 0xc89   : > { %v6660_v6 = vpop.f32.mrf.mxu1 }
 0xc8a   : > { %v3675_v48 = vadd.f32 %v6660_v6, %v3551_v11 }
 0xc8b   : > { %v3666_v14 = vpop.f32.mrf.mxu1 }
 0xc8c   : > { %v3667_v61 = vadd.f32 %v3666_v14, %v3551_v11  ;;  %v3707_v54 = vmax.f32 %v3675_v48, 0.0  ;;  %v7164_v48 = vld [vmem:[%s7879_s14 + $0x4] ss:$8 sps:$4 sm:$0xff]  }
 0xc8d   : > { %v6661_v17 = vpop.f32.mrf.mxu1 }
 0xc8e   : > { %v3678_v39 = vadd.f32 %v6661_v17, %v3551_v11  ;;  %v3705_v51 = vmax.f32 %v3667_v61, 0.0 }
 0xc8f   : > { %v3669_v26 = vpop.f32.mrf.mxu1 }
 0xc90   : > { %v3670_v50 = vadd.f32 %v3669_v26, %v3551_v11  ;;  %v3708_v3 = vmax.f32 %v3678_v39, 0.0 }
 0xc92   : > { %v3706_v60 = vmax.f32 %v3670_v50, 0.0  ;;  %v3718_v63 = vpack.c.bf16 %v3708_v3, %v3707_v54  ;;  %v9840_v50 = vld [vmem:[#allocation20_spill] sm:$0xff] }
 0xc93   : > { %v8912_v3 = vrot.slane %v8904_v21, %v9840_v50 }
 0xc94   : > { %v3717_v34 = vpack.c.bf16 %v3706_v60, %v3705_v51 }
 0xc96   : > { %6690 = vmatprep.mubr.bf16.mxu0 %v3717_v34 }
 0xc97   : > { %6691 = vmatmul.mubr.bf16.gmra.mxu0 %v3718_v63 }
 0xc99   : > { %v6664_v44 = vpop.f32.mrf.mxu1 }
 0xc9a   : > { %v3691_v58 = vadd.f32 %v6664_v44, %v3551_v11 }
 0xc9b   : > { %v3682_v25 = vpop.f32.mrf.mxu1 }
 0xc9c   : > { %v3683_v46 = vadd.f32 %v3682_v25, %v3551_v11  ;;  %v3711_v39 = vmax.f32 %v3691_v58, 0.0 }
 0xc9d   : > { %v6665_v16 = vpop.f32.mrf.mxu1 }
 0xc9e   : > { %v3694_v42 = vadd.f32 %v6665_v16, %v3551_v11  ;;  %v3709_v14 = vmax.f32 %v3683_v46, 0.0 }
 0xc9f   : > { %v3685_v47 = vpop.f32.mrf.mxu1 }
 0xca0   : > { %v3686_v10 = vadd.f32 %v3685_v47, %v3551_v11  ;;  %v3712_v6 = vmax.f32 %v3694_v42, 0.0 }
 0xca2   : > { %v3710_v17 = vmax.f32 %v3686_v10, 0.0  ;;  %v3720_v26 = vpack.c.bf16 %v3712_v6, %v3711_v39 }
 0xca4   : > { %v3719_v61 = vpack.c.bf16 %v3710_v17, %v3709_v14 }
 0xca6   : > { %6694 = vmatprep.mubr.bf16.mxu0 %v3719_v61 }
 0xca7   : > { %6695 = vmatmul.mubr.bf16.gmra.mxu0 %v3720_v26 }
 0xca8   : > { %4440 = vmatprep.mubr.bf16.mxu0 %v7164_v48 }
 0xd37   : > { %v6684_v51 = vpop.f32.mrf.mxu0 }
 0xd38   : > { %v8915_v60 = vadd.f32 %v6684_v51, %v8912_v3 }
 0xd39   : > { %v3824_v54 = vpop.f32.mrf.mxu0 }
 0xd3a   : > { %v8918_v11 = vadd.f32 %v3824_v54, %v8912_v3 }
 0xd3b   : > { %v8920_v34 = vpop.f32.mrf.mxu0 }
 0xd3d   : > { %v8922_v63 = vpop.f32.mrf.mxu0 }
 0xd47   : > { %v6688_v44 = vpop.f32.mrf.mxu0 }
 0xd48   : > { %v3849_v25 = vadd.f32 %v6688_v44, %v8912_v3 }
 0xd49   : > { %v3840_v16 = vpop.f32.mrf.mxu0 }
 0xd4a   : > { %v8926_v46 = vadd.f32 %v3849_v25, %v8855_v8  ;;  %v8929_v21 = vadd.f32 %v3840_v16, %v8912_v3 }
 0xd4b   : > { %v6689_v42 = vpop.f32.mrf.mxu0 }
 0xd4c   : > { %v3852_v58 = vadd.f32 %v6689_v42, %v8912_v3  ;;  %v3929_v47 = vsel %vm1059_vm1, %v8926_v46, 0.0  ;;  %v3981_v10 = vmul.f32 %v8926_v46, %v8926_v46 }
 0xd4d   : > { %3930 = vadd.xlane.f32.xlu0 %v3929_v47  ;;  %v3843_v17 = vpop.f32.mrf.mxu0 }
 0xd4e   : > { %v8937_v6 = vadd.f32 %v3852_v58, %v8849_v7  ;;  %v4009_v14 = vsel %vm1059_vm1, %v3981_v10, 0.0 }
 0xd50   : > { %v3932_v8 = vsel %vm1059_vm1, %v8937_v6, 0.0 }
 0xd51   : > { %4010 = vadd.xlane.f32.xlu0 %v4009_v14  ;;  %3933 = vadd.xlane.f32.xlu1 %v3932_v8 }
 0xd57   : > { %v6692_v39 = vpop.f32.mrf.mxu0 }
 0xd58   : > { %v3865_v61 = vadd.f32 %v6692_v39, %v8912_v3 }
 0xd59   : > { %v3856_v26 = vpop.f32.mrf.mxu0 }
 0xd5a   : > { %v8944_v48 = vadd.f32 %v3865_v61, %v8869_v56  ;;  %v3857_v54 = vadd.f32 %v3856_v26, %v8912_v3 }
 0xd5b   : > { %v6693_v51 = vpop.f32.mrf.mxu0 }
 0xd5c   : > { %v3941_v7 = vsel %vm1059_vm1, %v8944_v48, 0.0  ;;  %v3985_v44 = vmul.f32 %v8944_v48, %v8944_v48  ;;  %v8953_v42 = vadd.f32 %v3857_v54, %v8865_v20  ;;  %v3868_v58 = vadd.f32 %v6693_v51, %v8912_v3 }
 0xd5d   : > { %3942 = vadd.xlane.f32.xlu0 %v3941_v7  ;;  %v3859_v25 = vpop.f32.mrf.mxu0 }
 0xd5e   : > { %v3860_v16 = vadd.f32 %v3859_v25, %v8912_v3  ;;  %v4021_v47 = vsel %vm1059_vm1, %v3985_v44, 0.0  ;;  %v8963_v14 = vadd.f32 %v3868_v58, %v8863_v12  ;;  %v3935_v20 = vsel %vm1059_vm1, %v8953_v42, 0.0 }
 0xd5f   : > { %v3983_v61 = vmul.f32 %v8953_v42, %v8953_v42 }
 0xd60   : > { %v8957_v56 = vadd.f32 %v3860_v16, %v8867_v40  ;;  %v3944_v40 = vsel %vm1059_vm1, %v8963_v14, 0.0  ;;  %v3986_v54 = vmul.f32 %v8963_v14, %v8963_v14 }
 0xd61   : > { %4022 = vadd.xlane.f32.xlu0 %v4021_v47  ;;  %v4015_v12 = vsel %vm1059_vm1, %v3983_v61, 0.0  ;;  %v3844_v47 = vadd.f32 %v3843_v17, %v8912_v3 }
 0xd62   : > { %v3984_v10 = vmul.f32 %v8957_v56, %v8957_v56  ;;  %v4024_v58 = vsel %vm1059_vm1, %v3986_v54, 0.0 }
 0xd64   : > { %v4018_v8 = vsel %vm1059_vm1, %v3984_v10, 0.0 }
 0xd65   : > { %4019 = vadd.xlane.f32.xlu1 %v4018_v8  ;;  %3936 = vadd.xlane.f32.xlu0 %v3935_v20  ;;  %v3982_v8 = vmul.f32 %v8937_v6, %v8937_v6 }
 0xd67   : > { %v6696_v39 = vpop.f32.mrf.mxu0 }
 0xd68   : > { %v3881_v25 = vadd.f32 %v6696_v39, %v8912_v3  ;;  %v3938_v39 = vsel %vm1059_vm1, %v8957_v56, 0.0 }
 0xd69   : > { %v3872_v26 = vpop.f32.mrf.mxu0  ;;  %3945 = vadd.xlane.f32.xlu0 %v3944_v40  ;;  %v4012_v40 = vsel %vm1059_vm1, %v3982_v8, 0.0 }
 0xd6a   : > { %v8987_v20 = vadd.f32 %v3881_v25, %v8883_v53  ;;  %v3873_v17 = vadd.f32 %v3872_v26, %v8912_v3  ;;  %v3836_v53 = vadd.f32 %v8920_v34, %v8912_v3 }
 0xd6b   : > { %v6697_v51 = vpop.f32.mrf.mxu0 }
 0xd6c   : > { %v3953_v61 = vsel %vm1059_vm1, %v8987_v20, 0.0  ;;  %v3884_v26 = vadd.f32 %v6697_v51, %v8912_v3  ;;  %v9012_v25 = vadd.f32 %v3836_v53, %v8835_v38  ;;  %v9047_v53 = vadd.f32 %v8929_v21, %v8851_v33 }
 0xd6d   : > { %v3875_v7 = vpop.f32.mrf.mxu0  ;;  %4016 = vadd.xlane.f32.xlu0 %v4015_v12  ;;  %v3989_v12 = vmul.f32 %v8987_v20, %v8987_v20 }
 0xd6e   : > { %v3876_v44 = vadd.f32 %v3875_v7, %v8912_v3  ;;  %v9007_v7 = vadd.f32 %v3873_v17, %v8879_v15  ;;  %v3828_v15 = vadd.f32 %v8922_v63, %v8912_v3  ;;  %v3920_v51 = vsel %vm1059_vm1, %v9012_v25, 0.0 }
 0xd6f   : > { %v3978_v38 = vmul.f32 %v9012_v25, %v9012_v25 }
 0xd70   : > { %v8978_v16 = vadd.f32 %v3876_v44, %v8881_v55  ;;  %v8992_v55 = vadd.f32 %v3844_v47, %v8853_v23  ;;  %v4033_v44 = vsel %vm1059_vm1, %v3989_v12, 0.0  ;;  %v3947_v47 = vsel %vm1059_vm1, %v9007_v7, 0.0 }
 0xd71   : > { %4025 = vadd.xlane.f32.xlu0 %v4024_v58  ;;  %v9016_v58 = vadd.f32 %v3884_v26, %v8877_v59  ;;  %v3987_v59 = vmul.f32 %v9007_v7, %v9007_v7  ;;  %v9031_v8 = vadd.f32 %v3828_v15, %v8839_v2  ;;  %v3979_v26 = vmul.f32 %v9047_v53, %v9047_v53 }
 0xd72   : > { %v3950_v10 = vsel %vm1059_vm1, %v8978_v16, 0.0  ;;  %v3926_v54 = vsel %vm1059_vm1, %v8992_v55, 0.0  ;;  %v3980_v23 = vmul.f32 %v8992_v55, %v8992_v55  ;;  %v3988_v2 = vmul.f32 %v8978_v16, %v8978_v16 }
 0xd73   : > { %3951 = vadd.xlane.f32.xlu1 %v3950_v10  ;;  %v3956_v10 = vsel %vm1059_vm1, %v9016_v58, 0.0  ;;  %v4027_v3 = vsel %vm1059_vm1, %v3987_v59, 0.0  ;;  %v3990_v63 = vmul.f32 %v9016_v58, %v9016_v58  ;;  %v3976_v17 = vmul.f32 %v9031_v8, %v9031_v8 }
 0xd74   : > { %v4006_v34 = vsel %vm1059_vm1, %v3980_v23, 0.0  ;;  %v3923_v23 = vsel %vm1059_vm1, %v9047_v53, 0.0 }
 0xd75   : > { %3939 = vadd.xlane.f32.xlu0 %v3938_v39  ;;  %v4000_v39 = vsel %vm1059_vm1, %v3978_v38, 0.0  ;;  %v3994_v12 = vsel %vm1059_vm1, %v3976_v17, 0.0 }
 0xd77   : > { %4013 = vadd.xlane.f32.xlu1 %v4012_v40  ;;  %v3914_v40 = vsel %vm1059_vm1, %v9031_v8, 0.0 }
 0xd79   : > { %3954 = vadd.xlane.f32.xlu0 %v3953_v61  ;;  %v4036_v61 = vsel %vm1059_vm1, %v3990_v63, 0.0 }
 0xd7b   : > { %3927 = vadd.xlane.f32.xlu1 %v3926_v54  ;;  %v4030_v54 = vsel %vm1059_vm1, %v3988_v2, 0.0 }
 0xd7d   : > { %4034 = vadd.xlane.f32.xlu0 %v4033_v44  ;;  %v9056_v44 = vadd.f32 %v8915_v60, %v8841_v32 }
 0xd7f   : > { %4007 = vadd.xlane.f32.xlu1 %v4006_v34  ;;  %v4003_v34 = vsel %vm1059_vm1, %v3979_v26, 0.0  ;;  %v3917_v33 = vsel %vm1059_vm1, %v9056_v44, 0.0  ;;  %v3977_v21 = vmul.f32 %v9056_v44, %v9056_v44 }
 0xd81   : > { %3948 = vadd.xlane.f32.xlu0 %v3947_v47  ;;  %v9065_v47 = vadd.f32 %v8918_v11, %v8837_v13  ;;  %v3997_v15 = vsel %vm1059_vm1, %v3977_v21, 0.0 }
 0xd83   : > { %3921 = vadd.xlane.f32.xlu1 %v3920_v51  ;;  %v3911_v32 = vsel %vm1059_vm1, %v9065_v47, 0.0  ;;  %v3975_v60 = vmul.f32 %v9065_v47, %v9065_v47 }
 0xd85   : > { %3957 = vadd.xlane.f32.xlu0 %v3956_v10  ;;  %v3991_v51 = vsel %vm1059_vm1, %v3975_v60, 0.0 }
 0xd87   : > { %4001 = vadd.xlane.f32.xlu1 %v4000_v39 }
 0xd89   : > { %4028 = vadd.xlane.f32.xlu0 %v4027_v3 }
 0xd8b   : > { %3915 = vadd.xlane.f32.xlu1 %v3914_v40 }
 0xd8d   : > { %4037 = vadd.xlane.f32.xlu0 %v4036_v61 }
 0xd8f   : > { %3995 = vadd.xlane.f32.xlu1 %v3994_v12 }
 0xd91   : > { %4031 = vadd.xlane.f32.xlu0 %v4030_v54 }
 0xd95   : > { %3924 = vadd.xlane.f32.xlu0 %v3923_v23 }
 0xd99   : > { %4004 = vadd.xlane.f32.xlu0 %v4003_v34 }
 0xd9d   : > { %3918 = vadd.xlane.f32.xlu0 %v3917_v33 }
 0xda1   : > { %3998 = vadd.xlane.f32.xlu0 %v3997_v15 }
 0xda5   : > { %3912 = vadd.xlane.f32.xlu0 %v3911_v32 }
 0xda9   : > { %3992 = vadd.xlane.f32.xlu0 %v3991_v51 }
 0xdd6   : > { %v3931_v38 = vpop.xlane.xlu0 %3930 }
 0xdd7   : > { %v3965_v10 = vmul.f32 0.015625, %v3931_v38 }
 0xdd9   : > { %v4061_v39 = vmul.f32 %v3965_v10, %v3965_v10  ;;  %v4093_v17 = vsub.f32 %v8926_v46, %v3965_v10 }
 0xdda   : > { %v4011_v59 = vpop.xlane.xlu0 %4010  ;;  %v3934_v23 = vpop.xlane.xlu1 %3933 }
 0xddb   : > { %v4045_v3 = vmul.f32 0.015625, %v4011_v59 }
 0xddd   : > { %v4077_v13 = vsub.f32 %v4045_v3, %v4061_v39 }
 0xddf   : > { %v4109_v11 = vadd.f32 1e-05, %v4077_v13 }
 0xde1   : > { %7096 = vrsqrt.f32 %v4109_v11 }
 0xde6   : > { %v3943_v63 = vpop.xlane.xlu0 %3942 }
 0xdea   : > { %v4023_v40 = vpop.xlane.xlu0 %4022 }
 0xdeb   : > { %v4049_v41 = vmul.f32 0.015625, %v4023_v40 }
 0xdee   : > { %v7097_v61 = vpop.eup %7096  ;;  %v3937_v2 = vpop.xlane.xlu0 %3936 }
 0xdef   : > { %v9074_v12 = vmul.f32 %v7097_v61, %v4093_v17  ;;  %v4020_v34 = vpop.xlane.xlu1 %4019  ;;  %v9082_v61 = vmul.f32 0.015625, %v3943_v63 }
 0xdf2   : > { %v3946_v54 = vpop.xlane.xlu0 %3945 }
 0xdf3   : > { %v9078_v46 = vmul.f32 0.015625, %v3946_v54 }
 0xdf5   : > { %v4066_v36 = vmul.f32 %v9078_v46, %v9078_v46 }
 0xdf6   : > { %v4017_v26 = vpop.xlane.xlu0 %4016 }
 0xdfa   : > { %v4026_v33 = vpop.xlane.xlu0 %4025 }
 0xdfb   : > { %v4050_v13 = vmul.f32 0.015625, %v4026_v33  ;;  %v4065_v33 = vmul.f32 %v9082_v61, %v9082_v61 }
 0xdfc   : > { %v3952_v21 = vpop.xlane.xlu1 %3951 }
 0xdfd   : > { %v4082_v54 = vsub.f32 %v4050_v13, %v4066_v36  ;;  %v4048_v36 = vmul.f32 0.015625, %v4020_v34  ;;  %v4047_v13 = vmul.f32 0.015625, %v4017_v26  ;;  %v9104_v5 = vmul.f32 0.015625, %v3952_v21 }
 0xdfe   : > { %v3940_v15 = vpop.xlane.xlu0 %3939 }
 0xdff   : > { %v9088_v1 = vmul.f32 0.015625, %v3940_v15  ;;  %v4114_v4 = vadd.f32 1e-05, %v4082_v54  ;;  %v4068_v21 = vmul.f32 %v9104_v5, %v9104_v5 }
 0xe00   : > { %v4014_v32 = vpop.xlane.xlu1 %4013 }
 0xe01   : > { %v4064_v24 = vmul.f32 %v9088_v1, %v9088_v1 }
 0xe02   : > { %v3955_v60 = vpop.xlane.xlu0 %3954 }
 0xe03   : > { %v9076_v59 = vmul.f32 0.015625, %v3955_v60  ;;  %v4080_v62 = vsub.f32 %v4048_v36, %v4064_v24 }
 0xe04   : > { %v3928_v51 = vpop.xlane.xlu1 %3927 }
 0xe05   : > { %v4069_v11 = vmul.f32 %v9076_v59, %v9076_v59 }
 0xe06   : > { %v4035_v38 = vpop.xlane.xlu0 %4034 }
 0xe07   : > { %v4053_v10 = vmul.f32 0.015625, %v4035_v38  ;;  %v9092_v38 = vmul.f32 0.015625, %v3937_v2 }
 0xe08   : > { %v4008_v3 = vpop.xlane.xlu1 %4007 }
 0xe09   : > { %v4085_v60 = vsub.f32 %v4053_v10, %v4069_v11  ;;  %v4081_v10 = vsub.f32 %v4049_v41, %v4065_v33  ;;  %v9100_v11 = vmul.f32 0.015625, %v3934_v23  ;;  %v4063_v2 = vmul.f32 %v9092_v38, %v9092_v38 }
 0xe0a   : > { %v3949_v39 = vpop.xlane.xlu0 %3948  ;;  %v4112_v33 = vadd.f32 1e-05, %v4080_v62 }
 0xe0b   : > { %v9084_v50 = vmul.f32 0.015625, %v3949_v39  ;;  %v4117_v35 = vadd.f32 1e-05, %v4085_v60  ;;  %v4113_v23 = vadd.f32 1e-05, %v4081_v10  ;;  %v4062_v26 = vmul.f32 %v9100_v11, %v9100_v11 }
 0xe0c   : > { %v3922_v43 = vpop.xlane.xlu1 %3921  ;;  %v4079_v34 = vsub.f32 %v4047_v13, %v4063_v2 }
 0xe0d   : > { %v4067_v63 = vmul.f32 %v9084_v50, %v9084_v50  ;;  %7098 = vrsqrt.f32 %v4117_v35  ;;  %v9112_v35 = vmul.f32 0.015625, %v3928_v51  ;;  %v9118_v62 = vmul.f32 0.015625, %v3922_v43  ;;  %v9129_v43 = vld [vmem:[%s9624_s9 + $0x10] sm:$0x7f] }
 0xe0e   : > { %v3958_v17 = vpop.xlane.xlu0 %3957  ;;  %7100 = vrsqrt.f32 %v4114_v4  ;;  %v4111_v10 = vadd.f32 1e-05, %v4079_v34  ;;  %9841 = vst [vmem:[#allocation8_spill] sm:$0xff] %v9129_v43 }
 0xe0f   : > { %v9098_v15 = vmul.f32 0.015625, %v3958_v17 }
 0xe10   : > { %v4002_v9 = vpop.xlane.xlu1 %4001 }
 0xe11   : > { %v4070_v41 = vmul.f32 %v9098_v15, %v9098_v15 }
 0xe12   : > { %v4029_v31 = vpop.xlane.xlu0 %4028 }
 0xe13   : > { %v4051_v39 = vmul.f32 0.015625, %v4029_v31  ;;  %v4046_v31 = vmul.f32 0.015625, %v4014_v32 }
 0xe15   : > { %v4083_v40 = vsub.f32 %v4051_v39, %v4067_v63  ;;  %v4078_v24 = vsub.f32 %v4046_v31, %v4062_v26  ;;  %v4042_v31 = vmul.f32 0.015625, %v4002_v9  ;;  %v4058_v26 = vmul.f32 %v9118_v62, %v9118_v62 }
 0xe16   : > { %v4038_v52 = vpop.xlane.xlu0 %4037  ;;  %v4101_v9 = vsub.f32 %v8987_v20, %v9076_v59  ;;  %v4099_v20 = vsub.f32 %v9007_v7, %v9084_v50  ;;  %v9843_v7 = vld [vmem:[#allocation7_spill] sm:$0xff] }
 0xe17   : > { %v4115_v49 = vadd.f32 1e-05, %v4083_v40  ;;  %v4054_v17 = vmul.f32 0.015625, %v4038_v52  ;;  %v3916_v52 = vpop.xlane.xlu1 %3915  ;;  %v4044_v40 = vmul.f32 0.015625, %v4008_v3  ;;  %v4110_v2 = vadd.f32 1e-05, %v4078_v24 }
 0xe18   : > { %v9124_v34 = vmul.f32 0.015625, %v3916_v52 }
 0xe19   : > { %v4086_v60 = vsub.f32 %v4054_v17, %v4070_v41  ;;  %7102 = vrsqrt.f32 %v4115_v49  ;;  %v4060_v49 = vmul.f32 %v9112_v35, %v9112_v35 }
 0xe1a   : > { %v4032_v54 = vpop.xlane.xlu0 %4031  ;;  %7104 = vrsqrt.f32 %v4113_v23 }
 0xe1b   : > { %v4052_v32 = vmul.f32 0.015625, %v4032_v54  ;;  %v4118_v63 = vadd.f32 1e-05, %v4086_v60  ;;  %v4076_v51 = vsub.f32 %v4044_v40, %v4060_v49  ;;  %v3996_v17 = vpop.xlane.xlu1 %3995  ;;  %v7099_v60 = vpop.eup %7098  ;;  %v4056_v40 = vmul.f32 %v9124_v34, %v9124_v34 }
 0xe1d   : > { %v4084_v39 = vsub.f32 %v4052_v32, %v4068_v21  ;;  %7106 = vrsqrt.f32 %v4118_v63  ;;  %v4108_v21 = vadd.f32 1e-05, %v4076_v51  ;;  %v4074_v32 = vsub.f32 %v4042_v31, %v4058_v26  ;;  %v7101_v63 = vpop.eup %7100 }
 0xe1e   : > { %v3925_v36 = vpop.xlane.xlu0 %3924  ;;  %7108 = vrsqrt.f32 %v4112_v33  ;;  %v4040_v33 = vmul.f32 0.015625, %v3996_v17  ;;  %v4102_v51 = vsub.f32 %v9016_v58, %v9098_v15 }
 0xe1f   : > { %v4116_v4 = vadd.f32 1e-05, %v4084_v39  ;;  %v9114_v13 = vmul.f32 0.015625, %v3925_v36  ;;  %v4149_v36 = vmul.f32 %v7099_v60, %v4101_v9  ;;  %v4106_v31 = vadd.f32 1e-05, %v4074_v32 }
 0xe20   : > { %v4095_v9 = vsub.f32 %v8953_v42, %v9092_v38 }
 0xe21   : > { %7110 = vrsqrt.f32 %v4116_v4  ;;  %v4059_v3 = vmul.f32 %v9114_v13, %v9114_v13  ;;  %v4098_v4 = vsub.f32 %v8963_v14, %v9078_v46  ;;  %v4097_v14 = vsub.f32 %v8944_v48, %v9082_v61 }
 0xe22   : > { %7112 = vrsqrt.f32 %v4111_v10  ;;  %v4005_v41 = vpop.xlane.xlu0 %4004  ;;  %v4100_v48 = vsub.f32 %v8978_v16, %v9104_v5 }
 0xe23   : > { %v4043_v23 = vmul.f32 0.015625, %v4005_v41  ;;  %7114 = vrsqrt.f32 %v4110_v2  ;;  %v9842_v2 = vld [vmem:[#allocation6_spill] sm:$0xff]  ;;  %v4072_v41 = vsub.f32 %v4040_v33, %v4056_v40  ;;  %v4146_v58 = vmul.f32 %v7101_v63, %v4098_v4 }
 0xe24   : > { %v9141_v49 = vrot.slane %v9129_v43, %v9842_v2  ;;  %v4096_v33 = vsub.f32 %v8957_v56, %v9088_v1  ;;  %v4094_v2 = vsub.f32 %v8937_v6, %v9100_v11 }
 0xe25   : > { %v4075_v54 = vsub.f32 %v4043_v23, %v4059_v3 }
 0xe26   : > { %v3919_v24 = vpop.xlane.xlu0 %3918  ;;  %v7103_v52 = vpop.eup %7102  ;;  %v4169_v50 = vmul.f32 %v9141_v49, %v4149_v36  ;;  %v4166_v1 = vmul.f32 %v9141_v49, %v4146_v58 }
 0xe27   : > { %v4107_v39 = vadd.f32 1e-05, %v4075_v54  ;;  %v9133_v10 = vmul.f32 0.015625, %v3919_v24  ;;  %v7105_v59 = vpop.eup %7104  ;;  %v4147_v26 = vmul.f32 %v7103_v52, %v4099_v20  ;;  %v9154_v54 = vrot.slane %v9129_v43, %v9843_v7 }
 0xe28   : > { %v4104_v24 = vadd.f32 1e-05, %v4072_v41  ;;  %v4091_v7 = vsub.f32 %v9047_v53, %v9114_v13 }
 0xe29   : > { %7116 = vrsqrt.f32 %v4107_v39  ;;  %v4057_v46 = vmul.f32 %v9133_v10, %v9133_v10  ;;  %v4167_v42 = vmul.f32 %v9141_v49, %v4147_v26  ;;  %v9167_v5 = vadd.f32 %v9154_v54, %v4169_v50 }
 0xe2a   : > { %7118 = vrsqrt.f32 %v4108_v21  ;;  %v3999_v17 = vpop.xlane.xlu0 %3998  ;;  %v7107_v3 = vpop.eup %7106  ;;  %v4145_v21 = vmul.f32 %v7105_v59, %v4097_v14 }
 0xe2b   : > { %v4041_v23 = vmul.f32 0.015625, %v3999_v17  ;;  %v4150_v60 = vmul.f32 %v7107_v3, %v4102_v51  ;;  %v7109_v15 = vpop.eup %7108  ;;  %7120 = vrsqrt.f32 %v4106_v31  ;;  %9844 = vst [vmem:[#allocation9_spill] sm:$0xff] %v9167_v5  ;;  %v9182_v14 = vadd.f32 %v9154_v54, %v4167_v42 }
 0xe2c   : > { %v4144_v38 = vmul.f32 %v7109_v15, %v4096_v33  ;;  %v4165_v31 = vmul.f32 %v9141_v49, %v4145_v21 }
 0xe2d   : > { %v4073_v61 = vsub.f32 %v4041_v23, %v4057_v46  ;;  %v4170_v52 = vmul.f32 %v9141_v49, %v4150_v60  ;;  %v9189_v46 = vadd.f32 %v9154_v54, %v4166_v1 }
 0xe2e   : > { %v7111_v32 = vpop.eup %7110  ;;  %v3913_v39 = vpop.xlane.xlu0 %3912  ;;  %v4164_v11 = vmul.f32 %v9141_v49, %v4144_v38  ;;  %v9196_v58 = vadd.f32 %v9154_v54, %v4165_v31 }
 0xe2f   : > { %v7113_v40 = vpop.eup %7112  ;;  %v4105_v63 = vadd.f32 1e-05, %v4073_v61  ;;  %v9163_v36 = vmul.f32 0.015625, %v3913_v39  ;;  %v4148_v4 = vmul.f32 %v7111_v32, %v4100_v48  ;;  %v9170_v16 = vadd.f32 %v9154_v54, %v4170_v52 }
 0xe30   : > { %v7115_v56 = vpop.eup %7114  ;;  %v4143_v41 = vmul.f32 %v7113_v40, %v4095_v9  ;;  %v4092_v48 = vsub.f32 %v8992_v55, %v9112_v35  ;;  %v4196_v21 = vpack.c.bf16 %v9189_v46, %v9196_v58  ;;  %v9204_v32 = vadd.f32 %v9154_v54, %v4164_v11 }
 0xe31   : > { %9845 = vst [vmem:[#allocation5_spill] sm:$0xff] %v9170_v16  ;;  %7122 = vrsqrt.f32 %v4105_v63  ;;  %v4168_v20 = vmul.f32 %v9141_v49, %v4148_v4  ;;  %v4198_v51 = vpack.c.bf16 %v9170_v16, %v9167_v5  ;;  %v4055_v17 = vmul.f32 %v9163_v36, %v9163_v36 }
 0xe32   : > { %7124 = vrsqrt.f32 %v4104_v24  ;;  %v3993_v59 = vpop.xlane.xlu0 %3992  ;;  %v4142_v23 = vmul.f32 %v7115_v56, %v4094_v2  ;;  %v4163_v15 = vmul.f32 %v9141_v49, %v4143_v41  ;;  %v4161_v55 = vmul.f32 %v9141_v49, %v9074_v12 }
 0xe33   : > { %v4039_v3 = vmul.f32 0.015625, %v3993_v59  ;;  %v9185_v6 = vadd.f32 %v9154_v54, %v4168_v20  ;;  %6698 = vmatprep.subr.bf16.mxu1 %v4198_v51  ;;  %v4090_v39 = vsub.f32 %v9012_v25, %v9118_v62  ;;  %v4089_v4 = vsub.f32 %v9056_v44, %v9133_v10 }
 0xe34   : > { %6699 = vmatpush3.bf16.msra.mxu1 %v4198_v51  ;;  %v4162_v33 = vmul.f32 %v9141_v49, %v4142_v23  ;;  %v9208_v13 = vadd.f32 %v9154_v54, %v4163_v15  ;;  %v9223_v12 = vadd.f32 %v9154_v54, %v4161_v55  ;;  %v4088_v44 = vsub.f32 %v9031_v8, %v9124_v34  ;;  %v7168_v15 = vld [vmem:[%s7600_s25 + $0x20] sm:$0xff]  }
 0xe35   : > { %v4071_v26 = vsub.f32 %v4039_v3, %v4055_v17  ;;  %v4197_v60 = vpack.c.bf16 %v9185_v6, %v9182_v14  ;;  %v4087_v17 = vsub.f32 %v9065_v47, %v9163_v36  ;;  %v7176_v55 = vld [vmem:[%s7600_s25 + $0x60] sm:$0xff]  }
 0xe36   : > { %v7117_v50 = vpop.eup %7116  ;;  %v4195_v52 = vpack.c.bf16 %v9204_v32, %v9208_v13  ;;  %v9217_v40 = vadd.f32 %v9154_v54, %v4162_v33  ;;  %v7174_v33 = vld [vmem:[%s7600_s25 + $0x50] sm:$0xff]  }
 0xe37   : > { %v7119_v9 = vpop.eup %7118  ;;  %v4103_v61 = vadd.f32 1e-05, %v4071_v26  ;;  %6700 = vmatprep.subr.bf16.mxu1 %v4197_v60  ;;  %v4139_v53 = vmul.f32 %v7117_v50, %v4091_v7  ;;  %v7165_v50 = vld [vmem:[%s7600_s25 + $0x8] sm:$0xff]   ;;  %v7167_v7 = vld [vmem:[%s7600_s25 + $0x18] sm:$0xff]  }
 0xe38   : > { %6701 = vmatpush3.bf16.msra.mxu1 %v4197_v60  ;;  %v4140_v35 = vmul.f32 %v7119_v9, %v4092_v48  ;;  %v7121_v24 = vpop.eup %7120  ;;  %v4194_v56 = vpack.c.bf16 %v9217_v40, %v9223_v12  ;;  %v7170_v9 = vld [vmem:[%s7600_s25 + $0x30] sm:$0xff]   ;;  %v7171_v48 = vld [vmem:[%s7600_s25 + $0x38] sm:$0xff]  }
 0xe39   : > { %7126 = vrsqrt.f32 %v4103_v61  ;;  %6702 = vmatprep.subr.bf16.mxu1 %v4196_v21  ;;  %v4159_v63 = vmul.f32 %v9141_v49, %v4139_v53  ;;  %v4138_v25 = vmul.f32 %v7121_v24, %v4090_v39  ;;  %v7172_v61 = vld [vmem:[%s7600_s25 + $0x40] sm:$0xff]   ;;  %v7175_v53 = vld [vmem:[%s7600_s25 + $0x58] sm:$0xff]   ;;  %v7178_v24 = vld [vmem:[%s7600_s25 + $0x70] sm:$0xff]  }
 0xe3a   : > { %v4160_v38 = vmul.f32 %v9141_v49, %v4140_v35  ;;  %v7177_v35 = vld [vmem:[%s7600_s25 + $0x68] sm:$0xff]   ;;  %v7179_v39 = vld [vmem:[%s7600_s25 + $0x78] sm:$0xff]  }
 0xe3b   : > { %v9229_v2 = vadd.f32 %v9154_v54, %v4159_v63  ;;  %v4158_v59 = vmul.f32 %v9141_v49, %v4138_v25 }
 0xe3c   : > { %6703 = vmatpush3.bf16.msra.mxu1 %v4196_v21  ;;  %v9235_v20 = vadd.f32 %v9154_v54, %v4160_v38  ;;  %v7173_v21 = vld [vmem:[%s7600_s25 + $0x48] sm:$0xff]  }
 0xe3d   : > { %6704 = vmatprep.subr.bf16.mxu1 %v4195_v52  ;;  %v9246_v34 = vadd.f32 %v9154_v54, %v4158_v59 }
 0xe3e   : > { %v7123_v42 = vpop.eup %7122  ;;  %v4193_v31 = vpack.c.bf16 %v9235_v20, %v9229_v2 }
 0xe3f   : > { %v7125_v62 = vpop.eup %7124  ;;  %v4137_v1 = vmul.f32 %v7123_v42, %v4089_v4  ;;  %v9846_v4 = vld [vmem:[#allocation24_spill] sm:$0xff] }
 0xe40   : > { %6705 = vmatpush3.bf16.msra.mxu1 %v4195_v52  ;;  %v4136_v51 = vmul.f32 %v7125_v62, %v4088_v44  ;;  %v9847_v62 = vld [vmem:[#allocation25_spill] sm:$0xff] }
 0xe41   : > { %v4157_v10 = vmul.f32 %v9141_v49, %v4137_v1  ;;  %6706 = vmatprep.subr.bf16.mxu1 %v4194_v56 }
 0xe42   : > { %v4156_v11 = vmul.f32 %v9141_v49, %v4136_v51 }
 0xe43   : > { %v9241_v41 = vadd.f32 %v9154_v54, %v4157_v10 }
 0xe44   : > { %6707 = vmatpush3.bf16.msra.mxu1 %v4194_v56  ;;  %v9256_v36 = vadd.f32 %v9154_v54, %v4156_v11 }
 0xe45   : > { %6708 = vmatprep.subr.bf16.mxu1 %v4193_v31  ;;  %v4192_v23 = vpack.c.bf16 %v9246_v34, %v9241_v41 }
 0xe46   : > { %v7127_v8 = vpop.eup %7126 }
 0xe47   : > { %v4135_v3 = vmul.f32 %v7127_v8, %v4087_v17 }
 0xe48   : > { %6709 = vmatpush3.bf16.msra.mxu1 %v4193_v31 }
 0xe49   : > { %v4155_v26 = vmul.f32 %v9141_v49, %v4135_v3  ;;  %6710 = vmatprep.subr.bf16.mxu1 %v4192_v23  ;;  %v7166_v49 = vld [vmem:[%s7600_s25 + $0x10] sm:$0xff]  }
 0xe4b   : > { %v9253_v47 = vadd.f32 %v9154_v54, %v4155_v26  ;;  %v7169_v54 = vld [vmem:[%s7600_s25 + $0x28] sm:$0xff]   ;;  %s9573_s25 = scalar_lea.hbm %s9626_s11, %s5827_s22 }
 0xe4c   : > { %6711 = vmatpush3.bf16.msra.mxu1 %v4192_v23  ;;  %v9848_v23 = vld [vmem:[#allocation26_spill] sm:$0xff] }
 0xe4d   : > { %v4191_v60 = vpack.c.bf16 %v9256_v36, %v9253_v47 }
 0xe4f   : > { %6712 = vmatprep.subr.bf16.mxu1 %v4191_v60 }
 0xe50   : > { %6713 = vmatpush3.bf16.msra.mxu1 %v4191_v60 }
 0xe53   : > { %6715 = vmatmul.mubr.bf16.vlgmr.msra.gmra.mxu1 %v7165_v50  ;;  %v9849_v50 = vld [vmem:[#allocation28_spill] sm:$0xff] }
 0xe54   : > { %6718 = vmatprep.mubr.bf16.mxu1 %v7166_v49 }
 0xe5b   : > { %6719 = vmatmul.mubr.bf16.gmra.mxu1 %v7167_v7 }
 0xe5c   : > { %6722 = vmatprep.mubr.bf16.mxu1 %v7168_v15 }
 0xe63   : > { %6723 = vmatmul.mubr.bf16.gmra.mxu1 %v7169_v54 }
 0xe64   : > { %6726 = vmatprep.mubr.bf16.mxu1 %v7170_v9 }
 0xe6b   : > { %6727 = vmatmul.mubr.bf16.gmra.mxu1 %v7171_v48 }
 0xe6c   : > { %6730 = vmatprep.mubr.bf16.mxu1 %v7172_v61 }
 0xe73   : > { %6731 = vmatmul.mubr.bf16.gmra.mxu1 %v7173_v21 }
 0xe74   : > { %6734 = vmatprep.mubr.bf16.mxu1 %v7174_v33 }
 0xe7b   : > { %6735 = vmatmul.mubr.bf16.gmra.mxu1 %v7175_v53 }
 0xe7c   : > { %6738 = vmatprep.mubr.bf16.mxu1 %v7176_v55 }
 0xe83   : > { %6739 = vmatmul.mubr.bf16.gmra.mxu1 %v7177_v35 }
 0xe84   : > { %6742 = vmatprep.mubr.bf16.mxu1 %v7178_v24 }
 0xe8b   : > { %6743 = vmatmul.mubr.bf16.gmra.mxu1 %v7179_v39 }
 0xf13   : > { %v6716_v52 = vpop.f32.mrf.mxu1 }
 0xf14   : > { %v4242_v42 = vadd.f32 %v6716_v52, %v9846_v4 }
 0xf15   : > { %v4233_v63 = vpop.f32.mrf.mxu1 }
 0xf16   : > { %v4234_v25 = vadd.f32 %v4233_v63, %v9825_v0  ;;  %v4362_v44 = vmax.f32 %v4242_v42, 0.0 }
 0xf17   : > { %v6717_v38 = vpop.f32.mrf.mxu1 }
 0xf18   : > { %v4245_v1 = vadd.f32 %v6717_v38, %v9847_v62  ;;  %v4360_v31 = vmax.f32 %v4234_v25, 0.0 }
 0xf19   : > { %v4236_v56 = vpop.f32.mrf.mxu1 }
 0xf1a   : > { %v4363_v10 = vmax.f32 %v4245_v1, 0.0  ;;  %v4237_v59 = vadd.f32 %v4236_v56, %v9824_v37 }
 0xf1b   : > { %v6720_v51 = vpop.f32.mrf.mxu1 }
 0xf1c   : > { %v9279_v17 = vpack.c.bf16 %v4363_v10, %v4362_v44  ;;  %v4361_v8 = vmax.f32 %v4237_v59, 0.0  ;;  %v4258_v26 = vadd.f32 %v6720_v51, %v9848_v23  ;;  %v9851_v23 = vld [vmem:[#allocation29_spill] sm:$0xff] }
 0xf1d   : > { %v4249_v3 = vpop.f32.mrf.mxu1 }
 0xf1e   : > { %v9281_v11 = vpack.c.bf16 %v4361_v8, %v4360_v31  ;;  %v4250_v0 = vadd.f32 %v4249_v3, %v9820_v18  ;;  %v4366_v15 = vmax.f32 %v4258_v26, 0.0  ;;  %v9850_v31 = vld [vmem:[#allocation30_spill] sm:$0xff] }
 0xf1f   : > { %v6721_v60 = vpop.f32.mrf.mxu1 }
 0xf20   : > { %v4261_v49 = vadd.f32 %v6721_v60, %v9849_v50  ;;  %v4364_v48 = vmax.f32 %v4250_v0, 0.0  ;;  %v9852_v60 = vld [vmem:[#allocation31_spill] sm:$0xff] }
 0xf21   : > { %v4252_v7 = vpop.f32.mrf.mxu1 }
 0xf22   : > { %v4367_v54 = vmax.f32 %v4261_v49, 0.0  ;;  %v4253_v37 = vadd.f32 %v4252_v7, %v9818_v19  ;;  %v9853_v7 = vld [vmem:[#allocation33_spill] sm:$0xff] }
 0xf23   : > { %v6724_v9 = vpop.f32.mrf.mxu1 }
 0xf24   : > { %v9287_v61 = vpack.c.bf16 %v4367_v54, %v4366_v15  ;;  %v4365_v21 = vmax.f32 %v4253_v37, 0.0  ;;  %v9854_v37 = vld [vmem:[#allocation34_spill] sm:$0xff] }
 0xf25   : > { %v4265_v33 = vpop.f32.mrf.mxu1 }
 0xf26   : > { %v9289_v53 = vpack.c.bf16 %v4365_v21, %v4364_v48 }
 0xf27   : > { %v6725_v55 = vpop.f32.mrf.mxu1 }
 0xf29   : > { %v4268_v35 = vpop.f32.mrf.mxu1 }
 0xf2b   : > { %v6728_v24 = vpop.f32.mrf.mxu1 }
 0xf2c   : > { %v4290_v0 = vadd.f32 %v6728_v24, %v9852_v60 }
 0xf2d   : > { %v4281_v39 = vpop.f32.mrf.mxu1 }
 0xf2f   : > { %v6729_v18 = vpop.f32.mrf.mxu1 }
 0xf30   : > { %v4293_v8 = vadd.f32 %v6729_v18, %v9850_v31  ;;  %v4374_v31 = vmax.f32 %v4290_v0, 0.0 }
 0xf31   : > { %v4284_v52 = vpop.f32.mrf.mxu1 }
 0xf32   : > { %v4375_v54 = vmax.f32 %v4293_v8, 0.0  ;;  %v4285_v48 = vadd.f32 %v4284_v52, %v9854_v37 }
 0xf33   : > { %v9291_v63 = vpop.f32.mrf.mxu1 }
 0xf34   : > { %v4399_v8 = vpack.c.bf16 %v4375_v54, %v4374_v31  ;;  %v9860_v54 = vld [vmem:[#allocation39_spill] sm:$0xff] }
 0xf35   : > { %v9293_v4 = vpop.f32.mrf.mxu1 }
 0xf37   : > { %v9295_v42 = vpop.f32.mrf.mxu1 }
 0xf39   : > { %v9297_v19 = vpop.f32.mrf.mxu1 }
 0xf3b   : > { %v6736_v38 = vpop.f32.mrf.mxu1 }
 0xf3d   : > { %v4313_v25 = vpop.f32.mrf.mxu1 }
 0xf3f   : > { %v6737_v62 = vpop.f32.mrf.mxu1 }
 0xf41   : > { %v4316_v1 = vpop.f32.mrf.mxu1 }
 0xf43   : > { %v6740_v56 = vpop.f32.mrf.mxu1 }
 0xf44   : > { %v4338_v24 = vadd.f32 %v6740_v56, %v8000_v45 }
 0xf45   : > { %v4329_v44 = vpop.f32.mrf.mxu1 }
 0xf46   : > { %v4386_v0 = vmax.f32 %v4338_v24, 0.0 }
 0xf47   : > { %v6741_v10 = vpop.f32.mrf.mxu1 }
 0xf48   : > { %v4341_v43 = vadd.f32 %v6741_v10, %v7997_v27  ;;  %v9855_v10 = vld [vmem:[#allocation35_spill] sm:$0xff] }
 0xf49   : > { %v4332_v59 = vpop.f32.mrf.mxu1 }
 0xf4a   : > { %v4387_v52 = vmax.f32 %v4341_v43, 0.0 }
 0xf4b   : > { %v6744_v51 = vpop.f32.mrf.mxu1 }
 0xf4c   : > { %v4354_v26 = vadd.f32 %v6744_v51, %v9851_v23  ;;  %v4282_v51 = vadd.f32 %v4281_v39, %v8013_v22  ;;  %v9856_v22 = vld [vmem:[#allocation36_spill] sm:$0xff] }
 0xf4d   : > { %v4345_v3 = vpop.f32.mrf.mxu1  ;;  %v4330_v39 = vadd.f32 %v4329_v44, %v9856_v22  ;;  %v7182_v22 = vld [vmem:[%s7879_s14 + $0x10] ss:$8 sps:$4 sm:$0xff]  }
 0xf4e   : > { %v4346_v49 = vadd.f32 %v4345_v3, %v9813_v28  ;;  %v4390_v16 = vmax.f32 %v4354_v26, 0.0  ;;  %v4277_v3 = vadd.f32 %v6725_v55, %v8009_v29  ;;  %v4274_v26 = vadd.f32 %v6724_v9, %v9855_v10  ;;  %v9858_v29 = vld [vmem:[#allocation38_spill] sm:$0xff] }
 0xf4f   : > { %v6745_v50 = vpop.f32.mrf.mxu1  ;;  %v4325_v55 = vadd.f32 %v6737_v62, %v9858_v29  ;;  %v4322_v9 = vadd.f32 %v6736_v38, %v9860_v54  ;;  %v4384_v37 = vmax.f32 %v4330_v39, 0.0  ;;  %v9862_v62 = vld [vmem:[#allocation42_spill] sm:$0xff]  ;;  %v7010_v54 = vld [vmem:[%s9621_s6 + $0x80] sm:$0xff]  }
 0xf50   : > { %v4357_v15 = vadd.f32 %v6745_v50, %v9853_v7  ;;  %v4388_v23 = vmax.f32 %v4346_v49, 0.0  ;;  %v4373_v50 = vmax.f32 %v4285_v48, 0.0  ;;  %v4333_v7 = vadd.f32 %v4332_v59, %v8024_v30  ;;  %v9859_v30 = vld [vmem:[#allocation40_spill] sm:$0xff]  ;;  %v7184_v39 = vld [vmem:[%s7879_s14 + $0x20] ss:$8 sps:$4 sm:$0xff]  }
 0xf51   : > { %v4348_v21 = vpop.f32.mrf.mxu1  ;;  %v4371_v45 = vmax.f32 %v4277_v3, 0.0  ;;  %v4405_v49 = vpack.c.bf16 %v4387_v52, %v4386_v0  ;;  %v4266_v59 = vadd.f32 %v4265_v33, %v9859_v30  ;;  %v4383_v44 = vmax.f32 %v4325_v55, 0.0  ;;  %v7191_v29 = vld [vmem:[%s7879_s14 + $0x64] ss:$8 sps:$4 sm:$0xff]   ;;  %v7192_v55 = vld [vmem:[%s7879_s14 + $0x60] ss:$8 sps:$4 sm:$0xff]  }
 0xf52   : > { %v4391_v5 = vmax.f32 %v4357_v15, 0.0  ;;  %v4349_v18 = vadd.f32 %v4348_v21, %v8003_v57  ;;  %v4372_v57 = vmax.f32 %v4282_v51, 0.0  ;;  %v4385_v43 = vmax.f32 %v4333_v7, 0.0  ;;  %v9865_v7 = vld [vmem:[#allocation47_spill] sm:$0xff] }
 0xf53   : > { %v4370_v15 = vmax.f32 %v4274_v26, 0.0  ;;  %v4382_v24 = vmax.f32 %v4322_v9, 0.0  ;;  %v9866_v26 = vld [vmem:[#allocation48_spill] sm:$0xff]  ;;  %v7008_v30 = vld [vmem:[%s9621_s6 + $0x90] sm:$0xff]  }
 0xf54   : > { %v4407_v60 = vpack.c.bf16 %v4391_v5, %v4390_v16  ;;  %v4389_v28 = vmax.f32 %v4349_v18, 0.0  ;;  %v9857_v5 = vld [vmem:[#allocation37_spill] sm:$0xff]  ;;  %v4398_v56 = vpack.c.bf16 %v4373_v50, %v4372_v57  ;;  %v4404_v51 = vpack.c.bf16 %v4385_v43, %v4384_v37  ;;  %v7194_v43 = vld [vmem:[%s7879_s14 + $0x70] ss:$8 sps:$4 sm:$0xff]  }
 0xf55   : > { %v4269_v16 = vadd.f32 %v4268_v35, %v9857_v5  ;;  %v4397_v48 = vpack.c.bf16 %v4371_v45, %v4370_v15  ;;  %v9861_v18 = vld [vmem:[#allocation41_spill] sm:$0xff]  ;;  %v4368_v35 = vmax.f32 %v4266_v59, 0.0  ;;  %v4403_v3 = vpack.c.bf16 %v4383_v44, %v4382_v24  ;;  %v7186_v45 = vld [vmem:[%s7879_s14 + $0x30] ss:$8 sps:$4 sm:$0xff]   ;;  %v7009_v59 = vld [vmem:[%s9621_s6 + $0x88] sm:$0xff]  }
 0xf56   : > { %v4406_v27 = vpack.c.bf16 %v4389_v28, %v4388_v23  ;;  %6184 = vmatprep.subr.bf16.mxu0 %v4407_v60  ;;  %v4317_v31 = vadd.f32 %v4316_v1, %v9861_v18  ;;  %v4314_v23 = vadd.f32 %v4313_v25, %v9862_v62  ;;  %v9863_v28 = vld [vmem:[#allocation44_spill] sm:$0xff]  ;;  %v7188_v5 = vld [vmem:[%s7879_s14 + $0x40] ss:$8 sps:$4 sm:$0xff]  }
 0xf57   : > { %6185 = vmatpush3.bf16.msra.mxu0 %v4399_v8  ;;  %v4369_v21 = vmax.f32 %v4269_v16, 0.0  ;;  %v4309_v33 = vadd.f32 %v9295_v42, %v9863_v28  ;;  %v9864_v8 = vld [vmem:[#allocation45_spill] sm:$0xff]  ;;  %v4298_v42 = vadd.f32 %v9293_v4, %v9866_v26  ;;  %v7181_v4 = vld [vmem:[%s7879_s14 + $0x14] ss:$8 sps:$4 sm:$0xff]  }
 0xf58   : > { %6186 = vmatprep.subr.bf16.mxu0 %v4406_v27  ;;  %v4381_v38 = vmax.f32 %v4317_v31, 0.0  ;;  %v4306_v50 = vadd.f32 %v9291_v63, %v9864_v8  ;;  %v4380_v52 = vmax.f32 %v4314_v23, 0.0  ;;  %v4301_v27 = vadd.f32 %v9297_v19, %v9865_v7  ;;  %v7189_v16 = vld [vmem:[%s7879_s14 + $0x54] ss:$8 sps:$4 sm:$0xff]  }
 0xf59   : > { %v4396_v60 = vpack.c.bf16 %v4369_v21, %v4368_v35  ;;  %v4379_v1 = vmax.f32 %v4309_v33, 0.0  ;;  %v4376_v0 = vmax.f32 %v4298_v42, 0.0  ;;  %v7007_v15 = vld [vmem:[%s9621_s6 + $0x98] sm:$0xff]  }
 0xf5a   : > { %v4402_v10 = vpack.c.bf16 %v4381_v38, %v4380_v52  ;;  %v4378_v25 = vmax.f32 %v4306_v50, 0.0  ;;  %v4377_v63 = vmax.f32 %v4301_v27, 0.0  ;;  %6746 = vmatprep.subr.bf16.mxu1 %v7007_v15  ;;  %v7011_v9 = vld [vmem:[%s9621_s6 + $0xb8] sm:$0xff]  }
 0xf5b   : > { %6187 = vmatpush3.bf16.msra.mxu0 %v4398_v56  ;;  %v7190_v56 = vld [vmem:[%s7879_s14 + $0x50] ss:$8 sps:$4 sm:$0xff]   ;;  %6747 = vmatpush3.bf16.msra.mxu1 %v7007_v15 }
 0xf5c   : > { %6188 = vmatprep.subr.bf16.mxu0 %v4405_v49  ;;  %v4401_v57 = vpack.c.bf16 %v4379_v1, %v4378_v25  ;;  %v4400_v19 = vpack.c.bf16 %v4377_v63, %v4376_v0  ;;  %v7193_v49 = vld [vmem:[%s7879_s14 + $0x74] ss:$8 sps:$4 sm:$0xff]   ;;  %6748 = vmatprep.subr.bf16.mxu1 %v7008_v30 }
 0xf5f   : > { %6189 = vmatpush3.bf16.msra.mxu0 %v4397_v48  ;;  %6749 = vmatpush3.bf16.msra.mxu1 %v7008_v30 }
 0xf60   : > { %6190 = vmatprep.subr.bf16.mxu0 %v4404_v51  ;;  %6750 = vmatprep.subr.bf16.mxu1 %v7009_v59 }
 0xf63   : > { %6191 = vmatpush3.bf16.msra.mxu0 %v4396_v60  ;;  %6751 = vmatpush3.bf16.msra.mxu1 %v7009_v59 }
 0xf64   : > { %6192 = vmatprep.subr.bf16.mxu0 %v4403_v3  ;;  %6752 = vmatprep.subr.bf16.mxu1 %v7010_v54 }
 0xf67   : > { %6193 = vmatpush3.bf16.msra.mxu0 %v9287_v61  ;;  %v7180_v61 = vld [vmem:[%s7879_s14] ss:$8 sps:$4 sm:$0xff]   ;;  %6753 = vmatpush3.bf16.msra.mxu1 %v7010_v54 }
 0xf68   : > { %6194 = vmatprep.subr.bf16.mxu0 %v4402_v10 }
 0xf6b   : > { %6195 = vmatpush3.bf16.msra.mxu0 %v9289_v53  ;;  %v7183_v53 = vld [vmem:[%s7879_s14 + $0x24] ss:$8 sps:$4 sm:$0xff]  }
 0xf6c   : > { %6196 = vmatprep.subr.bf16.mxu0 %v4401_v57 }
 0xf6f   : > { %6197 = vmatpush3.bf16.msra.mxu0 %v9279_v17  ;;  %v7185_v17 = vld [vmem:[%s7879_s14 + $0x34] ss:$8 sps:$4 sm:$0xff]  }
 0xf70   : > { %6198 = vmatprep.subr.bf16.mxu0 %v4400_v19 }
 0xf73   : > { %6199 = vmatpush3.bf16.msra.mxu0 %v9281_v11  ;;  %v7187_v11 = vld [vmem:[%s7879_s14 + $0x44] ss:$8 sps:$4 sm:$0xff]  }
 0xf74   : > { %6770 = vmatprep.subr.bf16.mxu0 %v7011_v9 }
 0xf76   : > { %4441 = vmatmul.mubr.bf16.vlgmr.msra.gmra.mxu0 %v7180_v61 }
 0xf77   : > { %4448 = vmatprep.mubr.bf16.mxu0 %v7181_v4  ;;  %6771 = vmatpush3.bf16.msra.mxu0 %v7011_v9 }
 0xf7e   : > { %4449 = vmatmul.mubr.bf16.gmra.mxu0 %v7182_v22 }
 0xf7f   : > { %4456 = vmatprep.mubr.bf16.mxu0 %v7183_v53 }
 0xf86   : > { %4457 = vmatmul.mubr.bf16.gmra.mxu0 %v7184_v39 }
 0xf87   : > { %4464 = vmatprep.mubr.bf16.mxu0 %v7185_v17 }
 0xf8e   : > { %4465 = vmatmul.mubr.bf16.gmra.mxu0 %v7186_v45 }
 0xf8f   : > { %4472 = vmatprep.mubr.bf16.mxu0 %v7187_v11 }
 0xf96   : > { %4473 = vmatmul.mubr.bf16.gmra.mxu0 %v7188_v5 }
 0xf97   : > { %4480 = vmatprep.mubr.bf16.mxu0 %v7189_v16 }
 0xf9e   : > { %4481 = vmatmul.mubr.bf16.gmra.mxu0 %v7190_v56 }
 0xf9f   : > { %4488 = vmatprep.mubr.bf16.mxu0 %v7191_v29 }
 0xfa6   : > { %4489 = vmatmul.mubr.bf16.gmra.mxu0 %v7192_v55 }
 0xfa7   : > { %4496 = vmatprep.mubr.bf16.mxu0 %v7193_v49 }
 0xfae   : > { %4497 = vmatmul.mubr.bf16.gmra.mxu0 %v7194_v43 }
0x1036   : > { %v6200_v37 = vpop.f32.mrf.mxu0 }
0x1038   : > { %v6201_v48 = vpop.f32.mrf.mxu0 }
0x1039   : > { %v6202_v44 = vadd.f32 %v6201_v48, %v6200_v37 }
0x103a   : > { %v6203_v21 = vpop.f32.mrf.mxu0 }
0x103b   : > { %v4505_v35 = vadd.f32 %v6202_v44, %v9253_v47 }
0x103c   : > { %v6204_v18 = vpop.f32.mrf.mxu0 }
0x103d   : > { %v6205_v31 = vadd.f32 %v6204_v18, %v6203_v21 }
0x103e   : > { %v6206_v51 = vpop.f32.mrf.mxu0 }
0x103f   : > { %v4506_v24 = vadd.f32 %v6205_v31, %v9256_v36 }
0x1040   : > { %v6207_v62 = vpop.f32.mrf.mxu0 }
0x1041   : > { %v4521_v23 = vpack.c.bf16 %v4506_v24, %v4505_v35  ;;  %v6208_v28 = vadd.f32 %v6207_v62, %v6206_v51  ;;  %v9867_v35 = vld [vmem:[#allocation9_spill] sm:$0xff] }
0x1042   : > { %v6209_v60 = vpop.f32.mrf.mxu0  ;;  %v9868_v62 = vld [vmem:[#allocation5_spill] sm:$0xff] }
0x1043   : > { %6754 = vmatprep.mubr.msk.bf16.mxu1 %vm1059_vm1, %v4521_v23  ;;  %v4507_v8 = vadd.f32 %v6208_v28, %v9241_v41  ;;  %v7014_v28 = vld [vmem:[%s9621_s6 + $0xa0] sm:$0xff]  }
0x1044   : > { %v6210_v33 = vpop.f32.mrf.mxu0 }
0x1045   : > { %v6211_v3 = vadd.f32 %v6210_v33, %v6209_v60  ;;  %v7015_v33 = vld [vmem:[%s9622_s7 + $0x58] sm:$0xff]  }
0x1046   : > { %v6212_v38 = vpop.f32.mrf.mxu0  ;;  %6794 = vmatprep.subr.bf16.mxu1 %v7015_v33 }
0x1047   : > { %v4508_v50 = vadd.f32 %v6211_v3, %v9246_v34 }
0x1048   : > { %v6213_v52 = vpop.f32.mrf.mxu0 }
0x1049   : > { %v4522_v1 = vpack.c.bf16 %v4508_v50, %v4507_v8  ;;  %v6214_v27 = vadd.f32 %v6213_v52, %v6212_v38  ;;  %v9869_v38 = vld [vmem:[#allocation27_spill] sm:$0xff]  ;;  %v9870_v8 = vld [vmem:[#allocation8_spill] sm:$0xff] }
0x104a   : > { %v6215_v7 = vpop.f32.mrf.mxu0  ;;  %v4541_v50 = vrot.slane %v9870_v8, %v9869_v38 }
0x104b   : > { %6755 = vmatmul.mubr.msk.bf16.vlgmr.msra.gmra.mxu1 %vm1059_vm1, %v4522_v1  ;;  %v4509_v25 = vadd.f32 %v6214_v27, %v9229_v2 }
0x104c   : > { %v6216_v47 = vpop.f32.mrf.mxu0  ;;  %6795 = vmatpush3.bf16.msra.mxu1 %v7015_v33  ;;  %v7019_v33 = vld [vmem:[%s9623_s8 + $0xb8] sm:$0xff]  }
0x104d   : > { %v6217_v36 = vadd.f32 %v6216_v47, %v6215_v7 }
0x104e   : > { %v6218_v10 = vpop.f32.mrf.mxu0 }
0x104f   : > { %v4510_v26 = vadd.f32 %v6217_v36, %v9235_v20 }
0x1050   : > { %v6219_v42 = vpop.f32.mrf.mxu0 }
0x1051   : > { %v4523_v57 = vpack.c.bf16 %v4510_v26, %v4509_v25  ;;  %v6220_v0 = vadd.f32 %v6219_v42, %v6218_v10 }
0x1052   : > { %v6221_v63 = vpop.f32.mrf.mxu0 }
0x1053   : > { %6758 = vmatprep.mubr.msk.bf16.mxu1 %vm1059_vm1, %v4523_v57  ;;  %v4511_v61 = vadd.f32 %v6220_v0, %v9223_v12 }
0x1054   : > { %v6222_v41 = vpop.f32.mrf.mxu0 }
0x1055   : > { %v6223_v34 = vadd.f32 %v6222_v41, %v6221_v63 }
0x1056   : > { %v6224_v19 = vpop.f32.mrf.mxu0 }
0x1057   : > { %v4512_v4 = vadd.f32 %v6223_v34, %v9217_v40 }
0x1058   : > { %v6225_v22 = vpop.f32.mrf.mxu0 }
0x1059   : > { %v4524_v53 = vpack.c.bf16 %v4512_v4, %v4511_v61  ;;  %v6226_v17 = vadd.f32 %v6225_v22, %v6224_v19 }
0x105a   : > { %v6227_v39 = vpop.f32.mrf.mxu0 }
0x105b   : > { %6759 = vmatmul.mubr.msk.bf16.gmra.mxu1 %vm1059_vm1, %v4524_v53  ;;  %v4513_v11 = vadd.f32 %v6226_v17, %v9208_v13 }
0x105c   : > { %v6228_v2 = vpop.f32.mrf.mxu0 }
0x105d   : > { %v6229_v20 = vadd.f32 %v6228_v2, %v6227_v39 }
0x105e   : > { %v6230_v45 = vpop.f32.mrf.mxu0 }
0x105f   : > { %v4514_v5 = vadd.f32 %v6229_v20, %v9204_v32 }
0x1060   : > { %v6231_v16 = vpop.f32.mrf.mxu0 }
0x1061   : > { %v4525_v56 = vpack.c.bf16 %v4514_v5, %v4513_v11  ;;  %v6232_v55 = vadd.f32 %v6231_v16, %v6230_v45 }
0x1062   : > { %v6233_v29 = vpop.f32.mrf.mxu0 }
0x1063   : > { %6762 = vmatprep.mubr.msk.bf16.mxu1 %vm1059_vm1, %v4525_v56  ;;  %v4515_v43 = vadd.f32 %v6232_v55, %v9196_v58 }
0x1064   : > { %v6234_v40 = vpop.f32.mrf.mxu0 }
0x1065   : > { %v6235_v12 = vadd.f32 %v6234_v40, %v6233_v29 }
0x1066   : > { %v6236_v49 = vpop.f32.mrf.mxu0 }
0x1067   : > { %v4516_v15 = vadd.f32 %v6235_v12, %v9189_v46 }
0x1068   : > { %v6237_v30 = vpop.f32.mrf.mxu0 }
0x1069   : > { %v4526_v59 = vpack.c.bf16 %v4516_v15, %v4515_v43  ;;  %v6238_v9 = vadd.f32 %v6237_v30, %v6236_v49 }
0x106a   : > { %v6239_v54 = vpop.f32.mrf.mxu0 }
0x106b   : > { %6763 = vmatmul.mubr.msk.bf16.gmra.mxu1 %vm1059_vm1, %v4526_v59  ;;  %v4517_v48 = vadd.f32 %v6238_v9, %v9182_v14  ;;  %v7012_v14 = vld [vmem:[%s9621_s6 + $0xb0] sm:$0xff]  }
0x106c   : > { %v6240_v32 = vpop.f32.mrf.mxu0  ;;  %6772 = vmatprep.subr.bf16.mxu0 %v7012_v14 }
0x106d   : > { %v6241_v13 = vadd.f32 %v6240_v32, %v6239_v54  ;;  %6773 = vmatpush3.bf16.msra.mxu0 %v7012_v14  ;;  %v7017_v14 = vld [vmem:[%s9622_s7 + $0x48] sm:$0xff]  }
0x106e   : > { %v6242_v37 = vpop.f32.mrf.mxu0 }
0x106f   : > { %v4518_v21 = vadd.f32 %v6241_v13, %v9185_v6  ;;  %v7013_v6 = vld [vmem:[%s9621_s6 + $0xa8] sm:$0xff]  }
0x1070   : > { %v6243_v44 = vpop.f32.mrf.mxu0  ;;  %6774 = vmatprep.subr.bf16.mxu0 %v7013_v6 }
0x1071   : > { %v4527_v18 = vpack.c.bf16 %v4518_v21, %v4517_v48  ;;  %v6244_v51 = vadd.f32 %v6243_v44, %v6242_v37  ;;  %6775 = vmatpush3.bf16.msra.mxu0 %v7013_v6  ;;  %v7018_v6 = vld [vmem:[%s9622_s7 + $0x40] sm:$0xff]  }
0x1072   : > { %v6245_v31 = vpop.f32.mrf.mxu0  ;;  %6776 = vmatprep.subr.bf16.mxu0 %v7014_v28 }
0x1073   : > { %6766 = vmatprep.mubr.msk.bf16.mxu1 %vm1059_vm1, %v4527_v18  ;;  %v4519_v24 = vadd.f32 %v6244_v51, %v9867_v35 }
0x1074   : > { %v6246_v46 = vpop.f32.mrf.mxu0 }
0x1075   : > { %v6247_v58 = vadd.f32 %v6246_v46, %v6245_v31  ;;  %6777 = vmatpush3.bf16.msra.mxu0 %v7014_v28  ;;  %v3906_v28 = vrot.slane %v9870_v8, 1 }
0x1076   : > { %6818 = vmatprep.subr.bf16.mxu0 %v7019_v33 }
0x1077   : > { %v4520_v23 = vadd.f32 %v6247_v58, %v9868_v62  ;;  %3907 = vrot.lane.b32.xlu0 %v3906_v28, %s7259_s15 }
0x1079   : > { %v4528_v60 = vpack.c.bf16 %v4520_v23, %v4519_v24 }
0x107b   : > { %6767 = vmatmul.mubr.msk.bf16.gmra.mxu1 %vm1059_vm1, %v4528_v60  ;;  %v7016_v60 = vld [vmem:[%s9622_s7 + $0x50] sm:$0xff]  }
0x107c   : > { %6796 = vmatprep.subr.bf16.mxu1 %v7016_v60 }
0x107d   : > { %6797 = vmatpush3.bf16.msra.mxu1 %v7016_v60 }
0x107e   : > { %6798 = vmatprep.subr.bf16.mxu1 %v7017_v14 }
0x1081   : > { %6799 = vmatpush3.bf16.msra.mxu1 %v7017_v14 }
0x1082   : > { %6800 = vmatprep.subr.bf16.mxu1 %v7018_v6 }
0x1085   : > { %6801 = vmatpush3.bf16.msra.mxu1 %v7018_v6 }
0x110b   : > { %v6756_v3 = vpop.f32.mrf.mxu1 }
0x110c   : > { %v4633_v47 = vadd.f32 %v6756_v3, %v4541_v50  ;;  %v7020_v3 = vld [vmem:[%s9623_s8 + $0xb0] sm:$0xff]  }
0x110d   : > { %v4624_v52 = vpop.f32.mrf.mxu1 }
0x110e   : > { %v4625_v7 = vadd.f32 %v4624_v52, %v4541_v50  ;;  %v4689_v57 = vmax.f32 %v4633_v47, 0.0  ;;  %v7022_v52 = vld [vmem:[%s9623_s8 + $0xa0] sm:$0xff]   ;;  %v9871_v47 = vld [vmem:[#allocation22_spill] sm:$0xff] }
0x110f   : > { %v6757_v1 = vpop.f32.mrf.mxu1 }
0x1110   : > { %v4636_v27 = vadd.f32 %v6757_v1, %v4541_v50  ;;  %v4687_v26 = vmax.f32 %v4625_v7, 0.0  ;;  %v7023_v1 = vld [vmem:[%s9623_s8 + $0x98] sm:$0xff]  }
0x1111   : > { %v4627_v36 = vpop.f32.mrf.mxu1 }
0x1112   : > { %v4628_v10 = vadd.f32 %v4627_v36, %v4541_v50  ;;  %v4690_v25 = vmax.f32 %v4636_v27, 0.0  ;;  %v4723_v36 = vrot.slane %v9870_v8, %v9871_v47 }
0x1114   : > { %v4688_v42 = vmax.f32 %v4628_v10, 0.0  ;;  %v4704_v0 = vpack.c.bf16 %v4690_v25, %v4689_v57 }
0x1116   : > { %v4703_v63 = vpack.c.bf16 %v4688_v42, %v4687_v26 }
0x1118   : > { %6778 = vmatprep.mubr.msk.bf16.mxu0 %vm1059_vm1, %v4703_v63 }
0x1119   : > { %6779 = vmatmul.mubr.msk.bf16.vlgmr.msra.gmra.mxu0 %vm1059_vm1, %v4704_v0 }
0x111a   : > { %6819 = vmatpush3.bf16.msra.mxu0 %v7019_v33 }
0x111b   : > { %v6760_v41 = vpop.f32.mrf.mxu1  ;;  %6820 = vmatprep.subr.bf16.mxu0 %v7020_v3 }
0x111c   : > { %v4649_v22 = vadd.f32 %v6760_v41, %v4541_v50 }
0x111d   : > { %v4640_v34 = vpop.f32.mrf.mxu1 }
0x111e   : > { %v4641_v61 = vadd.f32 %v4640_v34, %v4541_v50  ;;  %v4693_v45 = vmax.f32 %v4649_v22, 0.0  ;;  %6821 = vmatpush3.bf16.msra.mxu0 %v7020_v3 }
0x111f   : > { %v6761_v19 = vpop.f32.mrf.mxu1 }
0x1120   : > { %v4652_v4 = vadd.f32 %v6761_v19, %v4541_v50  ;;  %v4691_v2 = vmax.f32 %v4641_v61, 0.0 }
0x1121   : > { %v4643_v53 = vpop.f32.mrf.mxu1 }
0x1122   : > { %v4644_v39 = vadd.f32 %v4643_v53, %v4541_v50  ;;  %v4694_v17 = vmax.f32 %v4652_v4, 0.0 }
0x1124   : > { %v4692_v20 = vmax.f32 %v4644_v39, 0.0  ;;  %v4706_v5 = vpack.c.bf16 %v4694_v17, %v4693_v45 }
0x1126   : > { %v4705_v11 = vpack.c.bf16 %v4692_v20, %v4691_v2 }
0x1128   : > { %6782 = vmatprep.mubr.msk.bf16.mxu0 %vm1059_vm1, %v4705_v11 }
0x1129   : > { %6783 = vmatmul.mubr.msk.bf16.gmra.mxu0 %vm1059_vm1, %v4706_v5 }
0x112b   : > { %v6764_v16 = vpop.f32.mrf.mxu1 }
0x112c   : > { %v4665_v12 = vadd.f32 %v6764_v16, %v4541_v50 }
0x112d   : > { %v4656_v56 = vpop.f32.mrf.mxu1 }
0x112e   : > { %v4657_v55 = vadd.f32 %v4656_v56, %v4541_v50  ;;  %v4697_v54 = vmax.f32 %v4665_v12, 0.0 }
0x112f   : > { %v6765_v29 = vpop.f32.mrf.mxu1 }
0x1130   : > { %v4668_v40 = vadd.f32 %v6765_v29, %v4541_v50  ;;  %v4695_v30 = vmax.f32 %v4657_v55, 0.0 }
0x1131   : > { %v4659_v49 = vpop.f32.mrf.mxu1 }
0x1132   : > { %v4660_v43 = vadd.f32 %v4659_v49, %v4541_v50  ;;  %v4698_v15 = vmax.f32 %v4668_v40, 0.0 }
0x1134   : > { %v4696_v59 = vmax.f32 %v4660_v43, 0.0  ;;  %v4708_v32 = vpack.c.bf16 %v4698_v15, %v4697_v54 }
0x1136   : > { %v4707_v9 = vpack.c.bf16 %v4696_v59, %v4695_v30 }
0x1138   : > { %6786 = vmatprep.mubr.msk.bf16.mxu0 %vm1059_vm1, %v4707_v9 }
0x1139   : > { %6787 = vmatmul.mubr.msk.bf16.gmra.mxu0 %vm1059_vm1, %v4708_v32 }
0x113b   : > { %v6768_v13 = vpop.f32.mrf.mxu1 }
0x113c   : > { %v4681_v18 = vadd.f32 %v6768_v13, %v4541_v50 }
0x113d   : > { %v4672_v37 = vpop.f32.mrf.mxu1 }
0x113e   : > { %v4673_v21 = vadd.f32 %v4672_v37, %v4541_v50  ;;  %v4701_v24 = vmax.f32 %v4681_v18, 0.0  ;;  %v3908_v18 = vpop.permute.xlu0 %3907 }
0x113f   : > { %v6769_v48 = vpop.f32.mrf.mxu1 }
0x1140   : > { %v4684_v44 = vadd.f32 %v6769_v48, %v4541_v50  ;;  %v4699_v58 = vmax.f32 %v4673_v21, 0.0  ;;  %v7024_v48 = vld [vmem:[%s9623_s8 + $0x90] sm:$0xff]   ;;  %v7025_v21 = vld [vmem:[%s9623_s8 + $0x88] sm:$0xff]  }
0x1141   : > { %v4675_v31 = vpop.f32.mrf.mxu1 }
0x1142   : > { %v4676_v51 = vadd.f32 %v4675_v31, %v4541_v50  ;;  %v4702_v46 = vmax.f32 %v4684_v44, 0.0  ;;  %v7021_v50 = vld [vmem:[%s9623_s8 + $0xa8] sm:$0xff]   ;;  %v7026_v44 = vld [vmem:[%s9623_s8 + $0x80] sm:$0xff]   ;;  %v9503_v31 = vld [vmem:[%s9624_s9 + $0x10] sm:$0x7f] }
0x1143   : > { %6822 = vmatprep.subr.bf16.mxu0 %v7021_v50 }
0x1144   : > { %v4700_v35 = vmax.f32 %v4676_v51, 0.0  ;;  %v4710_v23 = vpack.c.bf16 %v4702_v46, %v4701_v24  ;;  %6823 = vmatpush3.bf16.msra.mxu0 %v7021_v50  ;;  %v3910_v51 = vsel %vm1059_vm1, %v9503_v31, %v3908_v18 }
0x1145   : > { %6824 = vmatprep.subr.bf16.mxu0 %v7022_v52 }
0x1146   : > { %v4709_v62 = vpack.c.bf16 %v4700_v35, %v4699_v58  ;;  %v9872_v58 = vld [vmem:[#allocation23_spill] sm:$0xff] }
0x1147   : > { %v4889_v35 = vrot.slane %v3910_v51, %v9872_v58 }
0x1148   : > { %6790 = vmatprep.mubr.msk.bf16.mxu0 %vm1059_vm1, %v4709_v62  ;;  %6825 = vmatpush3.bf16.msra.mxu0 %v7022_v52 }
0x1149   : > { %6791 = vmatmul.mubr.msk.bf16.gmra.mxu0 %vm1059_vm1, %v4710_v23  ;;  %6826 = vmatprep.subr.bf16.mxu0 %v7023_v1 }
0x114c   : > { %6827 = vmatpush3.bf16.msra.mxu0 %v7023_v1 }
0x114d   : > { %6828 = vmatprep.subr.bf16.mxu0 %v7024_v48 }
0x1150   : > { %6829 = vmatpush3.bf16.msra.mxu0 %v7024_v48 }
0x1151   : > { %6830 = vmatprep.subr.bf16.mxu0 %v7025_v21 }
0x1154   : > { %6831 = vmatpush3.bf16.msra.mxu0 %v7025_v21 }
0x1155   : > { %6832 = vmatprep.subr.bf16.mxu0 %v7026_v44 }
0x1158   : > { %6833 = vmatpush3.bf16.msra.mxu0 %v7026_v44 }
0x11d9   : > { %v6780_v7 = vpop.f32.mrf.mxu0 }
0x11da   : > { %v9441_v63 = vadd.f32 %v6780_v7, %v4723_v36 }
0x11db   : > { %v4806_v27 = vpop.f32.mrf.mxu0 }
0x11dc   : > { %v9437_v42 = vadd.f32 %v4806_v27, %v4723_v36 }
0x11dd   : > { %v6781_v10 = vpop.f32.mrf.mxu0 }
0x11de   : > { %v9435_v25 = vadd.f32 %v6781_v10, %v4723_v36 }
0x11df   : > { %v4809_v26 = vpop.f32.mrf.mxu0 }
0x11e0   : > { %v9439_v57 = vadd.f32 %v4809_v26, %v4723_v36  ;;  %v4870_v41 = vpack.c.bf16 %v9435_v25, %v9441_v63 }
0x11e2   : > { %v4869_v0 = vpack.c.bf16 %v9439_v57, %v9437_v42 }
0x11e4   : > { %6802 = vmatprep.mubr.msk.bf16.mxu1 %vm1059_vm1, %v4869_v0 }
0x11e5   : > { %6803 = vmatmul.mubr.msk.bf16.vlgmr.msra.gmra.mxu1 %vm1059_vm1, %v4870_v41 }
0x11e9   : > { %v6784_v8 = vpop.f32.mrf.mxu0 }
0x11ea   : > { %v9455_v39 = vadd.f32 %v6784_v8, %v4723_v36 }
0x11eb   : > { %v4822_v34 = vpop.f32.mrf.mxu0 }
0x11ec   : > { %v9451_v22 = vadd.f32 %v4822_v34, %v4723_v36 }
0x11ed   : > { %v6785_v19 = vpop.f32.mrf.mxu0 }
0x11ee   : > { %v9449_v61 = vadd.f32 %v6785_v19, %v4723_v36 }
0x11ef   : > { %v4825_v4 = vpop.f32.mrf.mxu0 }
0x11f0   : > { %v9453_v53 = vadd.f32 %v4825_v4, %v4723_v36  ;;  %v4872_v2 = vpack.c.bf16 %v9449_v61, %v9455_v39 }
0x11f2   : > { %v4871_v17 = vpack.c.bf16 %v9453_v53, %v9451_v22 }
0x11f4   : > { %6806 = vmatprep.mubr.msk.bf16.mxu1 %vm1059_vm1, %v4871_v17 }
0x11f5   : > { %6807 = vmatmul.mubr.msk.bf16.gmra.mxu1 %vm1059_vm1, %v4872_v2 }
0x11f9   : > { %v6788_v20 = vpop.f32.mrf.mxu0 }
0x11fa   : > { %v9469_v55 = vadd.f32 %v6788_v20, %v4723_v36 }
0x11fb   : > { %v4838_v45 = vpop.f32.mrf.mxu0 }
0x11fc   : > { %v9465_v56 = vadd.f32 %v4838_v45, %v4723_v36 }
0x11fd   : > { %v6789_v11 = vpop.f32.mrf.mxu0 }
0x11fe   : > { %v9463_v5 = vadd.f32 %v6789_v11, %v4723_v36 }
0x11ff   : > { %v4841_v16 = vpop.f32.mrf.mxu0 }
0x1200   : > { %v9467_v29 = vadd.f32 %v4841_v16, %v4723_v36  ;;  %v4874_v12 = vpack.c.bf16 %v9463_v5, %v9469_v55 }
0x1202   : > { %v4873_v40 = vpack.c.bf16 %v9467_v29, %v9465_v56 }
0x1204   : > { %6810 = vmatprep.mubr.msk.bf16.mxu1 %vm1059_vm1, %v4873_v40 }
0x1205   : > { %6811 = vmatmul.mubr.msk.bf16.gmra.mxu1 %vm1059_vm1, %v4874_v12 }
0x1209   : > { %v6792_v49 = vpop.f32.mrf.mxu0 }
0x120a   : > { %v9483_v32 = vadd.f32 %v6792_v49, %v4723_v36 }
0x120b   : > { %v4854_v43 = vpop.f32.mrf.mxu0 }
0x120c   : > { %v9479_v54 = vadd.f32 %v4854_v43, %v4723_v36 }
0x120d   : > { %v6793_v15 = vpop.f32.mrf.mxu0 }
0x120e   : > { %v9477_v30 = vadd.f32 %v6793_v15, %v4723_v36 }
0x120f   : > { %v4857_v59 = vpop.f32.mrf.mxu0 }
0x1210   : > { %v9481_v9 = vadd.f32 %v4857_v59, %v4723_v36  ;;  %v4876_v37 = vpack.c.bf16 %v9477_v30, %v9483_v32 }
0x1212   : > { %v4875_v13 = vpack.c.bf16 %v9481_v9, %v9479_v54 }
0x1214   : > { %6814 = vmatprep.mubr.msk.bf16.mxu1 %vm1059_vm1, %v4875_v13 }
0x1215   : > { %6815 = vmatmul.mubr.msk.bf16.gmra.mxu1 %vm1059_vm1, %v4876_v37 }
0x12a5   : > { %v6804_v46 = vpop.f32.mrf.mxu1 }
0x12a6   : > { %v4981_v14 = vadd.f32 %v6804_v46, %v4889_v35 }
0x12a7   : > { %v4972_v24 = vpop.f32.mrf.mxu1 }
0x12a8   : > { %v4973_v23 = vadd.f32 %v4972_v24, %v4889_v35  ;;  %v5037_v52 = vmax.f32 %v4981_v14, 0.0 }
0x12a9   : > { %v6805_v62 = vpop.f32.mrf.mxu1 }
0x12aa   : > { %v4984_v60 = vadd.f32 %v6805_v62, %v4889_v35  ;;  %v5035_v3 = vmax.f32 %v4973_v23, 0.0 }
0x12ab   : > { %v4975_v6 = vpop.f32.mrf.mxu1 }
0x12ac   : > { %v4976_v28 = vadd.f32 %v4975_v6, %v4889_v35  ;;  %v5038_v33 = vmax.f32 %v4984_v60, 0.0 }
0x12ae   : > { %v5036_v50 = vmax.f32 %v4976_v28, 0.0  ;;  %v5052_v7 = vpack.c.bf16 %v5038_v33, %v5037_v52  ;;  %v7260_v52 = vmov 0.0  }
0x12af   : > { %6850 = vmatprep.subr.bf16.mxu1 %v7260_v52  ;;  %6870 = vmatprep.subr.bf16.mxu0 %v7260_v52 }
0x12b0   : > { %v5051_v1 = vpack.c.bf16 %v5036_v50, %v5035_v3  ;;  %6866 = vmatprep.mubr.msk.bf16.mxu1 %vm7261_vm2, %v7260_v52 }
0x12b2   : > { %6834 = vmatprep.mubr.bf16.mxu0 %v5051_v1  ;;  %v7029_v1 = vld [vmem:[%s9625_s10 + $0x10] sm:$0xff]  }
0x12b3   : > { %6835 = vmatmul.mubr.bf16.vlgmr.msra.gmra.mxu0 %v5052_v7 }
0x12b5   : > { %v6808_v27 = vpop.f32.mrf.mxu1 }
0x12b6   : > { %v4997_v0 = vadd.f32 %v6808_v27, %v4889_v35 }
0x12b7   : > { %v4988_v47 = vpop.f32.mrf.mxu1 }
0x12b8   : > { %v4989_v10 = vadd.f32 %v4988_v47, %v4889_v35  ;;  %v5041_v17 = vmax.f32 %v4997_v0, 0.0 }
0x12b9   : > { %v6809_v36 = vpop.f32.mrf.mxu1 }
0x12ba   : > { %v5000_v26 = vadd.f32 %v6809_v36, %v4889_v35  ;;  %v5039_v19 = vmax.f32 %v4989_v10, 0.0 }
0x12bb   : > { %v4991_v41 = vpop.f32.mrf.mxu1 }
0x12bc   : > { %v4992_v8 = vadd.f32 %v4991_v41, %v4889_v35  ;;  %v5042_v34 = vmax.f32 %v5000_v26, 0.0 }
0x12be   : > { %v5040_v4 = vmax.f32 %v4992_v8, 0.0  ;;  %v5054_v20 = vpack.c.bf16 %v5042_v34, %v5041_v17 }
0x12c0   : > { %v5053_v2 = vpack.c.bf16 %v5040_v4, %v5039_v19 }
0x12c2   : > { %6838 = vmatprep.mubr.bf16.mxu0 %v5053_v2  ;;  %v9873_v2 = vld [vmem:[#allocation20_spill] sm:$0xff] }
0x12c3   : > { %6839 = vmatmul.mubr.bf16.gmra.mxu0 %v5054_v20  ;;  %v5079_v20 = vrot.slane %v9503_v31, %v9873_v2 }
0x12c5   : > { %v6812_v45 = vpop.f32.mrf.mxu1 }
0x12c6   : > { %v5013_v49 = vadd.f32 %v6812_v45, %v4889_v35 }
0x12c7   : > { %v5004_v11 = vpop.f32.mrf.mxu1 }
0x12c8   : > { %v5005_v40 = vadd.f32 %v5004_v11, %v4889_v35  ;;  %v5045_v48 = vmax.f32 %v5013_v49, 0.0 }
0x12c9   : > { %v6813_v16 = vpop.f32.mrf.mxu1 }
0x12ca   : > { %v5016_v12 = vadd.f32 %v6813_v16, %v4889_v35  ;;  %v5043_v13 = vmax.f32 %v5005_v40, 0.0 }
0x12cb   : > { %v5007_v43 = vpop.f32.mrf.mxu1 }
0x12cc   : > { %v5008_v15 = vadd.f32 %v5007_v43, %v4889_v35  ;;  %v5046_v59 = vmax.f32 %v5016_v12, 0.0 }
0x12ce   : > { %v5044_v37 = vmax.f32 %v5008_v15, 0.0  ;;  %v5056_v44 = vpack.c.bf16 %v5046_v59, %v5045_v48 }
0x12d0   : > { %v5055_v21 = vpack.c.bf16 %v5044_v37, %v5043_v13 }
0x12d2   : > { %6842 = vmatprep.mubr.bf16.mxu0 %v5055_v21 }
0x12d3   : > { %6843 = vmatmul.mubr.bf16.gmra.mxu0 %v5056_v44 }
0x12d5   : > { %v6816_v18 = vpop.f32.mrf.mxu1 }
0x12d6   : > { %v5029_v62 = vadd.f32 %v6816_v18, %v4889_v35 }
0x12d7   : > { %v5020_v51 = vpop.f32.mrf.mxu1 }
0x12d8   : > { %v5021_v58 = vadd.f32 %v5020_v51, %v4889_v35  ;;  %v5049_v33 = vmax.f32 %v5029_v62, 0.0 }
0x12d9   : > { %v6817_v46 = vpop.f32.mrf.mxu1 }
0x12da   : > { %v5032_v24 = vadd.f32 %v6817_v46, %v4889_v35  ;;  %v5047_v6 = vmax.f32 %v5021_v58, 0.0 }
0x12db   : > { %v5023_v23 = vpop.f32.mrf.mxu1 }
0x12dc   : > { %v5024_v60 = vadd.f32 %v5023_v23, %v4889_v35  ;;  %v5050_v14 = vmax.f32 %v5032_v24, 0.0  ;;  %v7028_v35 = vld [vmem:[%s9625_s10 + $0x18] sm:$0xff]  }
0x12dd   : > { %6871 = vmatpush3.bf16.msra.mxu0 %v7028_v35 }
0x12de   : > { %v5048_v28 = vmax.f32 %v5024_v60, 0.0  ;;  %v5058_v50 = vpack.c.bf16 %v5050_v14, %v5049_v33  ;;  %6872 = vmatprep.subr.bf16.mxu0 %v7260_v52 }
0x12e0   : > { %v5057_v3 = vpack.c.bf16 %v5048_v28, %v5047_v6 }
0x12e1   : > { %6873 = vmatpush3.bf16.msra.mxu0 %v7029_v1 }
0x12e2   : > { %6846 = vmatprep.mubr.bf16.mxu0 %v5057_v3  ;;  %6874 = vmatprep.subr.bf16.mxu0 %v7260_v52 }
0x12e3   : > { %6847 = vmatmul.mubr.bf16.gmra.mxu0 %v5058_v50 }
0x12e4   : > { %6878 = vmatprep.mubr.msk.bf16.mxu0 %vm7261_vm2, %v7260_v52 }
0x1373   : > { %v6836_v7 = vpop.f32.mrf.mxu0 }
0x1374   : > { %v5171_v28 = vadd.f32 %v6836_v7, %v5079_v20  ;;  %v7027_v7 = vld [vmem:[%s9515_s1] sm:$0xff]   ;;  %s422_s1 = sand.u32 1, %s7249_s18  }
0x1375   : > { %v5162_v27 = vpop.f32.mrf.mxu0  ;;  %s5503_s14 = sshll.u32 %s422_s1, 4  ;;  %s9575_s29 = scalar_lea.sflag [#allocation3], %s422_s1 }
0x1376   : > { %v5163_v50 = vadd.f32 %v5162_v27, %v5079_v20  ;;  %s424_s0 = scalar_lea.vmem [#allocation2], %s5503_s14 }
0x1377   : > { %v6837_v47 = vpop.f32.mrf.mxu0 }
0x1378   : > { %v5174_v14 = vadd.f32 %v6837_v47, %v5079_v20  ;;  %v5225_v1 = vadd.f32 %v5163_v50, %v9437_v42  ;;  %v7196_v42 = vld [vmem:[%s9620_s5] sm:$0xf] }
0x1379   : > { %v5165_v36 = vpop.f32.mrf.mxu0 }
0x137a   : > { %v5166_v33 = vadd.f32 %v5165_v36, %v5079_v20 }
0x1383   : > { %v6840_v10 = vpop.f32.mrf.mxu0 }
0x1384   : > { %v5187_v24 = vadd.f32 %v6840_v10, %v5079_v20 }
0x1385   : > { %v5178_v26 = vpop.f32.mrf.mxu0 }
0x1386   : > { %v5179_v60 = vadd.f32 %v5178_v26, %v5079_v20 }
0x1387   : > { %v6841_v0 = vpop.f32.mrf.mxu0 }
0x1389   : > { %v5181_v41 = vpop.f32.mrf.mxu0 }
0x138a   : > { %v5182_v62 = vadd.f32 %v5181_v41, %v5079_v20 }
0x1393   : > { %v6844_v8 = vpop.f32.mrf.mxu0 }
0x1394   : > { %v5203_v21 = vadd.f32 %v6844_v8, %v5079_v20 }
0x1395   : > { %v5194_v34 = vpop.f32.mrf.mxu0 }
0x1396   : > { %v5195_v46 = vadd.f32 %v5194_v34, %v5079_v20 }
0x1397   : > { %v6845_v19 = vpop.f32.mrf.mxu0 }
0x1398   : > { %v5206_v13 = vadd.f32 %v6845_v19, %v5079_v20 }
0x1399   : > { %v5197_v4 = vpop.f32.mrf.mxu0 }
0x139a   : > { %v5236_v31 = vadd.f32 %v5206_v13, %v9463_v5  ;;  %v5198_v18 = vadd.f32 %v5197_v4, %v5079_v20 }
0x13a3   : > { %v6848_v17 = vpop.f32.mrf.mxu0 }
0x13a4   : > { %v5219_v11 = vadd.f32 %v6848_v17, %v5079_v20 }
0x13a5   : > { %v5210_v45 = vpop.f32.mrf.mxu0 }
0x13a6   : > { %v5239_v49 = vadd.f32 %v5219_v11, %v9483_v32  ;;  %v5211_v43 = vadd.f32 %v5210_v45, %v5079_v20  ;;  %v5235_v32 = vadd.f32 %v5203_v21, %v9469_v55  ;;  %v5231_v55 = vadd.f32 %v5187_v24, %v9455_v39 }
0x13a7   : > { %v6849_v16 = vpop.f32.mrf.mxu0  ;;  %v5227_v39 = vadd.f32 %v5171_v28, %v9441_v63  ;;  %v5299_v63 = vrot.slane %v7196_v42, 1 }
0x13a8   : > { %v5222_v40 = vadd.f32 %v6849_v16, %v5079_v20  ;;  %v5237_v44 = vadd.f32 %v5211_v43, %v9479_v54  ;;  %v5248_v58 = vpack.c.bf16 %v5236_v31, %v5235_v32  ;;  %v5233_v54 = vadd.f32 %v5195_v46, %v9465_v56 }
0x13a9   : > { %v5213_v12 = vpop.f32.mrf.mxu0  ;;  %v5229_v56 = vadd.f32 %v5179_v60, %v9451_v22  ;;  %5300 = vrot.lane.b32.xlu1 %v5299_v63, %s7259_s15  ;;  %s5401_s15 = sshll.u32 %s424_s0, 4  ;;  %s9568_s15 = int_to_ptr.vmem [resolvable:$true] %s5401_s15 }
0x13aa   : > { %v5240_v15 = vadd.f32 %v5222_v40, %v9477_v30  ;;  %v5214_v59 = vadd.f32 %v5213_v12, %v5079_v20  ;;  %v5190_v30 = vadd.f32 %v6841_v0, %v5079_v20  ;;  %s7197_s30 = scalar_lea.vmem %s9568_s15, 256  ;;  %p7204_p0 = scmp.lt.s32.totalorder %s9568_s15, %s7202_s12 }
0x13ab   : > { %p7198_p11 = scmp.ne.s32.totalorder %s9568_s15, %s7197_s30  ;;  %p7205_p1 = scmp.lt.s32.totalorder %s7203_s13, %s7197_s30 }
0x13ac   : > { %v5250_v37 = vpack.c.bf16 %v5240_v15, %v5239_v49  ;;  %v5238_v48 = vadd.f32 %v5214_v59, %v9481_v9  ;;  %v5234_v9 = vadd.f32 %v5198_v18, %v9467_v29  ;;  %v5232_v5 = vadd.f32 %v5190_v30, %v9449_v61 }
0x13ad   : > { %v5230_v29 = vadd.f32 %v5182_v62, %v9453_v53  ;;  %v5228_v61 = vadd.f32 %v5174_v14, %v9435_v25  ;;  %v5226_v53 = vadd.f32 %v5166_v33, %v9439_v57  ;;  %v7030_v25 = vld [vmem:[%s9625_s10 + $0x8] sm:$0xff]   ;;  %v7031_v57 = vld [vmem:[%s9625_s10] sm:$0xff]   ;;  %p7199_p12 = pnand %p7198_p11, %p7363_p5  ;;  %p7206_p2 = por %p7205_p1, %p7204_p0 }
0x13ae   : > { %6851 = vmatpush3.bf16.msra.mxu1 %v5250_v37  ;;  %v5249_v51 = vpack.c.bf16 %v5238_v48, %v5237_v44  ;;  %v5247_v23 = vpack.c.bf16 %v5234_v9, %v5233_v54  ;;  %v5246_v6 = vpack.c.bf16 %v5232_v5, %v5231_v55  ;;  %6875 = vmatpush3.bf16.msra.mxu0 %v7030_v25 }
0x13af   : > { %6852 = vmatprep.subr.bf16.mxu1 %v7260_v52  ;;  %v5245_v3 = vpack.c.bf16 %v5230_v29, %v5229_v56  ;;  %v5244_v35 = vpack.c.bf16 %v5228_v61, %v5227_v39  ;;  %v5243_v22 = vpack.c.bf16 %v5226_v53, %v5225_v1  ;;  %6876 = vmatprep.subr.bf16.mxu0 %v7260_v52  ;;  %p7200_p13 = pneg %p7199_p12 }
0x13b1   : > { %p7207_p3 = pnand %p7206_p2, %p7200_p13 }
0x13b2   : > { %6853 = vmatpush3.bf16.msra.mxu1 %v5249_v51  ;;  %6877 = vmatpush3.bf16.msra.mxu0 %v7031_v57 }
0x13b3   : > { %6854 = vmatprep.subr.bf16.mxu1 %v7260_v52 }
0x13b6   : > { %6855 = vmatpush3.bf16.msra.mxu1 %v5248_v58 }
0x13b7   : > { %6856 = vmatprep.subr.bf16.mxu1 %v7260_v52 }
0x13ba   : > { %6857 = vmatpush3.bf16.msra.mxu1 %v5247_v23 }
0x13bb   : > { %6858 = vmatprep.subr.bf16.mxu1 %v7260_v52 }
0x13be   : > { %6859 = vmatpush3.bf16.msra.mxu1 %v5246_v6 }
0x13bf   : > { %6860 = vmatprep.subr.bf16.mxu1 %v7260_v52 }
0x13c2   : > { %6861 = vmatpush3.bf16.msra.mxu1 %v5245_v3 }
0x13c3   : > { %6862 = vmatprep.subr.bf16.mxu1 %v7260_v52 }
0x13c6   : > { %6863 = vmatpush3.bf16.msra.mxu1 %v5244_v35 }
0x13c7   : > { %6864 = vmatprep.subr.bf16.mxu1 %v7260_v52 }
0x13ca   : > { %6865 = vmatpush3.bf16.msra.mxu1 %v5243_v22 }
0x13cd   : > { %6867 = vmatmul.mubr.bf16.vlgmr.msra.gmra.mxu1 %v7027_v7 }
0x141b   : > { %v5301_v52 = vpop.permute.xlu1 %5300 }
0x141c   : > { %v5303_v0 = vsel %vm1059_vm1, %v7196_v42, %v5301_v52 }
0x141d   : > { %v5316_v41 = vrot.slane %v5303_v0, %v9869_v38 }
0x148d   : > { %v5291_v27 = vpop.f32.mrf.mxu1 }
0x148f   : > { %v6868_v47 = vpop.f32.mrf.mxu1 }
0x1491   : > { %v5294_v36 = vpop.f32.mrf.mxu1 }
0x1492   : > { %v5304_v10 = vpack.c.bf16 %v5294_v36, %v5291_v27 }
0x1493   : > { %v6869_v26 = vpop.f32.mrf.mxu1 }
0x1494   : > { %6879 = vmatmul.mubr.msk.bf16.vlgmr.msra.gmra.mxu0 %vm1059_vm1, %v5304_v10 }
0x1554   : > { %v5378_v8 = vpop.f32.mrf.mxu0 }
0x1555   : > { %v5379_v34 = vadd.f32 %v5378_v8, %v5316_v41 }
0x1556   : > { %v6880_v19 = vpop.f32.mrf.mxu0 }
0x1557   : > { %5385 = vst [vmem:[%s424_s0] sm:$0xff] %v5379_v34 }
0x1558   : > { %v5381_v4 = vpop.f32.mrf.mxu0 }
0x1559   : > { %v5382_v38 = vadd.f32 %v5381_v4, %v5316_v41 }
0x155a   : > { %v6881_v17 = vpop.f32.mrf.mxu0 }
0x155b   : > { %5386 = vst [vmem:[%s424_s0 + $0x8] sm:$0xff] %v5382_v38 }
0x155c   : > { %7210 = shalt.err (!%p7207_p3)
}
0x155d   : > { %s7211_s1 = scalar_lea.hbm %s9573_s25, 256  ;;  %s7215_s22 = scalar_lea.hbm %s9626_s11, 512 }
0x155e   : > { %p7212_p4 = scmp.ne.s32.totalorder %s9573_s25, %s7211_s1  ;;  %p7216_p9 = scmp.lt.s32.totalorder %s9573_s25, %s9626_s11 }
0x155f   : > { %p7217_p10 = scmp.lt.s32.totalorder %s7215_s22, %s7211_s1 }
0x1560   : > { %p7213_p7 = pnand %p7212_p4, %p7363_p5 }
0x1561   : > { %p7218_p11 = por %p7217_p10, %p7216_p9 }
0x1562   : > { %p7214_p8 = pneg %p7213_p7 }
0x1564   : > { %p7219_p12 = pnand %p7218_p11, %p7214_p8 }
0x1566   : > { %7222 = shalt.err (!%p7219_p12)
}
0x1567   : > { %s7263_s30 = smov 128   ;;  %s7264_s21 = smov 8  }
0x1568   : > { %6883 = dma.vmem_to_hbm [thread:$0]  (%p7363_p5), %s9568_s15, 256, %s9573_s25, %s9575_s29, %s7263_s30, %s7263_s30, %s7264_s21  }
0x1569 PF: > { %p6889_p13 = scmp.ge.s32.totalorder %s7257_s20, 2  ;;  %s5416_s12 = sand.u32 1, %s7245_s17  }
0x156a   : > { %s5417_s13 = scalar_lea.sflag [#allocation3], %s5416_s12 }
0x156b   : > { %p6886_p0 = pnand %p6889_p13, %p7367_p6 }
0x156d   : > { %p6887_p1 = pneg %p6886_p0 }
0x156f   : > { %7240 = dma.done.wait (%p6887_p1), %s5417_s13, 256  }
0x1570   : > { %7242 = vsyncadd (%p6887_p1), %s5417_s13, 4294967040  ;;  %p21_p2 = scmp.ge.s32.totalorder %s7350_s23, 4   ;;  %s9874_s17 = smov %s7249_s18 }
0x1571   : > { %s9875_s18 = smov %s7253_s19  ;;  %s9876_s19 = smov %s7361_s26 }
0x1572   : > { %s9877_s20 = smov %s7350_s23  ;;  %23 = sbr.rel (!%p21_p2) target bundleno = 6 (0x6), region = 119 }
0x1577   :  { %5422 = vsyncpa [#allocation3], 1 }
0x1578   :  { %5424 = vsyncpa [#allocation3 + $0x1], 1 }

</bundles_post_ra>
